<compile_context>
chip_gen: v6e
topology: v6e:2x2x1
jax: 0.10.0
libtpu: 0.0.40
codegen_flags: <defaults>
</compile_context>

<pallas_src>
import functools

import jax
import jax.numpy as jnp
import numpy as np
from jax.experimental import pallas as pl
from jax.experimental.pallas import tpu as pltpu

EPS = 1e-5       # PyTorch BatchNorm default eps
ACTIONS = 3
HEAD_PAD = 128   # lane-dense head output width (lanes 0..2 probs, lane 3 value)


def _round8(n):
    return ((n + 7) // 8) * 8


def _row_plan(B):
    """Row counts for the shifted-matmul conv buffers (row = h*9*B + w*B + b)."""
    d_max = 20 * B                                  # max tap shift (kh=kw=2)
    a3 = _round8(21 * B)                            # rows the LSTM flatten reads
    a2 = _round8(a3 + d_max)
    a1 = _round8(a2 + d_max)
    r0 = _round8(max(81 * B, a1 + d_max))           # padded input rows
    return r0, a1, a2, a3


# ---------------------------------------------------------------------------
# Single fused kernel: conv stack + 2 LSTM cells + lin2 + heads
# ---------------------------------------------------------------------------
def policy_kernel(B, H, rows,
                  x_ref,
                  w1_ref, t1_ref, w2_ref, t2_ref, w3_ref, t3_ref,
                  wx1_ref, wh1_ref, b1_ref,
                  wx2_ref, wh2_ref, b2_ref,
                  w2a_ref, w2b_ref, tl2_ref,
                  wav_ref, bav_ref,
                  h0_ref, c0_ref, h1_ref, c1_ref,
                  pv_ref, st_ref,
                  a1_ref, a2_ref, a3_ref):
    _, r1, r2, r3 = rows

    def conv(in_ref, out_ref, w_ref, t_ref, rows_out):
        cout = w_ref.shape[2]
        acc = jnp.zeros((rows_out, cout), jnp.float32)
        for kh in range(3):
            for kw in range(3):
                d = (kh * 9 + kw) * B
                tap = in_ref[d:d + rows_out, :].astype(jnp.bfloat16)
                acc = acc + jnp.dot(tap, w_ref[kh * 3 + kw],
                                    preferred_element_type=jnp.float32)
        # folded-BN shift + ReLU (scale already folded into the weights)
        out_ref[...] = jnp.maximum(acc + t_ref[...], 0.0)

    conv(x_ref, a1_ref, w1_ref, t1_ref, r1)      # 15 -> 256
    conv(a1_ref, a2_ref, w2_ref, t2_ref, r2)     # 256 -> 128
    conv(a2_ref, a3_ref, w3_ref, t3_ref, r3)     # 128 -> 64

    def lstm_update(gates, c_prev):
        i = jax.nn.sigmoid(gates[:, 0:H])
        f = jax.nn.sigmoid(gates[:, H:2 * H])
        g = jnp.tanh(gates[:, 2 * H:3 * H])
        o = jax.nn.sigmoid(gates[:, 3 * H:4 * H])
        c_new = f * c_prev + i * g
        return o * jnp.tanh(c_new), c_new

    # rnn1: input path accumulated over the 9 valid conv3 spatial positions
    gates = b1_ref[...]
    for hh in range(3):
        for ww in range(3):
            off = (hh * 9 + ww) * B
            xs = a3_ref[off:off + B, :].astype(jnp.bfloat16)
            gates = gates + jnp.dot(xs, wx1_ref[hh * 3 + ww],
                                    preferred_element_type=jnp.float32)
    gates = gates + jnp.dot(h0_ref[...].astype(jnp.bfloat16), wh1_ref[...],
                            preferred_element_type=jnp.float32)
    h0n, c0n = lstm_update(gates, c0_ref[...])

    # rnn2
    gates2 = (b2_ref[...]
              + jnp.dot(h0n.astype(jnp.bfloat16), wx2_ref[...],
                        preferred_element_type=jnp.float32)
              + jnp.dot(h1_ref[...].astype(jnp.bfloat16), wh2_ref[...],
                        preferred_element_type=jnp.float32))
    h1n, c1n = lstm_update(gates2, c1_ref[...])

    # lin2 (+ folded bnLin2) + ReLU, split as two dots over [h0n | h1n]
    h2 = jnp.maximum(
        tl2_ref[...]
        + jnp.dot(h0n.astype(jnp.bfloat16), w2a_ref[...],
                  preferred_element_type=jnp.float32)
        + jnp.dot(h1n.astype(jnp.bfloat16), w2b_ref[...],
                  preferred_element_type=jnp.float32),
        0.0)

    # action + value heads packed into one lane-dense (B, 128) block
    av = jnp.dot(h2.astype(jnp.bfloat16), wav_ref[...],
                 preferred_element_type=jnp.float32) + bav_ref[...]
    lane = jax.lax.broadcasted_iota(jnp.int32, av.shape, 1)
    is_act = lane < ACTIONS
    masked = jnp.where(is_act, av, jnp.float32(-1e30))
    m = jnp.max(masked, axis=-1, keepdims=True)
    e = jnp.where(is_act, jnp.exp(masked - m), 0.0)
    probs = e / jnp.sum(e, axis=-1, keepdims=True)
    pv_ref[...] = jnp.where(lane == ACTIONS, av, probs)

    # packed recurrent state (B, 4H) = [h0 | c0 | h1 | c1]
    st_ref[:, 0:H] = h0n
    st_ref[:, H:2 * H] = c0n
    st_ref[:, 2 * H:3 * H] = h1n
    st_ref[:, 3 * H:4 * H] = c1n


# ---------------------------------------------------------------------------
# Parameter construction (deterministic, synthetic; BN folded, bf16 matmul wts)
# ---------------------------------------------------------------------------
def init_params(key, H):
    keys = iter(jax.random.split(key, 64))

    def nrm(shape, scale=0.05):
        return scale * jax.random.normal(next(keys), shape, dtype=jnp.float32)

    def bn(n):
        gamma = 1.0 + nrm((n,))
        beta = nrm((n,))
        mean = nrm((n,))
        var = 1.0 + jnp.abs(nrm((n,)))
        return gamma, beta, mean, var

    p = {}
    # conv stack: 15 -> 256 -> 128 -> 64, all 3x3 valid, BN folded into weights
    for idx, (cin, cout) in enumerate([(15, 256), (256, 128), (128, 64)], 1):
        w = nrm((cout, cin, 3, 3))
        b = nrm((cout,))
        gamma, beta, mean, var = bn(cout)
        s = gamma * jax.lax.rsqrt(var + EPS)
        t = beta + (b - mean) * s
        wf = w * s[:, None, None, None]
        # per-tap matrices (9, cin, cout): tap (kh, kw) -> w[:, :, kh, kw].T
        p[f"conv{idx}_w"] = wf.transpose(2, 3, 1, 0).reshape(9, cin, cout).astype(jnp.bfloat16)
        p[f"conv{idx}_t"] = t.reshape(1, cout)

    # LSTM cells (gate order i, f, g, o); bias = b_ih + b_hh
    lin_size = 64 * 3 * 3
    for idx, insz in enumerate([lin_size, H], 1):
        w_ih = nrm((4 * H, insz))
        w_hh = nrm((4 * H, H))
        b = nrm((4 * H,)) + nrm((4 * H,))
        wx = w_ih.T                                   # (insz, 4H)
        if idx == 1:
            # torch flattens conv3 NCHW: feature = c*9 + h*3 + w.  Reorder to
            # our (h, w)-block / channel-minor layout and split into 9 blocks.
            perm = np.array([c * 9 + h * 3 + w
                             for h in range(3) for w in range(3) for c in range(64)])
            wx = wx[perm].reshape(9, 64, 4 * H)
        p[f"rnn{idx}_wx"] = wx.astype(jnp.bfloat16)
        p[f"rnn{idx}_wh"] = w_hh.T.astype(jnp.bfloat16)
        p[f"rnn{idx}_b"] = b.reshape(1, 4 * H)

    # lin2: (2H -> H) with bnLin2 folded; split over the [h0 | h1] concat
    w2 = nrm((H, 2 * H))
    b2 = nrm((H,))
    gamma, beta, mean, var = bn(H)
    s2 = gamma * jax.lax.rsqrt(var + EPS)
    t2 = beta + (b2 - mean) * s2
    w2t = w2.T * s2[None, :]                          # (2H, H), BN scale folded
    p["lin2_wa"] = w2t[:H].astype(jnp.bfloat16)
    p["lin2_wb"] = w2t[H:].astype(jnp.bfloat16)
    p["lin2_t"] = t2.reshape(1, H)

    # heads padded into a single lane-dense (H, 128) block
    wa = nrm((ACTIONS, H))
    ba = nrm((ACTIONS,))
    wv = nrm((1, H))
    bv = nrm((1,))
    wav = jnp.zeros((H, HEAD_PAD), jnp.float32)
    wav = wav.at[:, :ACTIONS].set(wa.T).at[:, ACTIONS].set(wv[0])
    bav = jnp.zeros((1, HEAD_PAD), jnp.float32)
    bav = bav.at[0, :ACTIONS].set(ba).at[0, ACTIONS].set(bv[0])
    p["head_w"] = wav.astype(jnp.bfloat16)
    p["head_b"] = bav
    return p


# ---------------------------------------------------------------------------
# Full forward pass (mirrors Policy.forward) — one fused pallas_call
# ---------------------------------------------------------------------------
@jax.jit
def policy_forward(params, x, hidden_states):
    B = x.shape[0]
    H = hidden_states[0][0].shape[1]
    rows = _row_plan(B)
    r0 = rows[0]

    # NCHW -> (row = h*9*B + w*B + b, channel) layout, zero-padded rows.
    xr = jnp.transpose(x, (2, 3, 0, 1)).reshape(81 * B, x.shape[1]).astype(jnp.float32)
    xr = jnp.pad(xr, ((0, r0 - 81 * B), (0, 0)))

    vmem = pl.BlockSpec(memory_space=pltpu.MemorySpace.VMEM)
    pv, st = pl.pallas_call(
        functools.partial(policy_kernel, B, H, rows),
        out_shape=(jax.ShapeDtypeStruct((B, HEAD_PAD), jnp.float32),
                   jax.ShapeDtypeStruct((B, 4 * H), jnp.float32)),
        in_specs=[vmem] * 22,
        out_specs=(vmem, vmem),
        scratch_shapes=[pltpu.VMEM((rows[1], 256), jnp.float32),
                        pltpu.VMEM((rows[2], 128), jnp.float32),
                        pltpu.VMEM((rows[3], 64), jnp.float32)],
    )(xr,
      params["conv1_w"], params["conv1_t"],
      params["conv2_w"], params["conv2_t"],
      params["conv3_w"], params["conv3_t"],
      params["rnn1_wx"], params["rnn1_wh"], params["rnn1_b"],
      params["rnn2_wx"], params["rnn2_wh"], params["rnn2_b"],
      params["lin2_wa"], params["lin2_wb"], params["lin2_t"],
      params["head_w"], params["head_b"],
      hidden_states[0][0], hidden_states[0][1],
      hidden_states[1][0], hidden_states[1][1])

    probs = pv[:, :ACTIONS]
    values = pv[:, ACTIONS:ACTIONS + 1]
    all_hidden = [(st[:, 0:H], st[:, H:2 * H]),
                  (st[:, 2 * H:3 * H], st[:, 3 * H:4 * H])]
    return probs, values, all_hidden


# TODO(synk): BatchNorm layers use eval-mode (running-stat) semantics; PyTorch
# train-mode batch statistics are not reproduced.

if __name__ == "__main__":
    hidden_size = 32
    B = 2
    key = jax.random.PRNGKey(0)
    pkey, xkey = jax.random.split(key)

    params = init_params(pkey, hidden_size)
    x = jax.random.normal(xkey, (B, 15, 9, 9), dtype=jnp.float32)
    hidden_states = [
        (jnp.zeros((B, hidden_size), jnp.float32),
         jnp.zeros((B, hidden_size), jnp.float32)),
        (jnp.zeros((B, hidden_size), jnp.float32),
         jnp.zeros((B, hidden_size), jnp.float32)),
    ]

    probs, values, all_hidden = policy_forward(params, x, hidden_states)
    jax.block_until_ready((probs, values, all_hidden))

    assert probs.shape == (B, ACTIONS) and values.shape == (B, 1)
    assert all(h.shape == (B, hidden_size) and c.shape == (B, hidden_size)
               for (h, c) in all_hidden)
    assert bool(jnp.all(jnp.isfinite(probs))) and bool(jnp.all(jnp.isfinite(values)))
    assert bool(jnp.allclose(jnp.sum(probs, axis=1), 1.0, atol=1e-3))
    print("KERNEL_OK")
</pallas_src>

<mosaic_0001>
module attributes {stable_mosaic.version = 11 : i64} {
  func.func @policy_kernel(%arg0: memref<168x15xf32, #tpu.memory_space<vmem>>, %arg1: memref<9x15x256xbf16, #tpu.memory_space<vmem>>, %arg2: memref<1x256xf32, #tpu.memory_space<vmem>>, %arg3: memref<9x256x128xbf16, #tpu.memory_space<vmem>>, %arg4: memref<1x128xf32, #tpu.memory_space<vmem>>, %arg5: memref<9x128x64xbf16, #tpu.memory_space<vmem>>, %arg6: memref<1x64xf32, #tpu.memory_space<vmem>>, %arg7: memref<9x64x128xbf16, #tpu.memory_space<vmem>>, %arg8: memref<32x128xbf16, #tpu.memory_space<vmem>>, %arg9: memref<1x128xf32, #tpu.memory_space<vmem>>, %arg10: memref<32x128xbf16, #tpu.memory_space<vmem>>, %arg11: memref<32x128xbf16, #tpu.memory_space<vmem>>, %arg12: memref<1x128xf32, #tpu.memory_space<vmem>>, %arg13: memref<32x32xbf16, #tpu.memory_space<vmem>>, %arg14: memref<32x32xbf16, #tpu.memory_space<vmem>>, %arg15: memref<1x32xf32, #tpu.memory_space<vmem>>, %arg16: memref<32x128xbf16, #tpu.memory_space<vmem>>, %arg17: memref<1x128xf32, #tpu.memory_space<vmem>>, %arg18: memref<2x32xf32, #tpu.memory_space<vmem>>, %arg19: memref<2x32xf32, #tpu.memory_space<vmem>>, %arg20: memref<2x32xf32, #tpu.memory_space<vmem>>, %arg21: memref<2x32xf32, #tpu.memory_space<vmem>>, %arg22: memref<2x128xf32, #tpu.memory_space<vmem>>, %arg23: memref<2x128xf32, #tpu.memory_space<vmem>>, %arg24: memref<128x256xf32, #tpu.memory_space<vmem>>, %arg25: memref<88x128xf32, #tpu.memory_space<vmem>>, %arg26: memref<48x64xf32, #tpu.memory_space<vmem>>) attributes {dimension_semantics = [], scalar_prefetch = 0 : i64, scratch_operands = 3 : i64, tpu.core_type = #tpu.core_type<tc>} {
    %cst = arith.constant 0.000000e+00 : f32
    %0 = vector.broadcast %cst : f32 to vector<128x256xf32>
    %c0 = arith.constant 0 : index
    %c0_0 = arith.constant 0 : index
    %1 = vector.load %arg0[%c0, %c0_0] : memref<168x15xf32, #tpu.memory_space<vmem>>, vector<128x15xf32>
    %2 = arith.truncf %1 : vector<128x15xf32> to vector<128x15xbf16>
    %c0_1 = arith.constant 0 : index
    %c0_2 = arith.constant 0 : index
    %c0_3 = arith.constant 0 : index
    %3 = vector.load %arg1[%c0_1, %c0_2, %c0_3] : memref<9x15x256xbf16, #tpu.memory_space<vmem>>, vector<1x15x256xbf16>
    %4 = vector.shape_cast %3 : vector<1x15x256xbf16> to vector<15x256xbf16>
    %cst_4 = arith.constant dense<0.000000e+00> : vector<128x256xf32>
    %5 = tpu.matmul %2, %4, %cst_4 {dimension_numbers = #tpu.dot_dimension_numbers<[1], [0], [0], [1], [0, 0, 1, 1], [], []>} : vector<128x15xbf16>, vector<15x256xbf16>, vector<128x256xf32> -> vector<128x256xf32>
    %6 = arith.addf %0, %5 : vector<128x256xf32>
    %c2 = arith.constant 2 : index
    %c0_5 = arith.constant 0 : index
    %7 = vector.load %arg0[%c2, %c0_5] : memref<168x15xf32, #tpu.memory_space<vmem>>, vector<128x15xf32>
    %8 = arith.truncf %7 : vector<128x15xf32> to vector<128x15xbf16>
    %c1 = arith.constant 1 : index
    %c0_6 = arith.constant 0 : index
    %c0_7 = arith.constant 0 : index
    %9 = vector.load %arg1[%c1, %c0_6, %c0_7] : memref<9x15x256xbf16, #tpu.memory_space<vmem>>, vector<1x15x256xbf16>
    %10 = vector.shape_cast %9 : vector<1x15x256xbf16> to vector<15x256xbf16>
    %cst_8 = arith.constant dense<0.000000e+00> : vector<128x256xf32>
    %11 = tpu.matmul %8, %10, %cst_8 {dimension_numbers = #tpu.dot_dimension_numbers<[1], [0], [0], [1], [0, 0, 1, 1], [], []>} : vector<128x15xbf16>, vector<15x256xbf16>, vector<128x256xf32> -> vector<128x256xf32>
    %12 = arith.addf %6, %11 : vector<128x256xf32>
    %c4 = arith.constant 4 : index
    %c0_9 = arith.constant 0 : index
    %13 = vector.load %arg0[%c4, %c0_9] : memref<168x15xf32, #tpu.memory_space<vmem>>, vector<128x15xf32>
    %14 = arith.truncf %13 : vector<128x15xf32> to vector<128x15xbf16>
    %c2_10 = arith.constant 2 : index
    %c0_11 = arith.constant 0 : index
    %c0_12 = arith.constant 0 : index
    %15 = vector.load %arg1[%c2_10, %c0_11, %c0_12] : memref<9x15x256xbf16, #tpu.memory_space<vmem>>, vector<1x15x256xbf16>
    %16 = vector.shape_cast %15 : vector<1x15x256xbf16> to vector<15x256xbf16>
    %cst_13 = arith.constant dense<0.000000e+00> : vector<128x256xf32>
    %17 = tpu.matmul %14, %16, %cst_13 {dimension_numbers = #tpu.dot_dimension_numbers<[1], [0], [0], [1], [0, 0, 1, 1], [], []>} : vector<128x15xbf16>, vector<15x256xbf16>, vector<128x256xf32> -> vector<128x256xf32>
    %18 = arith.addf %12, %17 : vector<128x256xf32>
    %c18 = arith.constant 18 : index
    %c0_14 = arith.constant 0 : index
    %19 = vector.load %arg0[%c18, %c0_14] : memref<168x15xf32, #tpu.memory_space<vmem>>, vector<128x15xf32>
    %20 = arith.truncf %19 : vector<128x15xf32> to vector<128x15xbf16>
    %c3 = arith.constant 3 : index
    %c0_15 = arith.constant 0 : index
    %c0_16 = arith.constant 0 : index
    %21 = vector.load %arg1[%c3, %c0_15, %c0_16] : memref<9x15x256xbf16, #tpu.memory_space<vmem>>, vector<1x15x256xbf16>
    %22 = vector.shape_cast %21 : vector<1x15x256xbf16> to vector<15x256xbf16>
    %cst_17 = arith.constant dense<0.000000e+00> : vector<128x256xf32>
    %23 = tpu.matmul %20, %22, %cst_17 {dimension_numbers = #tpu.dot_dimension_numbers<[1], [0], [0], [1], [0, 0, 1, 1], [], []>} : vector<128x15xbf16>, vector<15x256xbf16>, vector<128x256xf32> -> vector<128x256xf32>
    %24 = arith.addf %18, %23 : vector<128x256xf32>
    %c20 = arith.constant 20 : index
    %c0_18 = arith.constant 0 : index
    %25 = vector.load %arg0[%c20, %c0_18] : memref<168x15xf32, #tpu.memory_space<vmem>>, vector<128x15xf32>
    %26 = arith.truncf %25 : vector<128x15xf32> to vector<128x15xbf16>
    %c4_19 = arith.constant 4 : index
    %c0_20 = arith.constant 0 : index
    %c0_21 = arith.constant 0 : index
    %27 = vector.load %arg1[%c4_19, %c0_20, %c0_21] : memref<9x15x256xbf16, #tpu.memory_space<vmem>>, vector<1x15x256xbf16>
    %28 = vector.shape_cast %27 : vector<1x15x256xbf16> to vector<15x256xbf16>
    %cst_22 = arith.constant dense<0.000000e+00> : vector<128x256xf32>
    %29 = tpu.matmul %26, %28, %cst_22 {dimension_numbers = #tpu.dot_dimension_numbers<[1], [0], [0], [1], [0, 0, 1, 1], [], []>} : vector<128x15xbf16>, vector<15x256xbf16>, vector<128x256xf32> -> vector<128x256xf32>
    %30 = arith.addf %24, %29 : vector<128x256xf32>
    %c22 = arith.constant 22 : index
    %c0_23 = arith.constant 0 : index
    %31 = vector.load %arg0[%c22, %c0_23] : memref<168x15xf32, #tpu.memory_space<vmem>>, vector<128x15xf32>
    %32 = arith.truncf %31 : vector<128x15xf32> to vector<128x15xbf16>
    %c5 = arith.constant 5 : index
    %c0_24 = arith.constant 0 : index
    %c0_25 = arith.constant 0 : index
    %33 = vector.load %arg1[%c5, %c0_24, %c0_25] : memref<9x15x256xbf16, #tpu.memory_space<vmem>>, vector<1x15x256xbf16>
    %34 = vector.shape_cast %33 : vector<1x15x256xbf16> to vector<15x256xbf16>
    %cst_26 = arith.constant dense<0.000000e+00> : vector<128x256xf32>
    %35 = tpu.matmul %32, %34, %cst_26 {dimension_numbers = #tpu.dot_dimension_numbers<[1], [0], [0], [1], [0, 0, 1, 1], [], []>} : vector<128x15xbf16>, vector<15x256xbf16>, vector<128x256xf32> -> vector<128x256xf32>
    %36 = arith.addf %30, %35 : vector<128x256xf32>
    %c36 = arith.constant 36 : index
    %c0_27 = arith.constant 0 : index
    %37 = vector.load %arg0[%c36, %c0_27] : memref<168x15xf32, #tpu.memory_space<vmem>>, vector<128x15xf32>
    %38 = arith.truncf %37 : vector<128x15xf32> to vector<128x15xbf16>
    %c6 = arith.constant 6 : index
    %c0_28 = arith.constant 0 : index
    %c0_29 = arith.constant 0 : index
    %39 = vector.load %arg1[%c6, %c0_28, %c0_29] : memref<9x15x256xbf16, #tpu.memory_space<vmem>>, vector<1x15x256xbf16>
    %40 = vector.shape_cast %39 : vector<1x15x256xbf16> to vector<15x256xbf16>
    %cst_30 = arith.constant dense<0.000000e+00> : vector<128x256xf32>
    %41 = tpu.matmul %38, %40, %cst_30 {dimension_numbers = #tpu.dot_dimension_numbers<[1], [0], [0], [1], [0, 0, 1, 1], [], []>} : vector<128x15xbf16>, vector<15x256xbf16>, vector<128x256xf32> -> vector<128x256xf32>
    %42 = arith.addf %36, %41 : vector<128x256xf32>
    %c38 = arith.constant 38 : index
    %c0_31 = arith.constant 0 : index
    %43 = vector.load %arg0[%c38, %c0_31] : memref<168x15xf32, #tpu.memory_space<vmem>>, vector<128x15xf32>
    %44 = arith.truncf %43 : vector<128x15xf32> to vector<128x15xbf16>
    %c7 = arith.constant 7 : index
    %c0_32 = arith.constant 0 : index
    %c0_33 = arith.constant 0 : index
    %45 = vector.load %arg1[%c7, %c0_32, %c0_33] : memref<9x15x256xbf16, #tpu.memory_space<vmem>>, vector<1x15x256xbf16>
    %46 = vector.shape_cast %45 : vector<1x15x256xbf16> to vector<15x256xbf16>
    %cst_34 = arith.constant dense<0.000000e+00> : vector<128x256xf32>
    %47 = tpu.matmul %44, %46, %cst_34 {dimension_numbers = #tpu.dot_dimension_numbers<[1], [0], [0], [1], [0, 0, 1, 1], [], []>} : vector<128x15xbf16>, vector<15x256xbf16>, vector<128x256xf32> -> vector<128x256xf32>
    %48 = arith.addf %42, %47 : vector<128x256xf32>
    %c40 = arith.constant 40 : index
    %c0_35 = arith.constant 0 : index
    %49 = vector.load %arg0[%c40, %c0_35] : memref<168x15xf32, #tpu.memory_space<vmem>>, vector<128x15xf32>
    %50 = arith.truncf %49 : vector<128x15xf32> to vector<128x15xbf16>
    %c8 = arith.constant 8 : index
    %c0_36 = arith.constant 0 : index
    %c0_37 = arith.constant 0 : index
    %51 = vector.load %arg1[%c8, %c0_36, %c0_37] : memref<9x15x256xbf16, #tpu.memory_space<vmem>>, vector<1x15x256xbf16>
    %52 = vector.shape_cast %51 : vector<1x15x256xbf16> to vector<15x256xbf16>
    %cst_38 = arith.constant dense<0.000000e+00> : vector<128x256xf32>
    %53 = tpu.matmul %50, %52, %cst_38 {dimension_numbers = #tpu.dot_dimension_numbers<[1], [0], [0], [1], [0, 0, 1, 1], [], []>} : vector<128x15xbf16>, vector<15x256xbf16>, vector<128x256xf32> -> vector<128x256xf32>
    %54 = arith.addf %48, %53 : vector<128x256xf32>
    %c0_39 = arith.constant 0 : index
    %c0_40 = arith.constant 0 : index
    %55 = vector.load %arg2[%c0_39, %c0_40] : memref<1x256xf32, #tpu.memory_space<vmem>>, vector<1x256xf32>
    %56 = vector.broadcast %55 : vector<1x256xf32> to vector<128x256xf32>
    %57 = arith.addf %54, %56 : vector<128x256xf32>
    %cst_41 = arith.constant 0.000000e+00 : f32
    %58 = vector.broadcast %cst_41 : f32 to vector<128x256xf32>
    %59 = arith.maximumf %57, %58 : vector<128x256xf32>
    %c0_42 = arith.constant 0 : index
    %c0_43 = arith.constant 0 : index
    %60 = vector.load %arg24[%c0_42, %c0_43] : memref<128x256xf32, #tpu.memory_space<vmem>>, vector<128x256xf32>
    tpu.vector_store %arg24[%c0_42, %c0_43], %59 {strides = array<i32>} : memref<128x256xf32, #tpu.memory_space<vmem>>, vector<128x256xf32>,
    %cst_44 = arith.constant 0.000000e+00 : f32
    %61 = vector.broadcast %cst_44 : f32 to vector<88x128xf32>
    %c0_45 = arith.constant 0 : index
    %c0_46 = arith.constant 0 : index
    %62 = vector.load %arg24[%c0_45, %c0_46] : memref<128x256xf32, #tpu.memory_space<vmem>>, vector<88x256xf32>
    %63 = arith.truncf %62 : vector<88x256xf32> to vector<88x256xbf16>
    %c0_47 = arith.constant 0 : index
    %c0_48 = arith.constant 0 : index
    %c0_49 = arith.constant 0 : index
    %64 = vector.load %arg3[%c0_47, %c0_48, %c0_49] : memref<9x256x128xbf16, #tpu.memory_space<vmem>>, vector<1x256x128xbf16>
    %65 = vector.shape_cast %64 : vector<1x256x128xbf16> to vector<256x128xbf16>
    %cst_50 = arith.constant dense<0.000000e+00> : vector<88x128xf32>
    %66 = tpu.matmul %63, %65, %cst_50 {dimension_numbers = #tpu.dot_dimension_numbers<[1], [0], [0], [1], [0, 0, 1, 1], [], []>} : vector<88x256xbf16>, vector<256x128xbf16>, vector<88x128xf32> -> vector<88x128xf32>
    %67 = arith.addf %61, %66 : vector<88x128xf32>
    %c2_51 = arith.constant 2 : index
    %c0_52 = arith.constant 0 : index
    %68 = vector.load %arg24[%c2_51, %c0_52] : memref<128x256xf32, #tpu.memory_space<vmem>>, vector<88x256xf32>
    %69 = arith.truncf %68 : vector<88x256xf32> to vector<88x256xbf16>
    %c1_53 = arith.constant 1 : index
    %c0_54 = arith.constant 0 : index
    %c0_55 = arith.constant 0 : index
    %70 = vector.load %arg3[%c1_53, %c0_54, %c0_55] : memref<9x256x128xbf16, #tpu.memory_space<vmem>>, vector<1x256x128xbf16>
    %71 = vector.shape_cast %70 : vector<1x256x128xbf16> to vector<256x128xbf16>
    %cst_56 = arith.constant dense<0.000000e+00> : vector<88x128xf32>
    %72 = tpu.matmul %69, %71, %cst_56 {dimension_numbers = #tpu.dot_dimension_numbers<[1], [0], [0], [1], [0, 0, 1, 1], [], []>} : vector<88x256xbf16>, vector<256x128xbf16>, vector<88x128xf32> -> vector<88x128xf32>
    %73 = arith.addf %67, %72 : vector<88x128xf32>
    %c4_57 = arith.constant 4 : index
    %c0_58 = arith.constant 0 : index
    %74 = vector.load %arg24[%c4_57, %c0_58] : memref<128x256xf32, #tpu.memory_space<vmem>>, vector<88x256xf32>
    %75 = arith.truncf %74 : vector<88x256xf32> to vector<88x256xbf16>
    %c2_59 = arith.constant 2 : index
    %c0_60 = arith.constant 0 : index
    %c0_61 = arith.constant 0 : index
    %76 = vector.load %arg3[%c2_59, %c0_60, %c0_61] : memref<9x256x128xbf16, #tpu.memory_space<vmem>>, vector<1x256x128xbf16>
    %77 = vector.shape_cast %76 : vector<1x256x128xbf16> to vector<256x128xbf16>
    %cst_62 = arith.constant dense<0.000000e+00> : vector<88x128xf32>
    %78 = tpu.matmul %75, %77, %cst_62 {dimension_numbers = #tpu.dot_dimension_numbers<[1], [0], [0], [1], [0, 0, 1, 1], [], []>} : vector<88x256xbf16>, vector<256x128xbf16>, vector<88x128xf32> -> vector<88x128xf32>
    %79 = arith.addf %73, %78 : vector<88x128xf32>
    %c18_63 = arith.constant 18 : index
    %c0_64 = arith.constant 0 : index
    %80 = vector.load %arg24[%c18_63, %c0_64] : memref<128x256xf32, #tpu.memory_space<vmem>>, vector<88x256xf32>
    %81 = arith.truncf %80 : vector<88x256xf32> to vector<88x256xbf16>
    %c3_65 = arith.constant 3 : index
    %c0_66 = arith.constant 0 : index
    %c0_67 = arith.constant 0 : index
    %82 = vector.load %arg3[%c3_65, %c0_66, %c0_67] : memref<9x256x128xbf16, #tpu.memory_space<vmem>>, vector<1x256x128xbf16>
    %83 = vector.shape_cast %82 : vector<1x256x128xbf16> to vector<256x128xbf16>
    %cst_68 = arith.constant dense<0.000000e+00> : vector<88x128xf32>
    %84 = tpu.matmul %81, %83, %cst_68 {dimension_numbers = #tpu.dot_dimension_numbers<[1], [0], [0], [1], [0, 0, 1, 1], [], []>} : vector<88x256xbf16>, vector<256x128xbf16>, vector<88x128xf32> -> vector<88x128xf32>
    %85 = arith.addf %79, %84 : vector<88x128xf32>
    %c20_69 = arith.constant 20 : index
    %c0_70 = arith.constant 0 : index
    %86 = vector.load %arg24[%c20_69, %c0_70] : memref<128x256xf32, #tpu.memory_space<vmem>>, vector<88x256xf32>
    %87 = arith.truncf %86 : vector<88x256xf32> to vector<88x256xbf16>
    %c4_71 = arith.constant 4 : index
    %c0_72 = arith.constant 0 : index
    %c0_73 = arith.constant 0 : index
    %88 = vector.load %arg3[%c4_71, %c0_72, %c0_73] : memref<9x256x128xbf16, #tpu.memory_space<vmem>>, vector<1x256x128xbf16>
    %89 = vector.shape_cast %88 : vector<1x256x128xbf16> to vector<256x128xbf16>
    %cst_74 = arith.constant dense<0.000000e+00> : vector<88x128xf32>
    %90 = tpu.matmul %87, %89, %cst_74 {dimension_numbers = #tpu.dot_dimension_numbers<[1], [0], [0], [1], [0, 0, 1, 1], [], []>} : vector<88x256xbf16>, vector<256x128xbf16>, vector<88x128xf32> -> vector<88x128xf32>
    %91 = arith.addf %85, %90 : vector<88x128xf32>
    %c22_75 = arith.constant 22 : index
    %c0_76 = arith.constant 0 : index
    %92 = vector.load %arg24[%c22_75, %c0_76] : memref<128x256xf32, #tpu.memory_space<vmem>>, vector<88x256xf32>
    %93 = arith.truncf %92 : vector<88x256xf32> to vector<88x256xbf16>
    %c5_77 = arith.constant 5 : index
    %c0_78 = arith.constant 0 : index
    %c0_79 = arith.constant 0 : index
    %94 = vector.load %arg3[%c5_77, %c0_78, %c0_79] : memref<9x256x128xbf16, #tpu.memory_space<vmem>>, vector<1x256x128xbf16>
    %95 = vector.shape_cast %94 : vector<1x256x128xbf16> to vector<256x128xbf16>
    %cst_80 = arith.constant dense<0.000000e+00> : vector<88x128xf32>
    %96 = tpu.matmul %93, %95, %cst_80 {dimension_numbers = #tpu.dot_dimension_numbers<[1], [0], [0], [1], [0, 0, 1, 1], [], []>} : vector<88x256xbf16>, vector<256x128xbf16>, vector<88x128xf32> -> vector<88x128xf32>
    %97 = arith.addf %91, %96 : vector<88x128xf32>
    %c36_81 = arith.constant 36 : index
    %c0_82 = arith.constant 0 : index
    %98 = vector.load %arg24[%c36_81, %c0_82] : memref<128x256xf32, #tpu.memory_space<vmem>>, vector<88x256xf32>
    %99 = arith.truncf %98 : vector<88x256xf32> to vector<88x256xbf16>
    %c6_83 = arith.constant 6 : index
    %c0_84 = arith.constant 0 : index
    %c0_85 = arith.constant 0 : index
    %100 = vector.load %arg3[%c6_83, %c0_84, %c0_85] : memref<9x256x128xbf16, #tpu.memory_space<vmem>>, vector<1x256x128xbf16>
    %101 = vector.shape_cast %100 : vector<1x256x128xbf16> to vector<256x128xbf16>
    %cst_86 = arith.constant dense<0.000000e+00> : vector<88x128xf32>
    %102 = tpu.matmul %99, %101, %cst_86 {dimension_numbers = #tpu.dot_dimension_numbers<[1], [0], [0], [1], [0, 0, 1, 1], [], []>} : vector<88x256xbf16>, vector<256x128xbf16>, vector<88x128xf32> -> vector<88x128xf32>
    %103 = arith.addf %97, %102 : vector<88x128xf32>
    %c38_87 = arith.constant 38 : index
    %c0_88 = arith.constant 0 : index
    %104 = vector.load %arg24[%c38_87, %c0_88] : memref<128x256xf32, #tpu.memory_space<vmem>>, vector<88x256xf32>
    %105 = arith.truncf %104 : vector<88x256xf32> to vector<88x256xbf16>
    %c7_89 = arith.constant 7 : index
    %c0_90 = arith.constant 0 : index
    %c0_91 = arith.constant 0 : index
    %106 = vector.load %arg3[%c7_89, %c0_90, %c0_91] : memref<9x256x128xbf16, #tpu.memory_space<vmem>>, vector<1x256x128xbf16>
    %107 = vector.shape_cast %106 : vector<1x256x128xbf16> to vector<256x128xbf16>
    %cst_92 = arith.constant dense<0.000000e+00> : vector<88x128xf32>
    %108 = tpu.matmul %105, %107, %cst_92 {dimension_numbers = #tpu.dot_dimension_numbers<[1], [0], [0], [1], [0, 0, 1, 1], [], []>} : vector<88x256xbf16>, vector<256x128xbf16>, vector<88x128xf32> -> vector<88x128xf32>
    %109 = arith.addf %103, %108 : vector<88x128xf32>
    %c40_93 = arith.constant 40 : index
    %c0_94 = arith.constant 0 : index
    %110 = vector.load %arg24[%c40_93, %c0_94] : memref<128x256xf32, #tpu.memory_space<vmem>>, vector<88x256xf32>
    %111 = arith.truncf %110 : vector<88x256xf32> to vector<88x256xbf16>
    %c8_95 = arith.constant 8 : index
    %c0_96 = arith.constant 0 : index
    %c0_97 = arith.constant 0 : index
    %112 = vector.load %arg3[%c8_95, %c0_96, %c0_97] : memref<9x256x128xbf16, #tpu.memory_space<vmem>>, vector<1x256x128xbf16>
    %113 = vector.shape_cast %112 : vector<1x256x128xbf16> to vector<256x128xbf16>
    %cst_98 = arith.constant dense<0.000000e+00> : vector<88x128xf32>
    %114 = tpu.matmul %111, %113, %cst_98 {dimension_numbers = #tpu.dot_dimension_numbers<[1], [0], [0], [1], [0, 0, 1, 1], [], []>} : vector<88x256xbf16>, vector<256x128xbf16>, vector<88x128xf32> -> vector<88x128xf32>
    %115 = arith.addf %109, %114 : vector<88x128xf32>
    %c0_99 = arith.constant 0 : index
    %c0_100 = arith.constant 0 : index
    %116 = vector.load %arg4[%c0_99, %c0_100] : memref<1x128xf32, #tpu.memory_space<vmem>>, vector<1x128xf32>
    %117 = vector.broadcast %116 : vector<1x128xf32> to vector<88x128xf32>
    %118 = arith.addf %115, %117 : vector<88x128xf32>
    %cst_101 = arith.constant 0.000000e+00 : f32
    %119 = vector.broadcast %cst_101 : f32 to vector<88x128xf32>
    %120 = arith.maximumf %118, %119 : vector<88x128xf32>
    %c0_102 = arith.constant 0 : index
    %c0_103 = arith.constant 0 : index
    %121 = vector.load %arg25[%c0_102, %c0_103] : memref<88x128xf32, #tpu.memory_space<vmem>>, vector<88x128xf32>
    tpu.vector_store %arg25[%c0_102, %c0_103], %120 {strides = array<i32>} : memref<88x128xf32, #tpu.memory_space<vmem>>, vector<88x128xf32>,
    %cst_104 = arith.constant 0.000000e+00 : f32
    %122 = vector.broadcast %cst_104 : f32 to vector<48x64xf32>
    %c0_105 = arith.constant 0 : index
    %c0_106 = arith.constant 0 : index
    %123 = vector.load %arg25[%c0_105, %c0_106] : memref<88x128xf32, #tpu.memory_space<vmem>>, vector<48x128xf32>
    %124 = arith.truncf %123 : vector<48x128xf32> to vector<48x128xbf16>
    %c0_107 = arith.constant 0 : index
    %c0_108 = arith.constant 0 : index
    %c0_109 = arith.constant 0 : index
    %125 = vector.load %arg5[%c0_107, %c0_108, %c0_109] : memref<9x128x64xbf16, #tpu.memory_space<vmem>>, vector<1x128x64xbf16>
    %126 = vector.shape_cast %125 : vector<1x128x64xbf16> to vector<128x64xbf16>
    %cst_110 = arith.constant dense<0.000000e+00> : vector<48x64xf32>
    %127 = tpu.matmul %124, %126, %cst_110 {dimension_numbers = #tpu.dot_dimension_numbers<[1], [0], [0], [1], [0, 0, 1, 1], [], []>} : vector<48x128xbf16>, vector<128x64xbf16>, vector<48x64xf32> -> vector<48x64xf32>
    %128 = arith.addf %122, %127 : vector<48x64xf32>
    %c2_111 = arith.constant 2 : index
    %c0_112 = arith.constant 0 : index
    %129 = vector.load %arg25[%c2_111, %c0_112] : memref<88x128xf32, #tpu.memory_space<vmem>>, vector<48x128xf32>
    %130 = arith.truncf %129 : vector<48x128xf32> to vector<48x128xbf16>
    %c1_113 = arith.constant 1 : index
    %c0_114 = arith.constant 0 : index
    %c0_115 = arith.constant 0 : index
    %131 = vector.load %arg5[%c1_113, %c0_114, %c0_115] : memref<9x128x64xbf16, #tpu.memory_space<vmem>>, vector<1x128x64xbf16>
    %132 = vector.shape_cast %131 : vector<1x128x64xbf16> to vector<128x64xbf16>
    %cst_116 = arith.constant dense<0.000000e+00> : vector<48x64xf32>
    %133 = tpu.matmul %130, %132, %cst_116 {dimension_numbers = #tpu.dot_dimension_numbers<[1], [0], [0], [1], [0, 0, 1, 1], [], []>} : vector<48x128xbf16>, vector<128x64xbf16>, vector<48x64xf32> -> vector<48x64xf32>
    %134 = arith.addf %128, %133 : vector<48x64xf32>
    %c4_117 = arith.constant 4 : index
    %c0_118 = arith.constant 0 : index
    %135 = vector.load %arg25[%c4_117, %c0_118] : memref<88x128xf32, #tpu.memory_space<vmem>>, vector<48x128xf32>
    %136 = arith.truncf %135 : vector<48x128xf32> to vector<48x128xbf16>
    %c2_119 = arith.constant 2 : index
    %c0_120 = arith.constant 0 : index
    %c0_121 = arith.constant 0 : index
    %137 = vector.load %arg5[%c2_119, %c0_120, %c0_121] : memref<9x128x64xbf16, #tpu.memory_space<vmem>>, vector<1x128x64xbf16>
    %138 = vector.shape_cast %137 : vector<1x128x64xbf16> to vector<128x64xbf16>
    %cst_122 = arith.constant dense<0.000000e+00> : vector<48x64xf32>
    %139 = tpu.matmul %136, %138, %cst_122 {dimension_numbers = #tpu.dot_dimension_numbers<[1], [0], [0], [1], [0, 0, 1, 1], [], []>} : vector<48x128xbf16>, vector<128x64xbf16>, vector<48x64xf32> -> vector<48x64xf32>
    %140 = arith.addf %134, %139 : vector<48x64xf32>
    %c18_123 = arith.constant 18 : index
    %c0_124 = arith.constant 0 : index
    %141 = vector.load %arg25[%c18_123, %c0_124] : memref<88x128xf32, #tpu.memory_space<vmem>>, vector<48x128xf32>
    %142 = arith.truncf %141 : vector<48x128xf32> to vector<48x128xbf16>
    %c3_125 = arith.constant 3 : index
    %c0_126 = arith.constant 0 : index
    %c0_127 = arith.constant 0 : index
    %143 = vector.load %arg5[%c3_125, %c0_126, %c0_127] : memref<9x128x64xbf16, #tpu.memory_space<vmem>>, vector<1x128x64xbf16>
    %144 = vector.shape_cast %143 : vector<1x128x64xbf16> to vector<128x64xbf16>
    %cst_128 = arith.constant dense<0.000000e+00> : vector<48x64xf32>
    %145 = tpu.matmul %142, %144, %cst_128 {dimension_numbers = #tpu.dot_dimension_numbers<[1], [0], [0], [1], [0, 0, 1, 1], [], []>} : vector<48x128xbf16>, vector<128x64xbf16>, vector<48x64xf32> -> vector<48x64xf32>
    %146 = arith.addf %140, %145 : vector<48x64xf32>
    %c20_129 = arith.constant 20 : index
    %c0_130 = arith.constant 0 : index
    %147 = vector.load %arg25[%c20_129, %c0_130] : memref<88x128xf32, #tpu.memory_space<vmem>>, vector<48x128xf32>
    %148 = arith.truncf %147 : vector<48x128xf32> to vector<48x128xbf16>
    %c4_131 = arith.constant 4 : index
    %c0_132 = arith.constant 0 : index
    %c0_133 = arith.constant 0 : index
    %149 = vector.load %arg5[%c4_131, %c0_132, %c0_133] : memref<9x128x64xbf16, #tpu.memory_space<vmem>>, vector<1x128x64xbf16>
    %150 = vector.shape_cast %149 : vector<1x128x64xbf16> to vector<128x64xbf16>
    %cst_134 = arith.constant dense<0.000000e+00> : vector<48x64xf32>
    %151 = tpu.matmul %148, %150, %cst_134 {dimension_numbers = #tpu.dot_dimension_numbers<[1], [0], [0], [1], [0, 0, 1, 1], [], []>} : vector<48x128xbf16>, vector<128x64xbf16>, vector<48x64xf32> -> vector<48x64xf32>
    %152 = arith.addf %146, %151 : vector<48x64xf32>
    %c22_135 = arith.constant 22 : index
    %c0_136 = arith.constant 0 : index
    %153 = vector.load %arg25[%c22_135, %c0_136] : memref<88x128xf32, #tpu.memory_space<vmem>>, vector<48x128xf32>
    %154 = arith.truncf %153 : vector<48x128xf32> to vector<48x128xbf16>
    %c5_137 = arith.constant 5 : index
    %c0_138 = arith.constant 0 : index
    %c0_139 = arith.constant 0 : index
    %155 = vector.load %arg5[%c5_137, %c0_138, %c0_139] : memref<9x128x64xbf16, #tpu.memory_space<vmem>>, vector<1x128x64xbf16>
    %156 = vector.shape_cast %155 : vector<1x128x64xbf16> to vector<128x64xbf16>
    %cst_140 = arith.constant dense<0.000000e+00> : vector<48x64xf32>
    %157 = tpu.matmul %154, %156, %cst_140 {dimension_numbers = #tpu.dot_dimension_numbers<[1], [0], [0], [1], [0, 0, 1, 1], [], []>} : vector<48x128xbf16>, vector<128x64xbf16>, vector<48x64xf32> -> vector<48x64xf32>
    %158 = arith.addf %152, %157 : vector<48x64xf32>
    %c36_141 = arith.constant 36 : index
    %c0_142 = arith.constant 0 : index
    %159 = vector.load %arg25[%c36_141, %c0_142] : memref<88x128xf32, #tpu.memory_space<vmem>>, vector<48x128xf32>
    %160 = arith.truncf %159 : vector<48x128xf32> to vector<48x128xbf16>
    %c6_143 = arith.constant 6 : index
    %c0_144 = arith.constant 0 : index
    %c0_145 = arith.constant 0 : index
    %161 = vector.load %arg5[%c6_143, %c0_144, %c0_145] : memref<9x128x64xbf16, #tpu.memory_space<vmem>>, vector<1x128x64xbf16>
    %162 = vector.shape_cast %161 : vector<1x128x64xbf16> to vector<128x64xbf16>
    %cst_146 = arith.constant dense<0.000000e+00> : vector<48x64xf32>
    %163 = tpu.matmul %160, %162, %cst_146 {dimension_numbers = #tpu.dot_dimension_numbers<[1], [0], [0], [1], [0, 0, 1, 1], [], []>} : vector<48x128xbf16>, vector<128x64xbf16>, vector<48x64xf32> -> vector<48x64xf32>
    %164 = arith.addf %158, %163 : vector<48x64xf32>
    %c38_147 = arith.constant 38 : index
    %c0_148 = arith.constant 0 : index
    %165 = vector.load %arg25[%c38_147, %c0_148] : memref<88x128xf32, #tpu.memory_space<vmem>>, vector<48x128xf32>
    %166 = arith.truncf %165 : vector<48x128xf32> to vector<48x128xbf16>
    %c7_149 = arith.constant 7 : index
    %c0_150 = arith.constant 0 : index
    %c0_151 = arith.constant 0 : index
    %167 = vector.load %arg5[%c7_149, %c0_150, %c0_151] : memref<9x128x64xbf16, #tpu.memory_space<vmem>>, vector<1x128x64xbf16>
    %168 = vector.shape_cast %167 : vector<1x128x64xbf16> to vector<128x64xbf16>
    %cst_152 = arith.constant dense<0.000000e+00> : vector<48x64xf32>
    %169 = tpu.matmul %166, %168, %cst_152 {dimension_numbers = #tpu.dot_dimension_numbers<[1], [0], [0], [1], [0, 0, 1, 1], [], []>} : vector<48x128xbf16>, vector<128x64xbf16>, vector<48x64xf32> -> vector<48x64xf32>
    %170 = arith.addf %164, %169 : vector<48x64xf32>
    %c40_153 = arith.constant 40 : index
    %c0_154 = arith.constant 0 : index
    %171 = vector.load %arg25[%c40_153, %c0_154] : memref<88x128xf32, #tpu.memory_space<vmem>>, vector<48x128xf32>
    %172 = arith.truncf %171 : vector<48x128xf32> to vector<48x128xbf16>
    %c8_155 = arith.constant 8 : index
    %c0_156 = arith.constant 0 : index
    %c0_157 = arith.constant 0 : index
    %173 = vector.load %arg5[%c8_155, %c0_156, %c0_157] : memref<9x128x64xbf16, #tpu.memory_space<vmem>>, vector<1x128x64xbf16>
    %174 = vector.shape_cast %173 : vector<1x128x64xbf16> to vector<128x64xbf16>
    %cst_158 = arith.constant dense<0.000000e+00> : vector<48x64xf32>
    %175 = tpu.matmul %172, %174, %cst_158 {dimension_numbers = #tpu.dot_dimension_numbers<[1], [0], [0], [1], [0, 0, 1, 1], [], []>} : vector<48x128xbf16>, vector<128x64xbf16>, vector<48x64xf32> -> vector<48x64xf32>
    %176 = arith.addf %170, %175 : vector<48x64xf32>
    %c0_159 = arith.constant 0 : index
    %c0_160 = arith.constant 0 : index
    %177 = vector.load %arg6[%c0_159, %c0_160] : memref<1x64xf32, #tpu.memory_space<vmem>>, vector<1x64xf32>
    %178 = vector.broadcast %177 : vector<1x64xf32> to vector<48x64xf32>
    %179 = arith.addf %176, %178 : vector<48x64xf32>
    %cst_161 = arith.constant 0.000000e+00 : f32
    %180 = vector.broadcast %cst_161 : f32 to vector<48x64xf32>
    %181 = arith.maximumf %179, %180 : vector<48x64xf32>
    %c0_162 = arith.constant 0 : index
    %c0_163 = arith.constant 0 : index
    %182 = vector.load %arg26[%c0_162, %c0_163] : memref<48x64xf32, #tpu.memory_space<vmem>>, vector<48x64xf32>
    tpu.vector_store %arg26[%c0_162, %c0_163], %181 {strides = array<i32>} : memref<48x64xf32, #tpu.memory_space<vmem>>, vector<48x64xf32>,
    %c0_164 = arith.constant 0 : index
    %c0_165 = arith.constant 0 : index
    %183 = vector.load %arg9[%c0_164, %c0_165] : memref<1x128xf32, #tpu.memory_space<vmem>>, vector<1x128xf32>
    %c0_166 = arith.constant 0 : index
    %c0_167 = arith.constant 0 : index
    %184 = vector.load %arg26[%c0_166, %c0_167] : memref<48x64xf32, #tpu.memory_space<vmem>>, vector<2x64xf32>
    %185 = arith.truncf %184 : vector<2x64xf32> to vector<2x64xbf16>
    %c0_168 = arith.constant 0 : index
    %c0_169 = arith.constant 0 : index
    %c0_170 = arith.constant 0 : index
    %186 = vector.load %arg7[%c0_168, %c0_169, %c0_170] : memref<9x64x128xbf16, #tpu.memory_space<vmem>>, vector<1x64x128xbf16>
    %187 = vector.shape_cast %186 : vector<1x64x128xbf16> to vector<64x128xbf16>
    %cst_171 = arith.constant dense<0.000000e+00> : vector<2x128xf32>
    %188 = tpu.matmul %185, %187, %cst_171 {dimension_numbers = #tpu.dot_dimension_numbers<[1], [0], [0], [1], [0, 0, 1, 1], [], []>} : vector<2x64xbf16>, vector<64x128xbf16>, vector<2x128xf32> -> vector<2x128xf32>
    %189 = vector.broadcast %183 : vector<1x128xf32> to vector<2x128xf32>
    %190 = arith.addf %189, %188 : vector<2x128xf32>
    %c2_172 = arith.constant 2 : index
    %c0_173 = arith.constant 0 : index
    %191 = vector.load %arg26[%c2_172, %c0_173] : memref<48x64xf32, #tpu.memory_space<vmem>>, vector<2x64xf32>
    %192 = arith.truncf %191 : vector<2x64xf32> to vector<2x64xbf16>
    %c1_174 = arith.constant 1 : index
    %c0_175 = arith.constant 0 : index
    %c0_176 = arith.constant 0 : index
    %193 = vector.load %arg7[%c1_174, %c0_175, %c0_176] : memref<9x64x128xbf16, #tpu.memory_space<vmem>>, vector<1x64x128xbf16>
    %194 = vector.shape_cast %193 : vector<1x64x128xbf16> to vector<64x128xbf16>
    %cst_177 = arith.constant dense<0.000000e+00> : vector<2x128xf32>
    %195 = tpu.matmul %192, %194, %cst_177 {dimension_numbers = #tpu.dot_dimension_numbers<[1], [0], [0], [1], [0, 0, 1, 1], [], []>} : vector<2x64xbf16>, vector<64x128xbf16>, vector<2x128xf32> -> vector<2x128xf32>
    %196 = arith.addf %190, %195 : vector<2x128xf32>
    %c4_178 = arith.constant 4 : index
    %c0_179 = arith.constant 0 : index
    %197 = vector.load %arg26[%c4_178, %c0_179] : memref<48x64xf32, #tpu.memory_space<vmem>>, vector<2x64xf32>
    %198 = arith.truncf %197 : vector<2x64xf32> to vector<2x64xbf16>
    %c2_180 = arith.constant 2 : index
    %c0_181 = arith.constant 0 : index
    %c0_182 = arith.constant 0 : index
    %199 = vector.load %arg7[%c2_180, %c0_181, %c0_182] : memref<9x64x128xbf16, #tpu.memory_space<vmem>>, vector<1x64x128xbf16>
    %200 = vector.shape_cast %199 : vector<1x64x128xbf16> to vector<64x128xbf16>
    %cst_183 = arith.constant dense<0.000000e+00> : vector<2x128xf32>
    %201 = tpu.matmul %198, %200, %cst_183 {dimension_numbers = #tpu.dot_dimension_numbers<[1], [0], [0], [1], [0, 0, 1, 1], [], []>} : vector<2x64xbf16>, vector<64x128xbf16>, vector<2x128xf32> -> vector<2x128xf32>
    %202 = arith.addf %196, %201 : vector<2x128xf32>
    %c18_184 = arith.constant 18 : index
    %c0_185 = arith.constant 0 : index
    %203 = vector.load %arg26[%c18_184, %c0_185] : memref<48x64xf32, #tpu.memory_space<vmem>>, vector<2x64xf32>
    %204 = arith.truncf %203 : vector<2x64xf32> to vector<2x64xbf16>
    %c3_186 = arith.constant 3 : index
    %c0_187 = arith.constant 0 : index
    %c0_188 = arith.constant 0 : index
    %205 = vector.load %arg7[%c3_186, %c0_187, %c0_188] : memref<9x64x128xbf16, #tpu.memory_space<vmem>>, vector<1x64x128xbf16>
    %206 = vector.shape_cast %205 : vector<1x64x128xbf16> to vector<64x128xbf16>
    %cst_189 = arith.constant dense<0.000000e+00> : vector<2x128xf32>
    %207 = tpu.matmul %204, %206, %cst_189 {dimension_numbers = #tpu.dot_dimension_numbers<[1], [0], [0], [1], [0, 0, 1, 1], [], []>} : vector<2x64xbf16>, vector<64x128xbf16>, vector<2x128xf32> -> vector<2x128xf32>
    %208 = arith.addf %202, %207 : vector<2x128xf32>
    %c20_190 = arith.constant 20 : index
    %c0_191 = arith.constant 0 : index
    %209 = vector.load %arg26[%c20_190, %c0_191] : memref<48x64xf32, #tpu.memory_space<vmem>>, vector<2x64xf32>
    %210 = arith.truncf %209 : vector<2x64xf32> to vector<2x64xbf16>
    %c4_192 = arith.constant 4 : index
    %c0_193 = arith.constant 0 : index
    %c0_194 = arith.constant 0 : index
    %211 = vector.load %arg7[%c4_192, %c0_193, %c0_194] : memref<9x64x128xbf16, #tpu.memory_space<vmem>>, vector<1x64x128xbf16>
    %212 = vector.shape_cast %211 : vector<1x64x128xbf16> to vector<64x128xbf16>
    %cst_195 = arith.constant dense<0.000000e+00> : vector<2x128xf32>
    %213 = tpu.matmul %210, %212, %cst_195 {dimension_numbers = #tpu.dot_dimension_numbers<[1], [0], [0], [1], [0, 0, 1, 1], [], []>} : vector<2x64xbf16>, vector<64x128xbf16>, vector<2x128xf32> -> vector<2x128xf32>
    %214 = arith.addf %208, %213 : vector<2x128xf32>
    %c22_196 = arith.constant 22 : index
    %c0_197 = arith.constant 0 : index
    %215 = vector.load %arg26[%c22_196, %c0_197] : memref<48x64xf32, #tpu.memory_space<vmem>>, vector<2x64xf32>
    %216 = arith.truncf %215 : vector<2x64xf32> to vector<2x64xbf16>
    %c5_198 = arith.constant 5 : index
    %c0_199 = arith.constant 0 : index
    %c0_200 = arith.constant 0 : index
    %217 = vector.load %arg7[%c5_198, %c0_199, %c0_200] : memref<9x64x128xbf16, #tpu.memory_space<vmem>>, vector<1x64x128xbf16>
    %218 = vector.shape_cast %217 : vector<1x64x128xbf16> to vector<64x128xbf16>
    %cst_201 = arith.constant dense<0.000000e+00> : vector<2x128xf32>
    %219 = tpu.matmul %216, %218, %cst_201 {dimension_numbers = #tpu.dot_dimension_numbers<[1], [0], [0], [1], [0, 0, 1, 1], [], []>} : vector<2x64xbf16>, vector<64x128xbf16>, vector<2x128xf32> -> vector<2x128xf32>
    %220 = arith.addf %214, %219 : vector<2x128xf32>
    %c36_202 = arith.constant 36 : index
    %c0_203 = arith.constant 0 : index
    %221 = vector.load %arg26[%c36_202, %c0_203] : memref<48x64xf32, #tpu.memory_space<vmem>>, vector<2x64xf32>
    %222 = arith.truncf %221 : vector<2x64xf32> to vector<2x64xbf16>
    %c6_204 = arith.constant 6 : index
    %c0_205 = arith.constant 0 : index
    %c0_206 = arith.constant 0 : index
    %223 = vector.load %arg7[%c6_204, %c0_205, %c0_206] : memref<9x64x128xbf16, #tpu.memory_space<vmem>>, vector<1x64x128xbf16>
    %224 = vector.shape_cast %223 : vector<1x64x128xbf16> to vector<64x128xbf16>
    %cst_207 = arith.constant dense<0.000000e+00> : vector<2x128xf32>
    %225 = tpu.matmul %222, %224, %cst_207 {dimension_numbers = #tpu.dot_dimension_numbers<[1], [0], [0], [1], [0, 0, 1, 1], [], []>} : vector<2x64xbf16>, vector<64x128xbf16>, vector<2x128xf32> -> vector<2x128xf32>
    %226 = arith.addf %220, %225 : vector<2x128xf32>
    %c38_208 = arith.constant 38 : index
    %c0_209 = arith.constant 0 : index
    %227 = vector.load %arg26[%c38_208, %c0_209] : memref<48x64xf32, #tpu.memory_space<vmem>>, vector<2x64xf32>
    %228 = arith.truncf %227 : vector<2x64xf32> to vector<2x64xbf16>
    %c7_210 = arith.constant 7 : index
    %c0_211 = arith.constant 0 : index
    %c0_212 = arith.constant 0 : index
    %229 = vector.load %arg7[%c7_210, %c0_211, %c0_212] : memref<9x64x128xbf16, #tpu.memory_space<vmem>>, vector<1x64x128xbf16>
    %230 = vector.shape_cast %229 : vector<1x64x128xbf16> to vector<64x128xbf16>
    %cst_213 = arith.constant dense<0.000000e+00> : vector<2x128xf32>
    %231 = tpu.matmul %228, %230, %cst_213 {dimension_numbers = #tpu.dot_dimension_numbers<[1], [0], [0], [1], [0, 0, 1, 1], [], []>} : vector<2x64xbf16>, vector<64x128xbf16>, vector<2x128xf32> -> vector<2x128xf32>
    %232 = arith.addf %226, %231 : vector<2x128xf32>
    %c40_214 = arith.constant 40 : index
    %c0_215 = arith.constant 0 : index
    %233 = vector.load %arg26[%c40_214, %c0_215] : memref<48x64xf32, #tpu.memory_space<vmem>>, vector<2x64xf32>
    %234 = arith.truncf %233 : vector<2x64xf32> to vector<2x64xbf16>
    %c8_216 = arith.constant 8 : index
    %c0_217 = arith.constant 0 : index
    %c0_218 = arith.constant 0 : index
    %235 = vector.load %arg7[%c8_216, %c0_217, %c0_218] : memref<9x64x128xbf16, #tpu.memory_space<vmem>>, vector<1x64x128xbf16>
    %236 = vector.shape_cast %235 : vector<1x64x128xbf16> to vector<64x128xbf16>
    %cst_219 = arith.constant dense<0.000000e+00> : vector<2x128xf32>
    %237 = tpu.matmul %234, %236, %cst_219 {dimension_numbers = #tpu.dot_dimension_numbers<[1], [0], [0], [1], [0, 0, 1, 1], [], []>} : vector<2x64xbf16>, vector<64x128xbf16>, vector<2x128xf32> -> vector<2x128xf32>
    %238 = arith.addf %232, %237 : vector<2x128xf32>
    %c0_220 = arith.constant 0 : index
    %c0_221 = arith.constant 0 : index
    %239 = vector.load %arg18[%c0_220, %c0_221] : memref<2x32xf32, #tpu.memory_space<vmem>>, vector<2x32xf32>
    %240 = arith.truncf %239 : vector<2x32xf32> to vector<2x32xbf16>
    %c0_222 = arith.constant 0 : index
    %c0_223 = arith.constant 0 : index
    %241 = vector.load %arg8[%c0_222, %c0_223] : memref<32x128xbf16, #tpu.memory_space<vmem>>, vector<32x128xbf16>
    %cst_224 = arith.constant dense<0.000000e+00> : vector<2x128xf32>
    %242 = tpu.matmul %240, %241, %cst_224 {dimension_numbers = #tpu.dot_dimension_numbers<[1], [0], [0], [1], [0, 0, 1, 1], [], []>} : vector<2x32xbf16>, vector<32x128xbf16>, vector<2x128xf32> -> vector<2x128xf32>
    %243 = arith.addf %238, %242 : vector<2x128xf32>
    %c0_225 = arith.constant 0 : index
    %c0_226 = arith.constant 0 : index
    %244 = vector.load %arg19[%c0_225, %c0_226] : memref<2x32xf32, #tpu.memory_space<vmem>>, vector<2x32xf32>
    %245 = vector.extract_strided_slice %243 {offsets = [0, 0], sizes = [2, 32], strides = [1, 1]} : vector<2x128xf32> to vector<2x32xf32>
    %246 = arith.negf %245 : vector<2x32xf32>
    %247 = math.exp %246 : vector<2x32xf32>
    %cst_227 = arith.constant 1.000000e+00 : f32
    %248 = vector.broadcast %cst_227 : f32 to vector<2x32xf32>
    %249 = arith.addf %248, %247 : vector<2x32xf32>
    %250 = arith.divf %248, %249 : vector<2x32xf32>
    %251 = vector.extract_strided_slice %243 {offsets = [0, 32], sizes = [2, 32], strides = [1, 1]} : vector<2x128xf32> to vector<2x32xf32>
    %252 = arith.negf %251 : vector<2x32xf32>
    %253 = math.exp %252 : vector<2x32xf32>
    %cst_228 = arith.constant 1.000000e+00 : f32
    %254 = vector.broadcast %cst_228 : f32 to vector<2x32xf32>
    %255 = arith.addf %254, %253 : vector<2x32xf32>
    %256 = arith.divf %254, %255 : vector<2x32xf32>
    %257 = vector.extract_strided_slice %243 {offsets = [0, 64], sizes = [2, 32], strides = [1, 1]} : vector<2x128xf32> to vector<2x32xf32>
    %258 = math.tanh %257 : vector<2x32xf32>
    %259 = vector.extract_strided_slice %243 {offsets = [0, 96], sizes = [2, 32], strides = [1, 1]} : vector<2x128xf32> to vector<2x32xf32>
    %260 = arith.negf %259 : vector<2x32xf32>
    %261 = math.exp %260 : vector<2x32xf32>
    %cst_229 = arith.constant 1.000000e+00 : f32
    %262 = vector.broadcast %cst_229 : f32 to vector<2x32xf32>
    %263 = arith.addf %262, %261 : vector<2x32xf32>
    %264 = arith.divf %262, %263 : vector<2x32xf32>
    %265 = arith.mulf %256, %244 : vector<2x32xf32>
    %266 = arith.mulf %250, %258 : vector<2x32xf32>
    %267 = arith.addf %265, %266 : vector<2x32xf32>
    %268 = math.tanh %267 : vector<2x32xf32>
    %269 = arith.mulf %264, %268 : vector<2x32xf32>
    %c0_230 = arith.constant 0 : index
    %c0_231 = arith.constant 0 : index
    %270 = vector.load %arg12[%c0_230, %c0_231] : memref<1x128xf32, #tpu.memory_space<vmem>>, vector<1x128xf32>
    %271 = arith.truncf %269 : vector<2x32xf32> to vector<2x32xbf16>
    %c0_232 = arith.constant 0 : index
    %c0_233 = arith.constant 0 : index
    %272 = vector.load %arg10[%c0_232, %c0_233] : memref<32x128xbf16, #tpu.memory_space<vmem>>, vector<32x128xbf16>
    %cst_234 = arith.constant dense<0.000000e+00> : vector<2x128xf32>
    %273 = tpu.matmul %271, %272, %cst_234 {dimension_numbers = #tpu.dot_dimension_numbers<[1], [0], [0], [1], [0, 0, 1, 1], [], []>} : vector<2x32xbf16>, vector<32x128xbf16>, vector<2x128xf32> -> vector<2x128xf32>
    %274 = vector.broadcast %270 : vector<1x128xf32> to vector<2x128xf32>
    %275 = arith.addf %274, %273 : vector<2x128xf32>
    %c0_235 = arith.constant 0 : index
    %c0_236 = arith.constant 0 : index
    %276 = vector.load %arg20[%c0_235, %c0_236] : memref<2x32xf32, #tpu.memory_space<vmem>>, vector<2x32xf32>
    %277 = arith.truncf %276 : vector<2x32xf32> to vector<2x32xbf16>
    %c0_237 = arith.constant 0 : index
    %c0_238 = arith.constant 0 : index
    %278 = vector.load %arg11[%c0_237, %c0_238] : memref<32x128xbf16, #tpu.memory_space<vmem>>, vector<32x128xbf16>
    %cst_239 = arith.constant dense<0.000000e+00> : vector<2x128xf32>
    %279 = tpu.matmul %277, %278, %cst_239 {dimension_numbers = #tpu.dot_dimension_numbers<[1], [0], [0], [1], [0, 0, 1, 1], [], []>} : vector<2x32xbf16>, vector<32x128xbf16>, vector<2x128xf32> -> vector<2x128xf32>
    %280 = arith.addf %275, %279 : vector<2x128xf32>
    %c0_240 = arith.constant 0 : index
    %c0_241 = arith.constant 0 : index
    %281 = vector.load %arg21[%c0_240, %c0_241] : memref<2x32xf32, #tpu.memory_space<vmem>>, vector<2x32xf32>
    %282 = vector.extract_strided_slice %280 {offsets = [0, 0], sizes = [2, 32], strides = [1, 1]} : vector<2x128xf32> to vector<2x32xf32>
    %283 = arith.negf %282 : vector<2x32xf32>
    %284 = math.exp %283 : vector<2x32xf32>
    %cst_242 = arith.constant 1.000000e+00 : f32
    %285 = vector.broadcast %cst_242 : f32 to vector<2x32xf32>
    %286 = arith.addf %285, %284 : vector<2x32xf32>
    %287 = arith.divf %285, %286 : vector<2x32xf32>
    %288 = vector.extract_strided_slice %280 {offsets = [0, 32], sizes = [2, 32], strides = [1, 1]} : vector<2x128xf32> to vector<2x32xf32>
    %289 = arith.negf %288 : vector<2x32xf32>
    %290 = math.exp %289 : vector<2x32xf32>
    %cst_243 = arith.constant 1.000000e+00 : f32
    %291 = vector.broadcast %cst_243 : f32 to vector<2x32xf32>
    %292 = arith.addf %291, %290 : vector<2x32xf32>
    %293 = arith.divf %291, %292 : vector<2x32xf32>
    %294 = vector.extract_strided_slice %280 {offsets = [0, 64], sizes = [2, 32], strides = [1, 1]} : vector<2x128xf32> to vector<2x32xf32>
    %295 = math.tanh %294 : vector<2x32xf32>
    %296 = vector.extract_strided_slice %280 {offsets = [0, 96], sizes = [2, 32], strides = [1, 1]} : vector<2x128xf32> to vector<2x32xf32>
    %297 = arith.negf %296 : vector<2x32xf32>
    %298 = math.exp %297 : vector<2x32xf32>
    %cst_244 = arith.constant 1.000000e+00 : f32
    %299 = vector.broadcast %cst_244 : f32 to vector<2x32xf32>
    %300 = arith.addf %299, %298 : vector<2x32xf32>
    %301 = arith.divf %299, %300 : vector<2x32xf32>
    %302 = arith.mulf %293, %281 : vector<2x32xf32>
    %303 = arith.mulf %287, %295 : vector<2x32xf32>
    %304 = arith.addf %302, %303 : vector<2x32xf32>
    %305 = math.tanh %304 : vector<2x32xf32>
    %306 = arith.mulf %301, %305 : vector<2x32xf32>
    %c0_245 = arith.constant 0 : index
    %c0_246 = arith.constant 0 : index
    %307 = vector.load %arg15[%c0_245, %c0_246] : memref<1x32xf32, #tpu.memory_space<vmem>>, vector<1x32xf32>
    %308 = arith.truncf %269 : vector<2x32xf32> to vector<2x32xbf16>
    %c0_247 = arith.constant 0 : index
    %c0_248 = arith.constant 0 : index
    %309 = vector.load %arg13[%c0_247, %c0_248] : memref<32x32xbf16, #tpu.memory_space<vmem>>, vector<32x32xbf16>
    %cst_249 = arith.constant dense<0.000000e+00> : vector<2x32xf32>
    %310 = tpu.matmul %308, %309, %cst_249 {dimension_numbers = #tpu.dot_dimension_numbers<[1], [0], [0], [1], [0, 0, 1, 1], [], []>} : vector<2x32xbf16>, vector<32x32xbf16>, vector<2x32xf32> -> vector<2x32xf32>
    %311 = vector.broadcast %307 : vector<1x32xf32> to vector<2x32xf32>
    %312 = arith.addf %311, %310 : vector<2x32xf32>
    %313 = arith.truncf %306 : vector<2x32xf32> to vector<2x32xbf16>
    %c0_250 = arith.constant 0 : index
    %c0_251 = arith.constant 0 : index
    %314 = vector.load %arg14[%c0_250, %c0_251] : memref<32x32xbf16, #tpu.memory_space<vmem>>, vector<32x32xbf16>
    %cst_252 = arith.constant dense<0.000000e+00> : vector<2x32xf32>
    %315 = tpu.matmul %313, %314, %cst_252 {dimension_numbers = #tpu.dot_dimension_numbers<[1], [0], [0], [1], [0, 0, 1, 1], [], []>} : vector<2x32xbf16>, vector<32x32xbf16>, vector<2x32xf32> -> vector<2x32xf32>
    %316 = arith.addf %312, %315 : vector<2x32xf32>
    %cst_253 = arith.constant 0.000000e+00 : f32
    %317 = vector.broadcast %cst_253 : f32 to vector<2x32xf32>
    %318 = arith.maximumf %316, %317 : vector<2x32xf32>
    %319 = arith.truncf %318 : vector<2x32xf32> to vector<2x32xbf16>
    %c0_254 = arith.constant 0 : index
    %c0_255 = arith.constant 0 : index
    %320 = vector.load %arg16[%c0_254, %c0_255] : memref<32x128xbf16, #tpu.memory_space<vmem>>, vector<32x128xbf16>
    %cst_256 = arith.constant dense<0.000000e+00> : vector<2x128xf32>
    %321 = tpu.matmul %319, %320, %cst_256 {dimension_numbers = #tpu.dot_dimension_numbers<[1], [0], [0], [1], [0, 0, 1, 1], [], []>} : vector<2x32xbf16>, vector<32x128xbf16>, vector<2x128xf32> -> vector<2x128xf32>
    %c0_257 = arith.constant 0 : index
    %c0_258 = arith.constant 0 : index
    %322 = vector.load %arg17[%c0_257, %c0_258] : memref<1x128xf32, #tpu.memory_space<vmem>>, vector<1x128xf32>
    %323 = vector.broadcast %322 : vector<1x128xf32> to vector<2x128xf32>
    %324 = arith.addf %321, %323 : vector<2x128xf32>
    %325 = tpu.iota {dimensions = array<i32: 1>} : vector<2x128xi32>
    %c3_i32 = arith.constant 3 : i32
    %326 = vector.broadcast %c3_i32 : i32 to vector<2x128xi32>
    %327 = arith.cmpi slt, %325, %326 : vector<2x128xi32>
    %cst_259 = arith.constant -1.000000e+30 : f32
    %328 = vector.broadcast %cst_259 : f32 to vector<2x128xf32>
    %329 = arith.select %327, %324, %328 : vector<2x128xi1>, vector<2x128xf32>
    %cst_260 = arith.constant dense<0xFF800000> : vector<2xf32>
    %330 = vector.multi_reduction <maximumf>, %329, %cst_260 [1] : vector<2x128xf32> to vector<2xf32>
    %331 = vector.shape_cast %330 : vector<2xf32> to vector<2x1xf32>
    %332 = vector.broadcast %331 : vector<2x1xf32> to vector<2x128xf32>
    %333 = arith.subf %329, %332 : vector<2x128xf32>
    %334 = math.exp %333 : vector<2x128xf32>
    %cst_261 = arith.constant 0.000000e+00 : f32
    %335 = vector.broadcast %cst_261 : f32 to vector<2x128xf32>
    %336 = arith.select %327, %334, %335 : vector<2x128xi1>, vector<2x128xf32>
    %cst_262 = arith.constant dense<0.000000e+00> : vector<2xf32>
    %337 = vector.multi_reduction <add>, %336, %cst_262 [1] : vector<2x128xf32> to vector<2xf32>
    %338 = vector.shape_cast %337 : vector<2xf32> to vector<2x1xf32>
    %339 = vector.broadcast %338 : vector<2x1xf32> to vector<2x128xf32>
    %340 = arith.divf %336, %339 : vector<2x128xf32>
    %c3_i32_263 = arith.constant 3 : i32
    %341 = vector.broadcast %c3_i32_263 : i32 to vector<2x128xi32>
    %342 = arith.cmpi eq, %325, %341 : vector<2x128xi32>
    %343 = arith.select %342, %324, %340 : vector<2x128xi1>, vector<2x128xf32>
    %c0_264 = arith.constant 0 : index
    %c0_265 = arith.constant 0 : index
    %344 = vector.load %arg22[%c0_264, %c0_265] : memref<2x128xf32, #tpu.memory_space<vmem>>, vector<2x128xf32>
    tpu.vector_store %arg22[%c0_264, %c0_265], %343 {strides = array<i32>} : memref<2x128xf32, #tpu.memory_space<vmem>>, vector<2x128xf32>,
    %c0_266 = arith.constant 0 : index
    %c0_267 = arith.constant 0 : index
    %345 = vector.load %arg23[%c0_266, %c0_267] : memref<2x128xf32, #tpu.memory_space<vmem>>, vector<2x32xf32>
    tpu.vector_store %arg23[%c0_266, %c0_267], %269 {strides = array<i32>} : memref<2x128xf32, #tpu.memory_space<vmem>>, vector<2x32xf32>,
    %c0_268 = arith.constant 0 : index
    %c32 = arith.constant 32 : index
    %346 = vector.load %arg23[%c0_268, %c32] : memref<2x128xf32, #tpu.memory_space<vmem>>, vector<2x32xf32>
    tpu.vector_store %arg23[%c0_268, %c32], %267 {strides = array<i32>} : memref<2x128xf32, #tpu.memory_space<vmem>>, vector<2x32xf32>,
    %c0_269 = arith.constant 0 : index
    %c64 = arith.constant 64 : index
    %347 = vector.load %arg23[%c0_269, %c64] : memref<2x128xf32, #tpu.memory_space<vmem>>, vector<2x32xf32>
    tpu.vector_store %arg23[%c0_269, %c64], %306 {strides = array<i32>} : memref<2x128xf32, #tpu.memory_space<vmem>>, vector<2x32xf32>,
    %c0_270 = arith.constant 0 : index
    %c96 = arith.constant 96 : index
    %348 = vector.load %arg23[%c0_270, %c96] : memref<2x128xf32, #tpu.memory_space<vmem>>, vector<2x32xf32>
    tpu.vector_store %arg23[%c0_270, %c96], %304 {strides = array<i32>} : memref<2x128xf32, #tpu.memory_space<vmem>>, vector<2x32xf32>,
    return
  }
}

</mosaic_0001>

<bundles_post_ra>
// kernel: policy_forward.1
= control target key start
LH: loop header
LB: loop body
LE: loop exit
PB: predicated region body
PF: predicated region fallthrough
CT: control target
= control target key end

     0   :  { %s12751_s0 = inlined_call_operand.vmem [shape: f32[168,15], index: 0, kind: input, shape index: {}]   ;;  %s12752_s1 = inlined_call_operand.hbm [shape: bf16[9,15,256], index: 1, kind: input, shape index: {}]   ;;  %s12753_s2 = inlined_call_operand.vmem [shape: f32[1,256], index: 2, kind: input, shape index: {}]   ;;  %s12754_s3 = inlined_call_operand.vmem [shape: bf16[9,256,128], index: 3, kind: input, shape index: {}]   ;;  %s12755_s4 = inlined_call_operand.hbm [shape: f32[1,128], index: 4, kind: input, shape index: {}]   ;;  %s12756_s5 = inlined_call_operand.vmem [shape: bf16[9,128,64], index: 5, kind: input, shape index: {}]   ;;  %s12757_s6 = inlined_call_operand.hbm [shape: f32[1,64], index: 6, kind: input, shape index: {}]   ;;  %s12758_s7 = inlined_call_operand.vmem [shape: bf16[9,64,128], index: 7, kind: input, shape index: {}]   ;;  %s12759_s8 = inlined_call_operand.vmem [shape: bf16[32,128], index: 8, kind: input, shape index: {}]   ;;  %s12760_s9 = inlined_call_operand.vmem [shape: f32[1,128], index: 9, kind: input, shape index: {}]   ;;  %s12761_s10 = inlined_call_operand.vmem [shape: bf16[32,128], index: 10, kind: input, shape index: {}]   ;;  %s12762_s11 = inlined_call_operand.vmem [shape: bf16[32,128], index: 11, kind: input, shape index: {}]   ;;  %s12763_s12 = inlined_call_operand.hbm [shape: f32[1,128], index: 12, kind: input, shape index: {}]   ;;  %s12764_s13 = inlined_call_operand.vmem [shape: bf16[32,32], index: 13, kind: input, shape index: {}]   ;;  %s12765_s14 = inlined_call_operand.vmem [shape: bf16[32,32], index: 14, kind: input, shape index: {}]   ;;  %s12766_s15 = inlined_call_operand.hbm [shape: f32[1,32], index: 15, kind: input, shape index: {}]   ;;  %s12767_s16 = inlined_call_operand.vmem [shape: bf16[32,128], index: 16, kind: input, shape index: {}]   ;;  %s12768_s17 = inlined_call_operand.hbm [shape: f32[1,128], index: 17, kind: input, shape index: {}]   ;;  %s12769_s18 = inlined_call_operand.vmem [shape: f32[2,32], index: 18, kind: input, shape index: {}]   ;;  %s12770_s19 = inlined_call_operand.vmem [shape: f32[2,32], index: 19, kind: input, shape index: {}]   ;;  %s12771_s20 = inlined_call_operand.vmem [shape: f32[2,32], index: 20, kind: input, shape index: {}]   ;;  %s12772_s21 = inlined_call_operand.vmem [shape: f32[2,32], index: 21, kind: input, shape index: {}]   ;;  %s12773_s22 = inlined_call_operand.vmem [shape: f32[2,128], index: 22, kind: output, shape index: {0}]   ;;  %s12774_s23 = inlined_call_operand.vmem [shape: f32[2,128], index: 23, kind: output, shape index: {1}]  }
   0x1   :  { %12805 = sst [smem:[#allocation90_spill]] %s12751_s0 }
   0x2   :  { %12806 = sst [smem:[#allocation91_spill]] %s12752_s1 }
   0x3   :  { %12807 = sst [smem:[#allocation92_spill]] %s12753_s2 }
   0x4   :  { %12808 = sst [smem:[#allocation93_spill]] %s12754_s3 }
   0x5   :  { %12809 = sst [smem:[#allocation94_spill]] %s12755_s4 }
   0x6   :  { %12810 = sst [smem:[#allocation95_spill]] %s12756_s5 }
   0x7   :  { %12811 = sst [smem:[#allocation96_spill]] %s12757_s6 }
   0x8   :  { %12812 = sst [smem:[#allocation97_spill]] %s12758_s7 }
   0x9   :  { %29 = vsyncpa [#allocation6], 0 }
   0xa   :  { %30 = vsyncpa [#allocation8], 0 }
   0xb   :  { %31 = vsyncpa [#allocation11], 0 }
   0xc   :  { %32 = vsyncpa [#allocation14], 0  ;;  %s9328_s4 = smov [#allocation7]   ;;  %s9329_s24 = smov [#allocation10]  }
   0xd   :  { %s57_s30 = sshll.u32 %s9328_s4, 4  ;;  %s89_s25 = sshll.u32 %s9329_s24, 4  ;;  %s58_s30 = int_to_ptr.vmem [resolvable:$true] %s57_s30  ;;  %s90_s25 = int_to_ptr.vmem [resolvable:$true] %s89_s25 }
   0xe   :  { %s9208_s5 = scalar_lea.vmem %s58_s30, 16  ;;  %s9212_s1 = scalar_lea.vmem %s58_s30, 32 }
   0xf   :  { %p9209_p0 = scmp.ne.s32.totalorder %s58_s30, %s9208_s5  ;;  %p9213_p1 = scmp.lt.s32.totalorder %s58_s30, %s58_s30 }
  0x10   :  { %p9214_p2 = scmp.lt.s32.totalorder %s9212_s1, %s9208_s5 }
  0x12   :  { %p9215_p3 = por %p9214_p2, %p9213_p1 }
  0x14   :  { %p9216_p4 = pnand %p9215_p3, %p9209_p0 }
  0x16   :  { %9219 = shalt.err (!%p9216_p4)
}
  0x17   :  { %s12813_s6 = sld [smem:[#allocation94_spill]]  ;;  %s9228_s27 = scalar_lea.vmem %s90_s25, 16 }
  0x18   :  { %p9229_p5 = scmp.ne.s32.totalorder %s90_s25, %s9228_s27  ;;  %s9232_s7 = scalar_lea.vmem %s90_s25, 32 }
  0x19   :  { %p9233_p6 = scmp.lt.s32.totalorder %s90_s25, %s90_s25  ;;  %p9234_p7 = scmp.lt.s32.totalorder %s9232_s7, %s9228_s27 }
  0x1b   :  { %p9235_p8 = por %p9234_p7, %p9233_p6 }
  0x1d   :  { %60 = dma.hbm_to_vmem [thread:$0]  %s12813_s6, 16, %s58_s30, [#allocation8]  }
  0x1e   :  { %p9236_p9 = pnand %p9235_p8, %p9229_p5 }
  0x20   :  { %9239 = shalt.err (!%p9236_p9)
}
  0x21   :  { %92 = dma.hbm_to_vmem [thread:$0]  %s12763_s12, 16, %s90_s25, [#allocation11]  }
  0x22   :  { %s9330_s3 = smov [#allocation5]  }
  0x23   :  { %s40_s0 = sshll.u32 %s9330_s3, 4  ;;  %s41_s0 = int_to_ptr.vmem [resolvable:$true] %s40_s0 }
  0x24   :  { %s9248_s4 = scalar_lea.vmem %s41_s0, 2304  ;;  %p9253_p11 = scmp.lt.s32.totalorder %s41_s0, %s41_s0 }
  0x25   :  { %p9249_p10 = scmp.ne.s32.totalorder %s41_s0, %s9248_s4  ;;  %p9254_p12 = scmp.lt.s32.totalorder %s9248_s4, %s9248_s4 }
  0x27   :  { %p9255_p13 = por %p9254_p12, %p9253_p11 }
  0x29   :  { %p9256_p0 = pnand %p9255_p13, %p9249_p10 }
  0x2b   :  { %9259 = shalt.err (!%p9256_p0)
}
  0x2c   :  { %s9331_s30 = smov 128   ;;  %s9332_s24 = smov 8  }
  0x2d   :  { %s12814_s26 = sld [smem:[#allocation91_spill]]  ;;  %s9333_s2 = smov [#allocation9]  }
  0x2e   :  { %s69_s6 = sshll.u32 %s9333_s2, 4  ;;  %s9334_s12 = smov [#allocation12]   ;;  %s70_s6 = int_to_ptr.vmem [resolvable:$true] %s69_s6 }
  0x2f   :  { %s103_s25 = sshll.u32 %s9334_s12, 4  ;;  %s9268_s27 = scalar_lea.vmem %s70_s6, 16  ;;  %s104_s25 = int_to_ptr.vmem [resolvable:$true] %s103_s25 }
  0x30   :  { %p9269_p1 = scmp.ne.s32.totalorder %s70_s6, %s9268_s27  ;;  %s9272_s7 = scalar_lea.vmem %s70_s6, 32 }
  0x31   :  { %p9273_p2 = scmp.lt.s32.totalorder %s70_s6, %s70_s6  ;;  %p9274_p3 = scmp.lt.s32.totalorder %s9272_s7, %s9268_s27 }
  0x33   :  { %46 = dma.hbm_to_vmem [thread:$0]  %s12814_s26, 2304, %s41_s0, [#allocation6], %s9331_s30, %s9331_s30, %s9332_s24  }
  0x34   :  { %p9275_p4 = por %p9274_p3, %p9273_p2 }
  0x36   :  { %p9276_p5 = pnand %p9275_p4, %p9269_p1 }
  0x38   :  { %9279 = shalt.err (!%p9276_p5)
}
  0x39   :  { %s12815_s3 = sld [smem:[#allocation96_spill]]  ;;  %s9288_s4 = scalar_lea.vmem %s104_s25, 16 }
  0x3a   :  { %p9289_p6 = scmp.ne.s32.totalorder %s104_s25, %s9288_s4  ;;  %s9292_s0 = scalar_lea.vmem %s104_s25, 32 }
  0x3b   :  { %p9293_p7 = scmp.lt.s32.totalorder %s104_s25, %s104_s25  ;;  %p9294_p8 = scmp.lt.s32.totalorder %s9292_s0, %s9288_s4 }
  0x3d   :  { %p9295_p9 = por %p9294_p8, %p9293_p7 }
  0x3f   :  { %72 = dma.hbm_to_vmem [thread:$0]  %s12815_s3, 16, %s70_s6, [#allocation8]  }
  0x40   :  { %p9296_p10 = pnand %p9295_p9, %p9289_p6 }
  0x42   :  { %9299 = shalt.err (!%p9296_p10)
}
  0x43   :  { %106 = dma.hbm_to_vmem [thread:$0]  %s12766_s15, 16, %s104_s25, [#allocation11]  }
  0x44   :  { %s9335_s5 = smov [#allocation13]  }
  0x45   :  { %s115_s1 = sshll.u32 %s9335_s5, 4  ;;  %s116_s1 = int_to_ptr.vmem [resolvable:$true] %s115_s1 }
  0x46   :  { %s9308_s26 = scalar_lea.vmem %s116_s1, 16  ;;  %s9312_s2 = scalar_lea.vmem %s116_s1, 32 }
  0x47   :  { %p9309_p11 = scmp.ne.s32.totalorder %s116_s1, %s9308_s26  ;;  %p9313_p12 = scmp.lt.s32.totalorder %s116_s1, %s116_s1 }
  0x48   :  { %p9314_p13 = scmp.lt.s32.totalorder %s9312_s2, %s9308_s26 }
  0x4a   :  { %p9315_p0 = por %p9314_p13, %p9313_p12 }
  0x4c   :  { %p9316_p1 = pnand %p9315_p0, %p9309_p11 }
  0x4e   :  { %9319 = shalt.err (!%p9316_p1)
}
  0x4f   :  { %118 = dma.hbm_to_vmem [thread:$0]  %s12768_s17, 16, %s116_s1, [#allocation14]  }
  0x50   :  { %9320 = dma.done.wait [#allocation6], 2304  }
  0x51   :  { %9321 = vsyncadd [#allocation6], 4294964992 }
  0x52   :  { %9322 = dma.done.wait [#allocation8], 32  }
  0x53   :  { %9323 = vsyncadd [#allocation8], 4294967264 }
  0x54   :  { %9324 = dma.done.wait [#allocation11], 32  }
  0x55   :  { %9325 = vsyncadd [#allocation11], 4294967264 }
  0x56   :  { %9326 = dma.done.wait [#allocation14], 16  }
  0x57   :  { %9327 = vsyncadd [#allocation14], 4294967280  ;;  %vm232_vm0 = vcmask 1046528   ;;  %v9336_v0 = vmov 0   ;;  %vm233_vm1 = vcmask 1047552   ;;  %v9337_v1 = vmov 65535  }
  0x58   :  { %274 = vmatprep.mubr.bf16.mxu0 %v9336_v0  ;;  %425 = vmatprep.mubr.bf16.mxu1 %v9336_v0  ;;  %v234_v2 = vsel %vm232_vm0, 4294967295, %v9337_v1  ;;  %v8877_v4 = vld [vmem:[#allocation5 + $0x14] ss:$8 sps:$4 sm:$0xff]   ;;  %v8879_v5 = vld [vmem:[#allocation5 + $0x4] ss:$8 sps:$4 sm:$0xff]   ;;  %s12816_s25 = sld [smem:[#allocation90_spill]] }
  0x59   :  { %v9484_v3 = vsel %vm233_vm1, %v234_v2, 0  ;;  %v8881_v7 = vld [vmem:[#allocation5 + $0x10] ss:$8 sps:$4 sm:$0xff]   ;;  %v8882_v8 = vld [vmem:[#allocation5] ss:$8 sps:$4 sm:$0xff]   ;;  %vm207_vm2 = vcmask 121856  }
  0x5a   :  { %v240_v6 = vand.u32 %v8877_v4, %v9484_v3  ;;  %v391_v10 = vand.u32 %v8879_v5, %v9484_v3  ;;  %v237_v14 = vand.u32 %v8881_v7, %v9484_v3  ;;  %v388_v15 = vand.u32 %v8882_v8, %v9484_v3  ;;  %v8883_v16 = vld [vmem:[#allocation5 + $0x20] ss:$8 sps:$4 sm:$0xff]   ;;  %v8885_v19 = vld [vmem:[#allocation5 + $0x24] ss:$8 sps:$4 sm:$0xff]   ;;  %v8886_v28 = vld [vmem:[#allocation5 + $0x30] ss:$8 sps:$4 sm:$0xff]  }
  0x5b   :  { %v569_v20 = vand.u32 %v8885_v19, %v9484_v3  ;;  %v566_v21 = vand.u32 %v8883_v16, %v9484_v3  ;;  %v8888_v29 = vld [vmem:[#allocation5 + $0x34] ss:$8 sps:$4 sm:$0xff]   ;;  %v776_v32 = vand.u32 %v8886_v28, %v9484_v3  ;;  %v8891_v33 = vld [vmem:[#allocation5 + $0x44] ss:$8 sps:$4 sm:$0xff]   ;;  %s12817_s6 = sld [smem:[#allocation93_spill]]  ;;  %vm2635_vm3 = vcmask 1045504  }
  0x5c   :  { %256 = vmatprep.subr.bf16.mxu0 %v240_v6  ;;  %407 = vmatprep.subr.bf16.mxu1 %v391_v10  ;;  %v779_v31 = vand.u32 %v8888_v29, %v9484_v3  ;;  %v989_v37 = vand.u32 %v8891_v33, %v9484_v3  ;;  %v8894_v40 = vld [vmem:[#allocation5 + $0x54] ss:$8 sps:$4 sm:$0xff]   ;;  %s12889_s30 = sld [smem:[#allocation92_spill]]  ;;  %vm3470_vm4 = vcmask 1044480   ;;  %vm9339_vm5 = vmmov 0   ;;  %s9341_s5 = smov 32  }
  0x5d   :  { %257 = vmatpush1.bf16.msra.mxu0 %v237_v14  ;;  %408 = vmatpush1.bf16.msra.mxu1 %v388_v15  ;;  %v1199_v45 = vand.u32 %v8894_v40, %v9484_v3  ;;  %v8897_v14 = vld [vmem:[#allocation5 + $0x64] ss:$8 sps:$4 sm:$0xff]   ;;  %v8900_v15 = vld [vmem:[#allocation5 + $0x74] ss:$8 sps:$4 sm:$0xff]   ;;  %s13042_s24 = sld [smem:[#allocation95_spill]]  ;;  %vm5773_vm6 = vcmask 523264  }
  0x5e   :  { %v172_v9 = vld [vmem:[%s12816_s25 + $0x2] sm:$0xff]  ;;  %v173_v11 = vld [vmem:[%s12816_s25 + $0xa] sm:$0xff]  ;;  %v174_v22 = vld [vmem:[%s12816_s25 + $0x12] sm:$0xff]  ;;  %585 = vmatprep.subr.bf16.mxu0 %v569_v20  ;;  %795 = vmatprep.subr.bf16.mxu1 %v779_v31  ;;  %v1409_v19 = vand.u32 %v8897_v14, %v9484_v3  ;;  %v1619_v20 = vand.u32 %v8900_v15, %v9484_v3  ;;  %vm6515_vm7 = vcmask 261120   ;;  %vm6951_vm9 = vcmask 1041408  }
  0x5f   :  { %v146_v12 = vld [vmem:[%s12816_s25] sm:$0xff]  ;;  %v147_v13 = vld [vmem:[%s12816_s25 + $0x8] sm:$0xff]  ;;  %v188_v17 = vpack.c.bf16 %v173_v11, %v172_v9  ;;  %v148_v24 = vld [vmem:[%s12816_s25 + $0x10] sm:$0xff]  ;;  %vm6971_vm10 = vcmask 254976   ;;  %vm6973_vm11 = vcmask 517376   ;;  %vm6979_vm12 = vcmask 779776  }
  0x60   :  { %v162_v18 = vpack.c.bf16 %v147_v13, %v146_v12  ;;  %v175_v23 = vld [vmem:[%s12816_s25 + $0x1a] sm:$0xff]  ;;  %v176_v30 = vld [vmem:[%s12816_s25 + $0x22] sm:$0xff]  ;;  %v177_v34 = vld [vmem:[%s12816_s25 + $0x2a] sm:$0xff]  ;;  %vm6985_vm13 = vcmask 1042176  }
  0x61   :  { %7001 = vmatmul.mubr.msk.bf16.vlgmr.msra.gmra.mxu0 %vm207_vm2, %v188_v17  ;;  %v149_v25 = vld [vmem:[%s12816_s25 + $0x18] sm:$0xff]  ;;  %v9520_v26 = vpack.c.bf16 %v175_v23, %v174_v22  ;;  %v150_v35 = vld [vmem:[%s12816_s25 + $0x20] sm:$0xff]  ;;  %v151_v36 = vld [vmem:[%s12816_s25 + $0x28] sm:$0xff]  ;;  %v9542_v38 = vpack.c.bf16 %v177_v34, %v176_v30 }
  0x62   :  { %7011 = vmatmul.mubr.msk.bf16.vlgmr.msra.gmra.mxu1 %vm207_vm2, %v162_v18  ;;  %284 = vmatprep.mubr.bf16.mxu0 %v9336_v0  ;;  %v163_v27 = vpack.c.bf16 %v149_v25, %v148_v24  ;;  %v164_v39 = vpack.c.bf16 %v151_v36, %v150_v35  ;;  %v178_v41 = vld [vmem:[%s12816_s25 + $0x32] sm:$0xff]  ;;  %v179_v42 = vld [vmem:[%s12816_s25 + $0x3a] sm:$0xff]  ;;  %v180_v48 = vld [vmem:[%s12816_s25 + $0x42] sm:$0xff] }
  0x63   :  { %586 = vmatpush1.bf16.msra.mxu0 %v566_v21  ;;  %435 = vmatprep.mubr.bf16.mxu1 %v9336_v0  ;;  %v152_v43 = vld [vmem:[%s12816_s25 + $0x30] sm:$0xff]  ;;  %v153_v44 = vld [vmem:[%s12816_s25 + $0x38] sm:$0xff]  ;;  %v9562_v46 = vpack.c.bf16 %v179_v42, %v178_v41  ;;  %v154_v50 = vld [vmem:[%s12816_s25 + $0x40] sm:$0xff] }
  0x64   :  { %796 = vmatpush1.bf16.msra.mxu1 %v776_v32  ;;  %1005 = vmatprep.subr.bf16.mxu0 %v989_v37  ;;  %v165_v47 = vpack.c.bf16 %v153_v44, %v152_v43  ;;  %v181_v49 = vld [vmem:[%s12816_s25 + $0x4a] sm:$0xff]  ;;  %v182_v54 = vld [vmem:[%s12816_s25 + $0x52] sm:$0xff]  ;;  %v183_v55 = vld [vmem:[%s12816_s25 + $0x5a] sm:$0xff] }
  0x65   :  { %1215 = vmatprep.subr.bf16.mxu1 %v1199_v45  ;;  %v155_v51 = vld [vmem:[%s12816_s25 + $0x48] sm:$0xff]  ;;  %v9581_v52 = vpack.c.bf16 %v181_v49, %v180_v48  ;;  %v156_v56 = vld [vmem:[%s12816_s25 + $0x50] sm:$0xff]  ;;  %v157_v57 = vld [vmem:[%s12816_s25 + $0x58] sm:$0xff]  ;;  %v9600_v58 = vpack.c.bf16 %v183_v55, %v182_v54 }
  0x66   :  { %v166_v53 = vpack.c.bf16 %v155_v51, %v154_v50  ;;  %v167_v59 = vpack.c.bf16 %v157_v57, %v156_v56  ;;  %v184_v60 = vld [vmem:[%s12816_s25 + $0x62] sm:$0xff]  ;;  %v185_v61 = vld [vmem:[%s12816_s25 + $0x6a] sm:$0xff]  ;;  %v186_v4 = vld [vmem:[%s12816_s25 + $0x72] sm:$0xff] }
  0x67   :  { %v158_v62 = vld [vmem:[%s12816_s25 + $0x60] sm:$0xff]  ;;  %v159_v63 = vld [vmem:[%s12816_s25 + $0x68] sm:$0xff]  ;;  %v9619_v1 = vpack.c.bf16 %v185_v61, %v184_v60  ;;  %v160_v6 = vld [vmem:[%s12816_s25 + $0x70] sm:$0xff] }
  0x68   :  { %v168_v2 = vpack.c.bf16 %v159_v63, %v158_v62  ;;  %v187_v5 = vld [vmem:[%s12816_s25 + $0x7a] sm:$0xff]  ;;  %v506_v10 = vld [vmem:[%s12816_s25 + $0x4] sm:$0xff]  ;;  %v507_v11 = vld [vmem:[%s12816_s25 + $0xc] sm:$0xff] }
  0x69   :  { %7002 = vmatmul.mubr.msk.bf16.gmra.mxu0 %vm207_vm2, %v9520_v26  ;;  %v161_v7 = vld [vmem:[%s12816_s25 + $0x78] sm:$0xff]  ;;  %v9638_v8 = vpack.c.bf16 %v187_v5, %v186_v4  ;;  %v8889_v12 = vld [vmem:[#allocation5 + $0x40] ss:$8 sps:$4 sm:$0xff]   ;;  %v522_v16 = vpack.c.bf16 %v507_v11, %v506_v10  ;;  %v8903_v49 = vld [vmem:[#allocation5 + $0x84] ss:$8 sps:$4 sm:$0xff]  }
  0x6a   :  { %7012 = vmatmul.mubr.msk.bf16.gmra.mxu1 %vm207_vm2, %v163_v27  ;;  %294 = vmatprep.mubr.bf16.mxu0 %v9336_v0  ;;  %v169_v9 = vpack.c.bf16 %v161_v7, %v160_v6  ;;  %v8892_v13 = vld [vmem:[#allocation5 + $0x50] ss:$8 sps:$4 sm:$0xff]   ;;  %v986_v17 = vand.u32 %v8889_v12, %v9484_v3  ;;  %v510_v24 = vld [vmem:[%s12816_s25 + $0x24] sm:$0xff]  ;;  %v511_v25 = vld [vmem:[%s12816_s25 + $0x2c] sm:$0xff]  ;;  %v1829_v55 = vand.u32 %v8903_v49, %v9484_v3 }
  0x6b   :  { %445 = vmatprep.mubr.bf16.mxu1 %v9336_v0  ;;  %v1196_v18 = vand.u32 %v8892_v13, %v9484_v3  ;;  %v508_v21 = vld [vmem:[%s12816_s25 + $0x14] sm:$0xff]  ;;  %v509_v22 = vld [vmem:[%s12816_s25 + $0x1c] sm:$0xff]  ;;  %v514_v30 = vld [vmem:[%s12816_s25 + $0x44] sm:$0xff] }
  0x6c   :  { %v523_v23 = vpack.c.bf16 %v509_v22, %v508_v21  ;;  %v512_v27 = vld [vmem:[%s12816_s25 + $0x34] sm:$0xff]  ;;  %v513_v28 = vld [vmem:[%s12816_s25 + $0x3c] sm:$0xff]  ;;  %v515_v31 = vld [vmem:[%s12816_s25 + $0x4c] sm:$0xff] }
  0x6d   :  { %v9691_v29 = vpack.c.bf16 %v513_v28, %v512_v27  ;;  %v9705_v32 = vpack.c.bf16 %v515_v31, %v514_v30  ;;  %v516_v33 = vld [vmem:[%s12816_s25 + $0x54] sm:$0xff]  ;;  %v517_v34 = vld [vmem:[%s12816_s25 + $0x5c] sm:$0xff]  ;;  %v518_v36 = vld [vmem:[%s12816_s25 + $0x64] sm:$0xff] }
  0x6e   :  { %v9719_v35 = vpack.c.bf16 %v517_v34, %v516_v33  ;;  %v519_v37 = vld [vmem:[%s12816_s25 + $0x6c] sm:$0xff]  ;;  %v521_v40 = vld [vmem:[%s12816_s25 + $0x7c] sm:$0xff]  ;;  %v940_v10 = vld [vmem:[%s12816_s25 + $0x84] sm:$0xff] }
  0x6f   :  { %v730_v41 = vld [vmem:[%s12816_s25 + $0x82] sm:$0xff]  ;;  %v731_v42 = vld [vmem:[%s12816_s25 + $0x8a] sm:$0xff]  ;;  %v1140_v57 = vld [vmem:[%s12816_s25 + $0x36] sm:$0xff] }
  0x70   :  { %v739_v44 = vpack.c.bf16 %v731_v42, %v730_v41  ;;  %v8895_v45 = vld [vmem:[#allocation5 + $0x60] ss:$8 sps:$4 sm:$0xff]   ;;  %v8898_v48 = vld [vmem:[#allocation5 + $0x70] ss:$8 sps:$4 sm:$0xff]  }
  0x71   :  { %7003 = vmatmul.mubr.msk.bf16.gmra.mxu0 %vm207_vm2, %v9542_v38  ;;  %v1406_v51 = vand.u32 %v8895_v45, %v9484_v3  ;;  %v1139_v54 = vld [vmem:[%s12816_s25 + $0x2e] sm:$0xff]  ;;  %v1142_v60 = vld [vmem:[%s12816_s25 + $0x46] sm:$0xff]  ;;  %v1144_v63 = vld [vmem:[%s12816_s25 + $0x56] sm:$0xff] }
  0x72   :  { %7013 = vmatmul.mubr.msk.bf16.gmra.mxu1 %vm207_vm2, %v164_v39  ;;  %304 = vmatprep.mubr.bf16.mxu0 %v9336_v0  ;;  %v520_v39 = vld [vmem:[%s12816_s25 + $0x74] sm:$0xff]  ;;  %v1146_v4 = vld [vmem:[%s12816_s25 + $0x66] sm:$0xff] }
  0x73   :  { %455 = vmatprep.mubr.bf16.mxu1 %v9336_v0  ;;  %v9753_v43 = vpack.c.bf16 %v521_v40, %v520_v39  ;;  %v1143_v61 = vld [vmem:[%s12816_s25 + $0x4e] sm:$0xff]  ;;  %v1148_v7 = vld [vmem:[%s12816_s25 + $0x76] sm:$0xff]  ;;  %v1150_v12 = vld [vmem:[%s12816_s25 + $0x86] sm:$0xff] }
  0x74   :  { %v9804_v62 = vpack.c.bf16 %v1143_v61, %v1142_v60  ;;  %v1147_v5 = vld [vmem:[%s12816_s25 + $0x6e] sm:$0xff] }
  0x75   :  { %v9832_v6 = vpack.c.bf16 %v1147_v5, %v1146_v4  ;;  %v941_v11 = vld [vmem:[%s12816_s25 + $0x8c] sm:$0xff] }
  0x76   :  { %v1151_v13 = vld [vmem:[%s12816_s25 + $0x8e] sm:$0xff]  ;;  %v9866_v14 = vpack.c.bf16 %v941_v11, %v940_v10 }
  0x77   :  { %v9868_v15 = vpack.c.bf16 %v1151_v13, %v1150_v12 }
  0x79   :  { %7004 = vmatmul.mubr.msk.bf16.gmra.mxu0 %vm207_vm2, %v9562_v46 }
  0x7a   :  { %7014 = vmatmul.mubr.msk.bf16.gmra.mxu1 %vm207_vm2, %v165_v47  ;;  %314 = vmatprep.mubr.bf16.mxu0 %v9336_v0  ;;  %v1137_v47 = vld [vmem:[%s12816_s25 + $0x1e] sm:$0xff] }
  0x7b   :  { %465 = vmatprep.mubr.bf16.mxu1 %v9336_v0 }
  0x81   :  { %7005 = vmatmul.mubr.msk.bf16.gmra.mxu0 %vm207_vm2, %v9581_v52 }
  0x82   :  { %7015 = vmatmul.mubr.msk.bf16.gmra.mxu1 %vm207_vm2, %v166_v53  ;;  %324 = vmatprep.mubr.bf16.mxu0 %v9336_v0  ;;  %v1138_v53 = vld [vmem:[%s12816_s25 + $0x26] sm:$0xff] }
  0x83   :  { %475 = vmatprep.mubr.bf16.mxu1 %v9336_v0  ;;  %v1153_v56 = vpack.c.bf16 %v1139_v54, %v1138_v53 }
  0x89   :  { %7006 = vmatmul.mubr.msk.bf16.gmra.mxu0 %vm207_vm2, %v9600_v58 }
  0x8a   :  { %7016 = vmatmul.mubr.msk.bf16.gmra.mxu1 %vm207_vm2, %v167_v59  ;;  %334 = vmatprep.mubr.bf16.mxu0 %v9336_v0 }
  0x8b   :  { %485 = vmatprep.mubr.bf16.mxu1 %v9336_v0 }
  0x91   :  { %7007 = vmatmul.mubr.msk.bf16.gmra.mxu0 %vm207_vm2, %v9619_v1 }
  0x92   :  { %7017 = vmatmul.mubr.msk.bf16.gmra.mxu1 %vm207_vm2, %v168_v2  ;;  %344 = vmatprep.mubr.bf16.mxu0 %v9336_v0 }
  0x93   :  { %495 = vmatprep.mubr.bf16.mxu1 %v9336_v0 }
  0x99   :  { %7008 = vmatmul.mubr.msk.bf16.gmra.mxu0 %vm207_vm2, %v9638_v8 }
  0x9a   :  { %7018 = vmatmul.mubr.msk.bf16.gmra.mxu1 %vm207_vm2, %v169_v9  ;;  %603 = vmatprep.mubr.bf16.mxu0 %v9336_v0 }
  0x9b   :  { %813 = vmatprep.mubr.bf16.mxu1 %v9336_v0 }
  0xa1   :  { %7021 = vmatmul.mubr.msk.bf16.vlgmr.msra.gmra.mxu0 %vm207_vm2, %v522_v16  ;;  %v8901_v16 = vld [vmem:[#allocation5 + $0x80] ss:$8 sps:$4 sm:$0xff]  }
  0xa2   :  { %7031 = vmatmul.mubr.msk.bf16.vlgmr.msra.gmra.mxu1 %vm207_vm2, %v9520_v26  ;;  %1006 = vmatpush1.bf16.msra.mxu0 %v986_v17  ;;  %v9677_v26 = vpack.c.bf16 %v511_v25, %v510_v24  ;;  %v1826_v17 = vand.u32 %v8901_v16, %v9484_v3 }
  0xa3   :  { %613 = vmatprep.mubr.bf16.mxu0 %v9336_v0  ;;  %823 = vmatprep.mubr.bf16.mxu1 %v9336_v0 }
  0xa4   :  { %1216 = vmatpush1.bf16.msra.mxu1 %v1196_v18  ;;  %1425 = vmatprep.subr.bf16.mxu0 %v1409_v19 }
  0xa5   :  { %1635 = vmatprep.subr.bf16.mxu1 %v1619_v20 }
  0xa9   :  { %7022 = vmatmul.mubr.msk.bf16.gmra.mxu0 %vm207_vm2, %v523_v23 }
  0xaa   :  { %7032 = vmatmul.mubr.msk.bf16.gmra.mxu1 %vm207_vm2, %v9542_v38  ;;  %623 = vmatprep.mubr.bf16.mxu0 %v9336_v0  ;;  %v9733_v38 = vpack.c.bf16 %v519_v37, %v518_v36 }
  0xab   :  { %833 = vmatprep.mubr.bf16.mxu1 %v9336_v0 }
  0xb1   :  { %7023 = vmatmul.mubr.msk.bf16.gmra.mxu0 %vm207_vm2, %v9677_v26 }
  0xb2   :  { %7033 = vmatmul.mubr.msk.bf16.gmra.mxu1 %vm207_vm2, %v9562_v46  ;;  %633 = vmatprep.mubr.bf16.mxu0 %v9336_v0  ;;  %v1136_v46 = vld [vmem:[%s12816_s25 + $0x16] sm:$0xff] }
  0xb3   :  { %843 = vmatprep.mubr.bf16.mxu1 %v9336_v0  ;;  %v1152_v50 = vpack.c.bf16 %v1137_v47, %v1136_v46 }
  0xb9   :  { %7024 = vmatmul.mubr.msk.bf16.gmra.mxu0 %vm207_vm2, %v9691_v29 }
  0xba   :  { %7034 = vmatmul.mubr.msk.bf16.gmra.mxu1 %vm207_vm2, %v9581_v52  ;;  %643 = vmatprep.mubr.bf16.mxu0 %v9336_v0  ;;  %v1616_v52 = vand.u32 %v8898_v48, %v9484_v3 }
  0xbb   :  { %853 = vmatprep.mubr.bf16.mxu1 %v9336_v0 }
  0xc1   :  { %7025 = vmatmul.mubr.msk.bf16.gmra.mxu0 %vm207_vm2, %v9705_v32 }
  0xc2   :  { %7035 = vmatmul.mubr.msk.bf16.gmra.mxu1 %vm207_vm2, %v9600_v58  ;;  %653 = vmatprep.mubr.bf16.mxu0 %v9336_v0  ;;  %v1141_v58 = vld [vmem:[%s12816_s25 + $0x3e] sm:$0xff] }
  0xc3   :  { %863 = vmatprep.mubr.bf16.mxu1 %v9336_v0  ;;  %v9790_v59 = vpack.c.bf16 %v1141_v58, %v1140_v57 }
  0xc9   :  { %7026 = vmatmul.mubr.msk.bf16.gmra.mxu0 %vm207_vm2, %v9719_v35 }
  0xca   :  { %7036 = vmatmul.mubr.msk.bf16.gmra.mxu1 %vm207_vm2, %v9619_v1  ;;  %663 = vmatprep.mubr.bf16.mxu0 %v9336_v0  ;;  %v1145_v1 = vld [vmem:[%s12816_s25 + $0x5e] sm:$0xff] }
  0xcb   :  { %873 = vmatprep.mubr.bf16.mxu1 %v9336_v0  ;;  %v9818_v2 = vpack.c.bf16 %v1145_v1, %v1144_v63 }
  0xd1   :  { %7027 = vmatmul.mubr.msk.bf16.gmra.mxu0 %vm207_vm2, %v9733_v38 }
  0xd2   :  { %7037 = vmatmul.mubr.msk.bf16.gmra.mxu1 %vm207_vm2, %v9638_v8  ;;  %673 = vmatprep.mubr.bf16.mxu0 %v9336_v0  ;;  %v1149_v8 = vld [vmem:[%s12816_s25 + $0x7e] sm:$0xff] }
  0xd3   :  { %883 = vmatprep.mubr.bf16.mxu1 %v9336_v0  ;;  %v9846_v9 = vpack.c.bf16 %v1149_v8, %v1148_v7 }
  0xd9   :  { %7028 = vmatmul.mubr.msk.bf16.gmra.mxu0 %vm207_vm2, %v9753_v43 }
  0xda   :  { %7038 = vmatmul.mubr.msk.bf16.gmra.mxu1 %vm207_vm2, %v739_v44  ;;  %1023 = vmatprep.mubr.bf16.mxu0 %v9336_v0 }
  0xdb   :  { %1233 = vmatprep.mubr.bf16.mxu1 %v9336_v0 }
  0xe1   :  { %7041 = vmatmul.mubr.msk.bf16.vlgmr.msra.gmra.mxu0 %vm207_vm2, %v523_v23 }
  0xe2   :  { %7051 = vmatmul.mubr.msk.bf16.vlgmr.msra.gmra.mxu1 %vm207_vm2, %v1152_v50  ;;  %1426 = vmatpush1.bf16.msra.mxu0 %v1406_v51 }
  0xe3   :  { %1033 = vmatprep.mubr.bf16.mxu0 %v9336_v0  ;;  %1243 = vmatprep.mubr.bf16.mxu1 %v9336_v0 }
  0xe4   :  { %1636 = vmatpush1.bf16.msra.mxu1 %v1616_v52  ;;  %1845 = vmatprep.subr.bf16.mxu0 %v1829_v55 }
  0xe9   :  { %7042 = vmatmul.mubr.msk.bf16.gmra.mxu0 %vm207_vm2, %v9677_v26 }
  0xea   :  { %7052 = vmatmul.mubr.msk.bf16.gmra.mxu1 %vm207_vm2, %v1153_v56  ;;  %1043 = vmatprep.mubr.bf16.mxu0 %v9336_v0 }
  0xeb   :  { %1253 = vmatprep.mubr.bf16.mxu1 %v9336_v0 }
  0xf1   :  { %7043 = vmatmul.mubr.msk.bf16.gmra.mxu0 %vm207_vm2, %v9691_v29 }
  0xf2   :  { %7053 = vmatmul.mubr.msk.bf16.gmra.mxu1 %vm207_vm2, %v9790_v59  ;;  %1053 = vmatprep.mubr.bf16.mxu0 %v9336_v0 }
  0xf3   :  { %1263 = vmatprep.mubr.bf16.mxu1 %v9336_v0 }
  0xf9   :  { %7044 = vmatmul.mubr.msk.bf16.gmra.mxu0 %vm207_vm2, %v9705_v32 }
  0xfa   :  { %7054 = vmatmul.mubr.msk.bf16.gmra.mxu1 %vm207_vm2, %v9804_v62  ;;  %1063 = vmatprep.mubr.bf16.mxu0 %v9336_v0 }
  0xfb   :  { %1273 = vmatprep.mubr.bf16.mxu1 %v9336_v0 }
 0x101   :  { %7045 = vmatmul.mubr.msk.bf16.gmra.mxu0 %vm207_vm2, %v9719_v35 }
 0x102   :  { %7055 = vmatmul.mubr.msk.bf16.gmra.mxu1 %vm207_vm2, %v9818_v2  ;;  %1073 = vmatprep.mubr.bf16.mxu0 %v9336_v0 }
 0x103   :  { %1283 = vmatprep.mubr.bf16.mxu1 %v9336_v0 }
 0x109   :  { %7046 = vmatmul.mubr.msk.bf16.gmra.mxu0 %vm207_vm2, %v9733_v38 }
 0x10a   :  { %7056 = vmatmul.mubr.msk.bf16.gmra.mxu1 %vm207_vm2, %v9832_v6  ;;  %1083 = vmatprep.mubr.bf16.mxu0 %v9336_v0 }
 0x10b   :  { %1293 = vmatprep.mubr.bf16.mxu1 %v9336_v0 }
 0x111   :  { %7047 = vmatmul.mubr.msk.bf16.gmra.mxu0 %vm207_vm2, %v9753_v43 }
 0x112   :  { %7057 = vmatmul.mubr.msk.bf16.gmra.mxu1 %vm207_vm2, %v9846_v9  ;;  %1093 = vmatprep.mubr.bf16.mxu0 %v9336_v0 }
 0x113   :  { %1303 = vmatprep.mubr.bf16.mxu1 %v9336_v0 }
 0x119   :  { %7048 = vmatmul.mubr.msk.bf16.gmra.mxu0 %vm207_vm2, %v9866_v14 }
 0x11a   :  { %7058 = vmatmul.mubr.msk.bf16.gmra.mxu1 %vm207_vm2, %v9868_v15  ;;  %1443 = vmatprep.mubr.bf16.mxu0 %v9336_v0 }
 0x11b   :  { %1653 = vmatprep.mubr.bf16.mxu1 %v9336_v0 }
 0x121   :  { %v276_v18 = vpop.f32.mrf.mxu0  ;;  %7061 = vmatmul.mubr.msk.bf16.vlgmr.msra.gmra.mxu0 %vm207_vm2, %v9677_v26 }
 0x122   :  { %v427_v19 = vpop.f32.mrf.mxu1  ;;  %7071 = vmatmul.mubr.msk.bf16.vlgmr.msra.gmra.mxu1 %vm207_vm2, %v1153_v56  ;;  %1846 = vmatpush1.bf16.msra.mxu0 %v1826_v17 }
 0x123   :  { %v9880_v20 = vadd.f32 %v427_v19, %v276_v18  ;;  %1453 = vmatprep.mubr.bf16.mxu0 %v9336_v0  ;;  %v278_v21 = vpop.f32.mrf.mxu0  ;;  %1663 = vmatprep.mubr.bf16.mxu1 %v9336_v0 }
 0x124   :  { %v429_v22 = vpop.f32.mrf.mxu1 }
 0x125   :  { %v9884_v23 = vadd.f32 %v429_v22, %v278_v21  ;;  %v280_v24 = vpop.f32.mrf.mxu0 }
 0x126   :  { %v431_v3 = vpop.f32.mrf.mxu1 }
 0x127   :  { %v9886_v25 = vadd.f32 %v431_v3, %v280_v24  ;;  %v282_v27 = vpop.f32.mrf.mxu0 }
 0x128   :  { %v433_v28 = vpop.f32.mrf.mxu1 }
 0x129   :  { %v9888_v26 = vadd.f32 %v433_v28, %v282_v27  ;;  %v286_v30 = vpop.f32.mrf.mxu0  ;;  %7062 = vmatmul.mubr.msk.bf16.gmra.mxu0 %vm207_vm2, %v9691_v29 }
 0x12a   :  { %v437_v31 = vpop.f32.mrf.mxu1  ;;  %7072 = vmatmul.mubr.msk.bf16.gmra.mxu1 %vm207_vm2, %v9790_v59  ;;  %1463 = vmatprep.mubr.bf16.mxu0 %v9336_v0 }
 0x12b   :  { %v9894_v33 = vadd.f32 %v437_v31, %v286_v30  ;;  %1673 = vmatprep.mubr.bf16.mxu1 %v9336_v0  ;;  %v288_v34 = vpop.f32.mrf.mxu0 }
 0x12c   :  { %v439_v36 = vpop.f32.mrf.mxu1 }
 0x12d   :  { %v9898_v37 = vadd.f32 %v439_v36, %v288_v34  ;;  %v290_v39 = vpop.f32.mrf.mxu0  ;;  %v1360_v36 = vld [vmem:[%s12816_s25 + $0x94] sm:$0xff] }
 0x12e   :  { %v441_v40 = vpop.f32.mrf.mxu1 }
 0x12f   :  { %v9900_v41 = vadd.f32 %v441_v40, %v290_v39  ;;  %v292_v42 = vpop.f32.mrf.mxu0  ;;  %v1361_v40 = vld [vmem:[%s12816_s25 + $0x9c] sm:$0xff] }
 0x130   :  { %v443_v44 = vpop.f32.mrf.mxu1 }
 0x131   :  { %v9902_v29 = vadd.f32 %v443_v44, %v292_v42  ;;  %v296_v45 = vpop.f32.mrf.mxu0  ;;  %7063 = vmatmul.mubr.msk.bf16.gmra.mxu0 %vm207_vm2, %v9705_v32 }
 0x132   :  { %v447_v46 = vpop.f32.mrf.mxu1  ;;  %7073 = vmatmul.mubr.msk.bf16.gmra.mxu1 %vm207_vm2, %v9804_v62  ;;  %1473 = vmatprep.mubr.bf16.mxu0 %v9336_v0 }
 0x133   :  { %v9908_v47 = vadd.f32 %v447_v46, %v296_v45  ;;  %1683 = vmatprep.mubr.bf16.mxu1 %v9336_v0  ;;  %v298_v48 = vpop.f32.mrf.mxu0 }
 0x134   :  { %v449_v49 = vpop.f32.mrf.mxu1 }
 0x135   :  { %v9912_v50 = vadd.f32 %v449_v49, %v298_v48  ;;  %v300_v51 = vpop.f32.mrf.mxu0  ;;  %v1369_v49 = vpack.c.bf16 %v1361_v40, %v1360_v36  ;;  %v9190_v40 = vld [vmem:[%s12816_s25 + $0x38] sm:$0xff] }
 0x136   :  { %v451_v52 = vpop.f32.mrf.mxu1 }
 0x137   :  { %v9914_v53 = vadd.f32 %v451_v52, %v300_v51  ;;  %v302_v54 = vpop.f32.mrf.mxu0 }
 0x138   :  { %v453_v55 = vpop.f32.mrf.mxu1 }
 0x139   :  { %v9916_v32 = vadd.f32 %v453_v55, %v302_v54  ;;  %v306_v56 = vpop.f32.mrf.mxu0  ;;  %7064 = vmatmul.mubr.msk.bf16.gmra.mxu0 %vm207_vm2, %v9719_v35 }
 0x13a   :  { %v457_v57 = vpop.f32.mrf.mxu1  ;;  %7074 = vmatmul.mubr.msk.bf16.gmra.mxu1 %vm207_vm2, %v9818_v2  ;;  %1483 = vmatprep.mubr.bf16.mxu0 %v9336_v0 }
 0x13b   :  { %v9922_v58 = vadd.f32 %v457_v57, %v306_v56  ;;  %1693 = vmatprep.mubr.bf16.mxu1 %v9336_v0  ;;  %v308_v59 = vpop.f32.mrf.mxu0 }
 0x13c   :  { %v459_v60 = vpop.f32.mrf.mxu1 }
 0x13d   :  { %v9926_v61 = vadd.f32 %v459_v60, %v308_v59  ;;  %v310_v62 = vpop.f32.mrf.mxu0 }
 0x13e   :  { %v461_v63 = vpop.f32.mrf.mxu1 }
 0x13f   :  { %v9928_v1 = vadd.f32 %v461_v63, %v310_v62  ;;  %v312_v4 = vpop.f32.mrf.mxu0 }
 0x140   :  { %v463_v5 = vpop.f32.mrf.mxu1 }
 0x141   :  { %v9930_v35 = vadd.f32 %v463_v5, %v312_v4  ;;  %v316_v7 = vpop.f32.mrf.mxu0  ;;  %7065 = vmatmul.mubr.msk.bf16.gmra.mxu0 %vm207_vm2, %v9733_v38 }
 0x142   :  { %v467_v2 = vpop.f32.mrf.mxu1  ;;  %7075 = vmatmul.mubr.msk.bf16.gmra.mxu1 %vm207_vm2, %v9832_v6  ;;  %1493 = vmatprep.mubr.bf16.mxu0 %v9336_v0 }
 0x143   :  { %v9936_v8 = vadd.f32 %v467_v2, %v316_v7  ;;  %1703 = vmatprep.mubr.bf16.mxu1 %v9336_v0  ;;  %v318_v10 = vpop.f32.mrf.mxu0  ;;  %v9188_v7 = vld [vmem:[%s12816_s25 + $0x28] sm:$0xff]  ;;  %v9189_v2 = vld [vmem:[%s12816_s25 + $0x30] sm:$0xff] }
 0x144   :  { %v469_v11 = vpop.f32.mrf.mxu1 }
 0x145   :  { %v9940_v12 = vadd.f32 %v469_v11, %v318_v10  ;;  %v320_v13 = vpop.f32.mrf.mxu0  ;;  %v1782_v10 = vpack.c.bf16 %v9189_v2, %v9188_v7  ;;  %v9193_v7 = vld [vmem:[%s12816_s25 + $0x50] sm:$0xff] }
 0x146   :  { %v471_v16 = vpop.f32.mrf.mxu1 }
 0x147   :  { %v9942_v17 = vadd.f32 %v471_v16, %v320_v13  ;;  %v9944_v18 = vpop.f32.mrf.mxu0 }
 0x148   :  { %v9946_v38 = vpop.f32.mrf.mxu1 }
 0x149   :  { %v326_v19 = vpop.f32.mrf.mxu0  ;;  %7066 = vmatmul.mubr.msk.bf16.gmra.mxu0 %vm207_vm2, %v9753_v43 }
 0x14a   :  { %v477_v6 = vpop.f32.mrf.mxu1  ;;  %7076 = vmatmul.mubr.msk.bf16.gmra.mxu1 %vm207_vm2, %v9846_v9  ;;  %1503 = vmatprep.mubr.bf16.mxu0 %v9336_v0 }
 0x14b   :  { %v9952_v21 = vadd.f32 %v477_v6, %v326_v19  ;;  %1713 = vmatprep.mubr.bf16.mxu1 %v9336_v0  ;;  %v328_v22 = vpop.f32.mrf.mxu0 }
 0x14c   :  { %v479_v24 = vpop.f32.mrf.mxu1 }
 0x14d   :  { %v9956_v3 = vadd.f32 %v479_v24, %v328_v22  ;;  %v330_v27 = vpop.f32.mrf.mxu0 }
 0x14e   :  { %v481_v28 = vpop.f32.mrf.mxu1 }
 0x14f   :  { %v9958_v30 = vadd.f32 %v481_v28, %v330_v27  ;;  %v9960_v31 = vpop.f32.mrf.mxu0 }
 0x150   :  { %v9962_v43 = vpop.f32.mrf.mxu1 }
 0x151   :  { %v336_v34 = vpop.f32.mrf.mxu0  ;;  %7067 = vmatmul.mubr.msk.bf16.gmra.mxu0 %vm207_vm2, %v9866_v14  ;;  %v1570_v14 = vld [vmem:[%s12816_s25 + $0x96] sm:$0xff] }
 0x152   :  { %v487_v9 = vpop.f32.mrf.mxu1  ;;  %7077 = vmatmul.mubr.msk.bf16.gmra.mxu1 %vm207_vm2, %v9868_v15  ;;  %1513 = vmatprep.mubr.bf16.mxu0 %v9336_v0  ;;  %v1571_v15 = vld [vmem:[%s12816_s25 + $0x9e] sm:$0xff] }
 0x153   :  { %v9971_v39 = vadd.f32 %v487_v9, %v336_v34  ;;  %1723 = vmatprep.mubr.bf16.mxu1 %v9336_v0  ;;  %v338_v42 = vpop.f32.mrf.mxu0  ;;  %v1579_v51 = vpack.c.bf16 %v1571_v15, %v1570_v14  ;;  %v9191_v14 = vld [vmem:[%s12816_s25 + $0x40] sm:$0xff] }
 0x154   :  { %v489_v44 = vpop.f32.mrf.mxu1  ;;  %v1783_v15 = vpack.c.bf16 %v9191_v14, %v9190_v40 }
 0x155   :  { %v9984_v45 = vadd.f32 %v489_v44, %v338_v42  ;;  %v340_v46 = vpop.f32.mrf.mxu0 }
 0x156   :  { %v491_v48 = vpop.f32.mrf.mxu1 }
 0x157   :  { %v9986_v52 = vadd.f32 %v491_v48, %v340_v46  ;;  %v9988_v54 = vpop.f32.mrf.mxu0 }
 0x158   :  { %v9990_v55 = vpop.f32.mrf.mxu1 }
 0x159   :  { %v346_v56 = vpop.f32.mrf.mxu0  ;;  %7068 = vmatmul.mubr.msk.bf16.gmra.mxu0 %vm207_vm2, %v1369_v49 }
 0x15a   :  { %v497_v57 = vpop.f32.mrf.mxu1  ;;  %7078 = vmatmul.mubr.msk.bf16.gmra.mxu1 %vm207_vm2, %v1579_v51  ;;  %1863 = vmatprep.mubr.bf16.mxu0 %v9336_v0 }
 0x15b   :  { %v9994_v59 = vadd.f32 %v497_v57, %v346_v56  ;;  %v348_v60 = vpop.f32.mrf.mxu0 }
 0x15c   :  { %v499_v62 = vpop.f32.mrf.mxu1 }
 0x15d   :  { %v9997_v63 = vadd.f32 %v499_v62, %v348_v60  ;;  %v350_v4 = vpop.f32.mrf.mxu0 }
 0x15e   :  { %v501_v5 = vpop.f32.mrf.mxu1 }
 0x15f   :  { %v10005_v11 = vadd.f32 %v501_v5, %v350_v4  ;;  %v10007_v13 = vpop.f32.mrf.mxu0 }
 0x160   :  { %v10009_v16 = vpop.f32.mrf.mxu1 }
 0x161   :  { %v605_v19 = vpop.f32.mrf.mxu0  ;;  %7081 = vmatmul.mubr.msk.bf16.vlgmr.msra.gmra.mxu0 %vm207_vm2, %v1782_v10 }
 0x162   :  { %v815_v6 = vpop.f32.mrf.mxu1  ;;  %v684_v22 = vadd.f32 %v605_v19, %v9880_v20  ;;  %1873 = vmatprep.mubr.bf16.mxu0 %v9336_v0 }
 0x163   :  { %v607_v24 = vpop.f32.mrf.mxu0 }
 0x164   :  { %v817_v27 = vpop.f32.mrf.mxu1  ;;  %v685_v28 = vadd.f32 %v607_v24, %v9884_v23  ;;  %v10015_v34 = vadd.f32 %v815_v6, %v684_v22 }
 0x165   :  { %v609_v9 = vpop.f32.mrf.mxu0 }
 0x166   :  { %v819_v36 = vpop.f32.mrf.mxu1  ;;  %v686_v20 = vadd.f32 %v609_v9, %v9886_v25  ;;  %v10024_v42 = vadd.f32 %v817_v27, %v685_v28 }
 0x167   :  { %v611_v44 = vpop.f32.mrf.mxu0 }
 0x168   :  { %v10026_v46 = vpop.f32.mrf.mxu1  ;;  %v10029_v23 = vadd.f32 %v611_v44, %v9888_v26  ;;  %v10031_v48 = vadd.f32 %v819_v36, %v686_v20  ;;  %v9192_v26 = vld [vmem:[%s12816_s25 + $0x48] sm:$0xff]  ;;  %v9195_v20 = vld [vmem:[%s12816_s25 + $0x60] sm:$0xff] }
 0x169   :  { %v615_v49 = vpop.f32.mrf.mxu0  ;;  %7082 = vmatmul.mubr.msk.bf16.gmra.mxu0 %vm207_vm2, %v1783_v15  ;;  %v1784_v2 = vpack.c.bf16 %v9193_v7, %v9192_v26 }
 0x16a   :  { %v825_v51 = vpop.f32.mrf.mxu1  ;;  %v688_v56 = vadd.f32 %v615_v49, %v9894_v33  ;;  %1883 = vmatprep.mubr.bf16.mxu0 %v9336_v0 }
 0x16b   :  { %v617_v57 = vpop.f32.mrf.mxu0 }
 0x16c   :  { %v827_v25 = vpop.f32.mrf.mxu1  ;;  %v689_v60 = vadd.f32 %v617_v57, %v9898_v37  ;;  %v10037_v62 = vadd.f32 %v825_v51, %v688_v56 }
 0x16d   :  { %v619_v4 = vpop.f32.mrf.mxu0 }
 0x16e   :  { %v829_v5 = vpop.f32.mrf.mxu1  ;;  %v690_v33 = vadd.f32 %v619_v4, %v9900_v41  ;;  %v10046_v10 = vadd.f32 %v827_v25, %v689_v60 }
 0x16f   :  { %v621_v19 = vpop.f32.mrf.mxu0 }
 0x170   :  { %v10048_v6 = vpop.f32.mrf.mxu1  ;;  %v10051_v37 = vadd.f32 %v621_v19, %v9902_v29  ;;  %v10053_v22 = vadd.f32 %v829_v5, %v690_v33  ;;  %v9194_v29 = vld [vmem:[%s12816_s25 + $0x58] sm:$0xff]  ;;  %v9197_v19 = vld [vmem:[%s12816_s25 + $0x70] sm:$0xff] }
 0x171   :  { %v625_v24 = vpop.f32.mrf.mxu0  ;;  %7083 = vmatmul.mubr.msk.bf16.gmra.mxu0 %vm207_vm2, %v1784_v2  ;;  %v1785_v44 = vpack.c.bf16 %v9195_v20, %v9194_v29 }
 0x172   :  { %v835_v27 = vpop.f32.mrf.mxu1  ;;  %v692_v28 = vadd.f32 %v625_v24, %v9908_v47  ;;  %1893 = vmatprep.mubr.bf16.mxu0 %v9336_v0 }
 0x173   :  { %v627_v9 = vpop.f32.mrf.mxu0 }
 0x174   :  { %v837_v41 = vpop.f32.mrf.mxu1  ;;  %v693_v36 = vadd.f32 %v627_v9, %v9912_v50  ;;  %v10059_v40 = vadd.f32 %v835_v27, %v692_v28 }
 0x175   :  { %v629_v14 = vpop.f32.mrf.mxu0 }
 0x176   :  { %v839_v15 = vpop.f32.mrf.mxu1  ;;  %v694_v47 = vadd.f32 %v629_v14, %v9914_v53  ;;  %v10068_v49 = vadd.f32 %v837_v41, %v693_v36 }
 0x177   :  { %v631_v51 = vpop.f32.mrf.mxu0 }
 0x178   :  { %v10070_v56 = vpop.f32.mrf.mxu1  ;;  %v10073_v50 = vadd.f32 %v631_v51, %v9916_v32  ;;  %v10075_v57 = vadd.f32 %v839_v15, %v694_v47  ;;  %v9196_v32 = vld [vmem:[%s12816_s25 + $0x68] sm:$0xff]  ;;  %v8904_v47 = vld [vmem:[%s12817_s6 + $0xf8] sm:$0xff]  }
 0x179   :  { %v635_v25 = vpop.f32.mrf.mxu0  ;;  %7084 = vmatmul.mubr.msk.bf16.gmra.mxu0 %vm207_vm2, %v1785_v44  ;;  %v1786_v24 = vpack.c.bf16 %v9197_v19, %v9196_v32  ;;  %7824 = vmatprep.subr.bf16.mxu1 %v8904_v47  ;;  %v1778_v19 = vld [vmem:[%s12816_s25 + $0x88] sm:$0xff]  ;;  %v8907_v47 = vld [vmem:[%s12817_s6 + $0xb0] sm:$0xff]  }
 0x17a   :  { %v845_v60 = vpop.f32.mrf.mxu1  ;;  %v696_v4 = vadd.f32 %v635_v25, %v9922_v58  ;;  %1903 = vmatprep.mubr.bf16.mxu0 %v9336_v0 }
 0x17b   :  { %v637_v5 = vpop.f32.mrf.mxu0 }
 0x17c   :  { %v847_v53 = vpop.f32.mrf.mxu1  ;;  %v697_v26 = vadd.f32 %v637_v5, %v9926_v61  ;;  %v10081_v7 = vadd.f32 %v845_v60, %v696_v4 }
 0x17d   :  { %v639_v2 = vpop.f32.mrf.mxu0 }
 0x17e   :  { %v849_v33 = vpop.f32.mrf.mxu1  ;;  %v698_v58 = vadd.f32 %v639_v2, %v9928_v1  ;;  %v10090_v27 = vadd.f32 %v847_v53, %v697_v26  ;;  %v1777_v1 = vld [vmem:[%s12816_s25 + $0x80] sm:$0xff] }
 0x17f   :  { %v641_v28 = vpop.f32.mrf.mxu0 }
 0x180   :  { %v10092_v9 = vpop.f32.mrf.mxu1  ;;  %v10095_v61 = vadd.f32 %v641_v28, %v9930_v35  ;;  %v10097_v41 = vadd.f32 %v849_v33, %v698_v58 }
 0x181   :  { %v645_v36 = vpop.f32.mrf.mxu0  ;;  %7085 = vmatmul.mubr.msk.bf16.gmra.mxu0 %vm207_vm2, %v1786_v24  ;;  %v1779_v24 = vld [vmem:[%s12816_s25 + $0x90] sm:$0xff] }
 0x182   :  { %v855_v14 = vpop.f32.mrf.mxu1  ;;  %v700_v15 = vadd.f32 %v645_v36, %v9936_v8  ;;  %1913 = vmatprep.mubr.bf16.mxu0 %v9336_v0  ;;  %v9198_v8 = vld [vmem:[%s12816_s25 + $0x78] sm:$0xff] }
 0x183   :  { %v647_v29 = vpop.f32.mrf.mxu0  ;;  %v1787_v60 = vpack.c.bf16 %v1777_v1, %v9198_v8 }
 0x184   :  { %v857_v20 = vpop.f32.mrf.mxu1  ;;  %v701_v44 = vadd.f32 %v647_v29, %v9940_v12  ;;  %v10106_v35 = vadd.f32 %v855_v14, %v700_v15  ;;  %v8905_v12 = vld [vmem:[%s12817_s6 + $0xb8] sm:$0xff]   ;;  %v1788_v29 = vpack.c.bf16 %v1779_v24, %v1778_v19 }
 0x185   :  { %v649_v51 = vpop.f32.mrf.mxu0  ;;  %7825 = vmatpush3.bf16.msra.mxu1 %v8905_v12  ;;  %v1781_v12 = vld [vmem:[%s12816_s25 + $0xa0] sm:$0xff] }
 0x186   :  { %v859_v25 = vpop.f32.mrf.mxu1  ;;  %v702_v4 = vadd.f32 %v649_v51, %v9942_v17  ;;  %v10115_v5 = vadd.f32 %v857_v20, %v701_v44 }
 0x187   :  { %v10120_v53 = vpop.f32.mrf.mxu0 }
 0x188   :  { %v10122_v26 = vpop.f32.mrf.mxu1  ;;  %v10124_v2 = vadd.f32 %v859_v25, %v702_v4  ;;  %v1780_v4 = vld [vmem:[%s12816_s25 + $0x98] sm:$0xff]  ;;  %s13043_s25 = sld [smem:[#allocation97_spill]] }
 0x189   :  { %v655_v33 = vpop.f32.mrf.mxu0  ;;  %7086 = vmatmul.mubr.msk.bf16.gmra.mxu0 %vm207_vm2, %v1787_v60 }
 0x18a   :  { %v865_v32 = vpop.f32.mrf.mxu1  ;;  %v704_v17 = vadd.f32 %v655_v33, %v9952_v21  ;;  %1923 = vmatprep.mubr.bf16.mxu0 %v9336_v0  ;;  %v8906_v21 = vld [vmem:[%s12817_s6 + $0xf0] sm:$0xff]  }
 0x18b   :  { %v657_v58 = vpop.f32.mrf.mxu0  ;;  %7826 = vmatprep.subr.bf16.mxu1 %v8906_v21  ;;  %v8909_v21 = vld [vmem:[%s12817_s6 + $0xa8] sm:$0xff]  }
 0x18c   :  { %v867_v28 = vpop.f32.mrf.mxu1  ;;  %v705_v36 = vadd.f32 %v657_v58, %v9956_v3  ;;  %v10136_v14 = vadd.f32 %v865_v32, %v704_v17  ;;  %7827 = vmatpush3.bf16.msra.mxu1 %v8907_v47  ;;  %v1789_v58 = vpack.c.bf16 %v1781_v12, %v1780_v4  ;;  %v8913_v47 = vld [vmem:[%s12817_s6 + $0x178] sm:$0xff]  }
 0x18d   :  { %v659_v15 = vpop.f32.mrf.mxu0  ;;  %7928 = vmatprep.subr.bf16.mxu0 %v8913_v47 }
 0x18e   :  { %v869_v1 = vpop.f32.mrf.mxu1  ;;  %v706_v20 = vadd.f32 %v659_v15, %v9958_v30  ;;  %v10142_v44 = vadd.f32 %v867_v28, %v705_v36 }
 0x18f   :  { %v10147_v51 = vpop.f32.mrf.mxu0 }
 0x190   :  { %v10149_v3 = vpop.f32.mrf.mxu1  ;;  %v10151_v25 = vadd.f32 %v869_v1, %v706_v20 }
 0x191   :  { %v665_v8 = vpop.f32.mrf.mxu0  ;;  %7087 = vmatmul.mubr.msk.bf16.gmra.mxu0 %vm207_vm2, %v1788_v29 }
 0x192   :  { %v875_v60 = vpop.f32.mrf.mxu1  ;;  %v708_v30 = vadd.f32 %v665_v8, %v9971_v39  ;;  %1933 = vmatprep.mubr.bf16.mxu0 %v9336_v0  ;;  %v8908_v39 = vld [vmem:[%s12817_s6 + $0xe8] sm:$0xff]  }
 0x193   :  { %v667_v33 = vpop.f32.mrf.mxu0  ;;  %7828 = vmatprep.subr.bf16.mxu1 %v8908_v39 }
 0x194   :  { %v877_v32 = vpop.f32.mrf.mxu1  ;;  %v709_v17 = vadd.f32 %v667_v33, %v9984_v45  ;;  %v10163_v19 = vadd.f32 %v875_v60, %v708_v30  ;;  %7829 = vmatpush3.bf16.msra.mxu1 %v8909_v21  ;;  %v8915_v30 = vld [vmem:[%s12817_s6 + $0x138] sm:$0xff]   ;;  %v8910_v33 = vld [vmem:[%s12817_s6 + $0xe0] sm:$0xff]  }
 0x195   :  { %v669_v24 = vpop.f32.mrf.mxu0  ;;  %7929 = vmatpush3.bf16.msra.mxu0 %v8915_v30  ;;  %7830 = vmatprep.subr.bf16.mxu1 %v8910_v33 }
 0x196   :  { %v879_v0 = vpop.f32.mrf.mxu1  ;;  %v710_v28 = vadd.f32 %v669_v24, %v9986_v52  ;;  %v10169_v36 = vadd.f32 %v877_v32, %v709_v17  ;;  %v8911_v24 = vld [vmem:[%s12817_s6 + $0xa0] sm:$0xff]  }
 0x197   :  { %v10174_v15 = vpop.f32.mrf.mxu0 }
 0x198   :  { %v10176_v45 = vpop.f32.mrf.mxu1  ;;  %v10178_v1 = vadd.f32 %v879_v0, %v710_v28  ;;  %v8917_v28 = vld [vmem:[%s12817_s6 + $0x130] sm:$0xff]   ;;  %7831 = vmatpush3.bf16.msra.mxu1 %v8911_v24 }
 0x199   :  { %v675_v29 = vpop.f32.mrf.mxu0  ;;  %7088 = vmatmul.mubr.msk.bf16.gmra.mxu0 %vm207_vm2, %v1789_v58 }
 0x19a   :  { %v885_v20 = vpop.f32.mrf.mxu1  ;;  %v712_v52 = vadd.f32 %v675_v29, %v9994_v59 }
 0x19b   :  { %v677_v8 = vpop.f32.mrf.mxu0 }
 0x19c   :  { %v887_v60 = vpop.f32.mrf.mxu1  ;;  %v713_v4 = vadd.f32 %v677_v8, %v9997_v63  ;;  %v10189_v12 = vadd.f32 %v885_v20, %v712_v52  ;;  %v8916_v63 = vld [vmem:[%s12817_s6 + $0x170] sm:$0xff]   ;;  %v8919_v52 = vld [vmem:[%s12817_s6 + $0x168] sm:$0xff]  }
 0x19d   :  { %v679_v59 = vpop.f32.mrf.mxu0  ;;  %7930 = vmatprep.subr.bf16.mxu0 %v8916_v63 }
 0x19e   :  { %v889_v32 = vpop.f32.mrf.mxu1  ;;  %v714_v17 = vadd.f32 %v679_v59, %v10005_v11  ;;  %v10195_v39 = vadd.f32 %v887_v60, %v713_v4  ;;  %7931 = vmatpush3.bf16.msra.mxu0 %v8917_v28  ;;  %v8921_v60 = vld [vmem:[%s12817_s6 + $0x128] sm:$0xff]   ;;  %v8922_v59 = vld [vmem:[%s12817_s6 + $0x160] sm:$0xff]   ;;  %v8912_v28 = vld [vmem:[%s12817_s6 + $0xd8] sm:$0xff]  }
 0x19f   :  { %v10203_v0 = vpop.f32.mrf.mxu0  ;;  %7932 = vmatprep.subr.bf16.mxu0 %v8919_v52  ;;  %7832 = vmatprep.subr.bf16.mxu1 %v8912_v28 }
 0x1a0   :  { %v10205_v58 = vpop.f32.mrf.mxu1  ;;  %v10210_v11 = vadd.f32 %v889_v32, %v714_v17 }
 0x1a1   :  { %v1025_v21 = vpop.f32.mrf.mxu0 }
 0x1a2   :  { %v10212_v29 = vpop.f32.mrf.mxu1  ;;  %v10215_v20 = vadd.f32 %v1025_v21, %v10015_v34  ;;  %7933 = vmatpush3.bf16.msra.mxu0 %v8921_v60  ;;  %v8925_v21 = vld [vmem:[%s12817_s6 + $0x158] sm:$0xff]  }
 0x1a3   :  { %v1027_v47 = vpop.f32.mrf.mxu0  ;;  %7934 = vmatprep.subr.bf16.mxu0 %v8922_v59  ;;  %v8914_v60 = vld [vmem:[%s12817_s6 + $0x98] sm:$0xff]  }
 0x1a4   :  { %v10220_v8 = vpop.f32.mrf.mxu1  ;;  %v10226_v30 = vadd.f32 %v1027_v47, %v10024_v42  ;;  %v8923_v42 = vld [vmem:[%s12817_s6 + $0x120] sm:$0xff]   ;;  %7833 = vmatpush3.bf16.msra.mxu1 %v8914_v60 }
 0x1a5   :  { %v1029_v4 = vpop.f32.mrf.mxu0 }
 0x1a6   :  { %v10228_v33 = vpop.f32.mrf.mxu1  ;;  %v10231_v34 = vadd.f32 %v1029_v4, %v10031_v48  ;;  %7935 = vmatpush3.bf16.msra.mxu0 %v8923_v42 }
 0x1a7   :  { %v10236_v32 = vpop.f32.mrf.mxu0  ;;  %7936 = vmatprep.subr.bf16.mxu0 %v8925_v21  ;;  %v8920_v21 = vld [vmem:[%s12817_s6 + $0x90] sm:$0xff]  }
 0x1a8   :  { %v10238_v17 = vpop.f32.mrf.mxu1 }
 0x1a9   :  { %v1035_v24 = vpop.f32.mrf.mxu0 }
 0x1aa   :  { %v10243_v63 = vpop.f32.mrf.mxu1  ;;  %v10246_v48 = vadd.f32 %v1035_v24, %v10037_v62  ;;  %v8927_v62 = vld [vmem:[%s12817_s6 + $0x118] sm:$0xff]  }
 0x1ab   :  { %12818 = vst [vmem:[#allocation19_spill] sm:$0xff] %v10243_v63  ;;  %v1037_v52 = vpop.f32.mrf.mxu0  ;;  %7937 = vmatpush3.bf16.msra.mxu0 %v8927_v62  ;;  %v8928_v63 = vld [vmem:[%s12817_s6 + $0x150] sm:$0xff]  }
 0x1ac   :  { %v10254_v47 = vpop.f32.mrf.mxu1  ;;  %v10263_v4 = vadd.f32 %v1037_v52, %v10046_v10  ;;  %7938 = vmatprep.subr.bf16.mxu0 %v8928_v63  ;;  %v8926_v63 = vld [vmem:[%s12817_s6 + $0x88] sm:$0xff]  }
 0x1ad   :  { %12819 = vst [vmem:[#allocation20_spill] sm:$0xff] %v10254_v47  ;;  %v1039_v59 = vpop.f32.mrf.mxu0  ;;  %v8918_v47 = vld [vmem:[%s12817_s6 + $0xd0] sm:$0xff]  }
 0x1ae   :  { %v10265_v42 = vpop.f32.mrf.mxu1  ;;  %v10268_v24 = vadd.f32 %v1039_v59, %v10053_v22  ;;  %v8929_v22 = vld [vmem:[%s12817_s6 + $0x110] sm:$0xff]   ;;  %7834 = vmatprep.subr.bf16.mxu1 %v8918_v47  ;;  %v8924_v59 = vld [vmem:[%s12817_s6 + $0xc8] sm:$0xff]  }
 0x1af   :  { %12820 = vst [vmem:[#allocation21_spill] sm:$0xff] %v10265_v42  ;;  %v10276_v10 = vpop.f32.mrf.mxu0  ;;  %7835 = vmatpush3.bf16.msra.mxu1 %v8920_v21  ;;  %7939 = vmatpush3.bf16.msra.mxu0 %v8929_v22 }
 0x1b0   :  { %12821 = vst [vmem:[#allocation22_spill] sm:$0xff] %v10268_v24  ;;  %v10278_v28 = vpop.f32.mrf.mxu1  ;;  %7836 = vmatprep.subr.bf16.mxu1 %v8924_v59 }
 0x1b1   :  { %12822 = vst [vmem:[#allocation23_spill] sm:$0xff] %v10278_v28  ;;  %v1045_v52 = vpop.f32.mrf.mxu0  ;;  %v8931_v28 = vld [vmem:[%s12817_s6 + $0x148] sm:$0xff]  }
 0x1b2   :  { %v10286_v60 = vpop.f32.mrf.mxu1  ;;  %v10289_v62 = vadd.f32 %v1045_v52, %v10059_v40  ;;  %v8933_v40 = vld [vmem:[%s12817_s6 + $0x108] sm:$0xff]   ;;  %7940 = vmatprep.subr.bf16.mxu0 %v8931_v28  ;;  %v8932_v28 = vld [vmem:[%s12817_s6 + $0x80] sm:$0xff]  }
 0x1b3   :  { %12823 = vst [vmem:[#allocation24_spill] sm:$0xff] %v10286_v60  ;;  %v1047_v42 = vpop.f32.mrf.mxu0  ;;  %7837 = vmatpush3.bf16.msra.mxu1 %v8926_v63  ;;  %7941 = vmatpush3.bf16.msra.mxu0 %v8933_v40  ;;  %v8934_v60 = vld [vmem:[%s12817_s6 + $0x140] sm:$0xff]  }
 0x1b4   :  { %v10297_v24 = vpop.f32.mrf.mxu1  ;;  %v10306_v47 = vadd.f32 %v1047_v42, %v10068_v49  ;;  %7942 = vmatprep.subr.bf16.mxu0 %v8934_v60 }
 0x1b5   :  { %12824 = vst [vmem:[#allocation25_spill] sm:$0xff] %v10297_v24  ;;  %v1049_v21 = vpop.f32.mrf.mxu0  ;;  %v8930_v24 = vld [vmem:[%s12817_s6 + $0xc0] sm:$0xff]  }
 0x1b6   :  { %12825 = vst [vmem:[#allocation26_spill] sm:$0xff] %v10306_v47  ;;  %v10308_v22 = vpop.f32.mrf.mxu1  ;;  %v10311_v52 = vadd.f32 %v1049_v21, %v10075_v57  ;;  %v8935_v57 = vld [vmem:[%s12817_s6 + $0x100] sm:$0xff]   ;;  %7838 = vmatprep.subr.bf16.mxu1 %v8930_v24 }
 0x1b7   :  { %12826 = vst [vmem:[#allocation27_spill] sm:$0xff] %v10308_v22  ;;  %v10319_v49 = vpop.f32.mrf.mxu0  ;;  %7839 = vmatpush3.bf16.msra.mxu1 %v8932_v28  ;;  %7943 = vmatpush3.bf16.msra.mxu0 %v8935_v57 }
 0x1b8   :  { %12827 = vst [vmem:[#allocation28_spill] sm:$0xff] %v10311_v52  ;;  %v10321_v42 = vpop.f32.mrf.mxu1 }
 0x1b9   :  { %12828 = vst [vmem:[#allocation29_spill] sm:$0xff] %v10321_v42  ;;  %v1055_v59 = vpop.f32.mrf.mxu0 }
 0x1ba   :  { %v10329_v63 = vpop.f32.mrf.mxu1  ;;  %v10332_v40 = vadd.f32 %v1055_v59, %v10081_v7 }
 0x1bb   :  { %12829 = vst [vmem:[#allocation30_spill] sm:$0xff] %v10329_v63  ;;  %v1057_v21 = vpop.f32.mrf.mxu0 }
 0x1bc   :  { %v10334_v42 = vpop.f32.mrf.mxu1  ;;  %v10337_v22 = vadd.f32 %v1057_v21, %v10090_v27 }
 0x1bd   :  { %12830 = vst [vmem:[#allocation31_spill] sm:$0xff] %v10334_v42  ;;  %v1059_v52 = vpop.f32.mrf.mxu0 }
 0x1be   :  { %v10339_v47 = vpop.f32.mrf.mxu1  ;;  %v10342_v24 = vadd.f32 %v1059_v52, %v10097_v41 }
 0x1bf   :  { %12831 = vst [vmem:[#allocation32_spill] sm:$0xff] %v10339_v47  ;;  %v10344_v60 = vpop.f32.mrf.mxu0 }
 0x1c0   :  { %12832 = vst [vmem:[#allocation33_spill] sm:$0xff] %v10342_v24  ;;  %v10346_v63 = vpop.f32.mrf.mxu1 }
 0x1c1   :  { %12833 = vst [vmem:[#allocation34_spill] sm:$0xff] %v10346_v63  ;;  %v1065_v28 = vpop.f32.mrf.mxu0 }
 0x1c2   :  { %v10348_v57 = vpop.f32.mrf.mxu1  ;;  %v10351_v7 = vadd.f32 %v1065_v28, %v10106_v35 }
 0x1c3   :  { %12834 = vst [vmem:[#allocation35_spill] sm:$0xff] %v10348_v57  ;;  %v1067_v59 = vpop.f32.mrf.mxu0 }
 0x1c4   :  { %v10353_v42 = vpop.f32.mrf.mxu1  ;;  %v10356_v27 = vadd.f32 %v1067_v59, %v10115_v5  ;;  %v8936_v5 = vld [vmem:[%s12817_s6 + $0x78] sm:$0xff]  }
 0x1c5   :  { %v1069_v21 = vpop.f32.mrf.mxu0  ;;  %7876 = vmatprep.subr.bf16.mxu1 %v8936_v5  ;;  %v8942_v5 = vld [vmem:[%s12817_s6 + $0x278] sm:$0xff]  }
 0x1c6   :  { %v10358_v47 = vpop.f32.mrf.mxu1  ;;  %v10361_v41 = vadd.f32 %v1069_v21, %v10124_v2  ;;  %8032 = vmatprep.subr.bf16.mxu0 %v8942_v5 }
 0x1c7   :  { %12835 = vst [vmem:[#allocation36_spill] sm:$0xff] %v10358_v47  ;;  %v10363_v52 = vpop.f32.mrf.mxu0 }
 0x1c8   :  { %12836 = vst [vmem:[#allocation37_spill] sm:$0xff] %v10361_v41  ;;  %v10365_v63 = vpop.f32.mrf.mxu1 }
 0x1c9   :  { %12837 = vst [vmem:[#allocation38_spill] sm:$0xff] %v10365_v63  ;;  %v1075_v57 = vpop.f32.mrf.mxu0 }
 0x1ca   :  { %v10367_v24 = vpop.f32.mrf.mxu1  ;;  %v10370_v35 = vadd.f32 %v1075_v57, %v10136_v14 }
 0x1cb   :  { %12838 = vst [vmem:[#allocation39_spill] sm:$0xff] %v10367_v24  ;;  %v1077_v28 = vpop.f32.mrf.mxu0 }
 0x1cc   :  { %12839 = vst [vmem:[#allocation40_spill] sm:$0xff] %v10370_v35  ;;  %v10375_v59 = vpop.f32.mrf.mxu1  ;;  %v10378_v2 = vadd.f32 %v1077_v28, %v10142_v44 }
 0x1cd   :  { %12840 = vst [vmem:[#allocation41_spill] sm:$0xff] %v10375_v59  ;;  %v1079_v21 = vpop.f32.mrf.mxu0 }
 0x1ce   :  { %v10380_v47 = vpop.f32.mrf.mxu1  ;;  %v10383_v63 = vadd.f32 %v1079_v21, %v10151_v25 }
 0x1cf   :  { %12841 = vst [vmem:[#allocation42_spill] sm:$0xff] %v10380_v47  ;;  %v10385_v24 = vpop.f32.mrf.mxu0 }
 0x1d0   :  { %v10387_v14 = vpop.f32.mrf.mxu1 }
 0x1d1   :  { %12842 = vst [vmem:[#allocation43_spill] sm:$0xff] %v10387_v14  ;;  %v1085_v57 = vpop.f32.mrf.mxu0 }
 0x1d2   :  { %v10389_v35 = vpop.f32.mrf.mxu1  ;;  %v10392_v41 = vadd.f32 %v1085_v57, %v10163_v19 }
 0x1d3   :  { %12843 = vst [vmem:[#allocation44_spill] sm:$0xff] %v10389_v35  ;;  %v1087_v59 = vpop.f32.mrf.mxu0 }
 0x1d4   :  { %12844 = vst [vmem:[#allocation45_spill] sm:$0xff] %v10392_v41  ;;  %v10394_v44 = vpop.f32.mrf.mxu1  ;;  %v10400_v25 = vadd.f32 %v1087_v59, %v10169_v36 }
 0x1d5   :  { %12845 = vst [vmem:[#allocation46_spill] sm:$0xff] %v10394_v44  ;;  %v1089_v28 = vpop.f32.mrf.mxu0 }
 0x1d6   :  { %v10402_v21 = vpop.f32.mrf.mxu1  ;;  %v10405_v14 = vadd.f32 %v1089_v28, %v10178_v1 }
 0x1d7   :  { %12846 = vst [vmem:[#allocation47_spill] sm:$0xff] %v10402_v21  ;;  %v10407_v35 = vpop.f32.mrf.mxu0 }
 0x1d8   :  { %12847 = vst [vmem:[#allocation48_spill] sm:$0xff] %v10405_v14  ;;  %v10409_v19 = vpop.f32.mrf.mxu1 }
 0x1d9   :  { %12848 = vst [vmem:[#allocation49_spill] sm:$0xff] %v10409_v19  ;;  %v1095_v57 = vpop.f32.mrf.mxu0 }
 0x1da   :  { %v10411_v44 = vpop.f32.mrf.mxu1  ;;  %v10414_v41 = vadd.f32 %v1095_v57, %v10189_v12 }
 0x1db   :  { %12849 = vst [vmem:[#allocation50_spill] sm:$0xff] %v10411_v44  ;;  %v1097_v47 = vpop.f32.mrf.mxu0 }
 0x1dc   :  { %12850 = vst [vmem:[#allocation51_spill] sm:$0xff] %v10414_v41  ;;  %v10416_v36 = vpop.f32.mrf.mxu1  ;;  %v10419_v59 = vadd.f32 %v1097_v47, %v10195_v39 }
 0x1dd   :  { %12851 = vst [vmem:[#allocation52_spill] sm:$0xff] %v10416_v36  ;;  %v1099_v5 = vpop.f32.mrf.mxu0 }
 0x1de   :  { %12852 = vst [vmem:[#allocation53_spill] sm:$0xff] %v10419_v59  ;;  %v10421_v21 = vpop.f32.mrf.mxu1  ;;  %v10424_v1 = vadd.f32 %v1099_v5, %v10210_v11 }
 0x1df   :  { %12853 = vst [vmem:[#allocation54_spill] sm:$0xff] %v10421_v21  ;;  %v10426_v28 = vpop.f32.mrf.mxu0 }
 0x1e0   :  { %12854 = vst [vmem:[#allocation55_spill] sm:$0xff] %v10424_v1  ;;  %12855 = vst [vmem:[#allocation56_spill] sm:$0xff] %v10426_v28  ;;  %v10428_v19 = vpop.f32.mrf.mxu1 }
 0x1e1   :  { %12856 = vst [vmem:[#allocation57_spill] sm:$0xff] %v10428_v19  ;;  %v10430_v44 = vpop.f32.mrf.mxu0 }
 0x1e2   :  { %v10432_v12 = vpop.f32.mrf.mxu1 }
 0x1e3   :  { %v10434_v57 = vpop.f32.mrf.mxu0 }
 0x1e4   :  { %v10436_v36 = vpop.f32.mrf.mxu1 }
 0x1e5   :  { %12857 = vst [vmem:[#allocation58_spill] sm:$0xff] %v10436_v36  ;;  %v10438_v39 = vpop.f32.mrf.mxu0 }
 0x1e6   :  { %v10440_v47 = vpop.f32.mrf.mxu1 }
 0x1e7   :  { %12858 = vst [vmem:[#allocation59_spill] sm:$0xff] %v10440_v47  ;;  %v10442_v21 = vpop.f32.mrf.mxu0 }
 0x1e8   :  { %12859 = vst [vmem:[#allocation60_spill] sm:$0xff] %v10442_v21  ;;  %v10446_v5 = vpop.f32.mrf.mxu1 }
 0x1e9   :  { %v10444_v11 = vpop.f32.mrf.mxu0  ;;  %12861 = vst [vmem:[#allocation62_spill] sm:$0xff] %v10446_v5 }
 0x1ea   :  { %12860 = vst [vmem:[#allocation61_spill] sm:$0xff] %v10444_v11  ;;  %v10452_v28 = vpop.f32.mrf.mxu1 }
 0x1eb   :  { %v10448_v1 = vpop.f32.mrf.mxu0  ;;  %12864 = vst [vmem:[#allocation65_spill] sm:$0xff] %v10452_v28 }
 0x1ec   :  { %12862 = vst [vmem:[#allocation63_spill] sm:$0xff] %v10448_v1  ;;  %v10458_v36 = vpop.f32.mrf.mxu1 }
 0x1ed   :  { %v10450_v19 = vpop.f32.mrf.mxu0  ;;  %12867 = vst [vmem:[#allocation68_spill] sm:$0xff] %v10458_v36 }
 0x1ee   :  { %12863 = vst [vmem:[#allocation64_spill] sm:$0xff] %v10450_v19  ;;  %v10464_v21 = vpop.f32.mrf.mxu1 }
 0x1ef   :  { %v10454_v59 = vpop.f32.mrf.mxu0  ;;  %12870 = vst [vmem:[#allocation71_spill] sm:$0xff] %v10464_v21 }
 0x1f0   :  { %12865 = vst [vmem:[#allocation66_spill] sm:$0xff] %v10454_v59  ;;  %v10470_v1 = vpop.f32.mrf.mxu1 }
 0x1f1   :  { %v10456_v41 = vpop.f32.mrf.mxu0  ;;  %12873 = vst [vmem:[#allocation74_spill] sm:$0xff] %v10470_v1 }
 0x1f2   :  { %12866 = vst [vmem:[#allocation67_spill] sm:$0xff] %v10456_v41  ;;  %v10476_v59 = vpop.f32.mrf.mxu1 }
 0x1f3   :  { %v10460_v14 = vpop.f32.mrf.mxu0  ;;  %12876 = vst [vmem:[#allocation77_spill] sm:$0xff] %v10476_v59  ;;  %v12779_v59 = vlaneseq }
 0x1f4   :  { %12868 = vst [vmem:[#allocation69_spill] sm:$0xff] %v10460_v14  ;;  %v10482_v14 = vpop.f32.mrf.mxu1 }
 0x1f5   :  { %v10462_v47 = vpop.f32.mrf.mxu0  ;;  %12879 = vst [vmem:[#allocation80_spill] sm:$0xff] %v10482_v14 }
 0x1f6   :  { %12869 = vst [vmem:[#allocation70_spill] sm:$0xff] %v10462_v47 }
 0x1f7   :  { %v10466_v11 = vpop.f32.mrf.mxu0 }
 0x1f8   :  { %12871 = vst [vmem:[#allocation72_spill] sm:$0xff] %v10466_v11  ;;  %v10488_v11 = vpop.f32.mrf.mxu1 }
 0x1f9   :  { %v10468_v5 = vpop.f32.mrf.mxu0 }
 0x1fa   :  { %12872 = vst [vmem:[#allocation73_spill] sm:$0xff] %v10468_v5 }
 0x1fb   :  { %v10472_v19 = vpop.f32.mrf.mxu0 }
 0x1fc   :  { %12874 = vst [vmem:[#allocation75_spill] sm:$0xff] %v10472_v19  ;;  %v10494_v19 = vpop.f32.mrf.mxu1 }
 0x1fd   :  { %v10474_v28 = vpop.f32.mrf.mxu0  ;;  %12884 = vst [vmem:[#allocation85_spill] sm:$0xff] %v10494_v19 }
 0x1fe   :  { %12875 = vst [vmem:[#allocation76_spill] sm:$0xff] %v10474_v28 }
 0x1ff   :  { %v10478_v41 = vpop.f32.mrf.mxu0 }
 0x200   :  { %12877 = vst [vmem:[#allocation78_spill] sm:$0xff] %v10478_v41 }
 0x201   :  { %v10480_v36 = vpop.f32.mrf.mxu0 }
 0x202   :  { %12878 = vst [vmem:[#allocation79_spill] sm:$0xff] %v10480_v36  ;;  %v10500_v36 = vpop.f32.mrf.mxu1 }
 0x203   :  { %v10484_v47 = vpop.f32.mrf.mxu0  ;;  %12887 = vst [vmem:[#allocation88_spill] sm:$0xff] %v10500_v36 }
 0x204   :  { %12880 = vst [vmem:[#allocation81_spill] sm:$0xff] %v10484_v47  ;;  %v1979_v47 = vshrl.u32 %v12779_v59, 7  ;;  %v10515_v19 = vpop.f32.mrf.mxu1 }
 0x205   :  { %v10486_v21 = vpop.f32.mrf.mxu0 }
 0x206   :  { %12881 = vst [vmem:[#allocation82_spill] sm:$0xff] %v10486_v21  ;;  %v474_v21 = vadd.f32 %v9946_v38, %v9944_v18  ;;  %v897_v18 = vadd.f32 %v10026_v46, %v10029_v23  ;;  %v10535_v23 = vpop.f32.mrf.mxu1 }
 0x207   :  { %v10490_v5 = vpop.f32.mrf.mxu0 }
 0x208   :  { %12882 = vst [vmem:[#allocation83_spill] sm:$0xff] %v10490_v5  ;;  %v484_v5 = vadd.f32 %v9962_v43, %v9960_v31  ;;  %v1980_v43 = vsub.s32 0, %v1979_v47  ;;  %v1107_v46 = vadd.f32 %v10236_v32, %v897_v18  ;;  %v1314_v32 = vadd.f32 %v10212_v29, %v10215_v20  ;;  %v10565_v20 = vpop.f32.mrf.mxu1  ;;  %v12898_v18 = vld [vmem:[#allocation25_spill] sm:$0xff] }
 0x209   :  { %v10492_v1 = vpop.f32.mrf.mxu0 }
 0x20a   :  { %12883 = vst [vmem:[#allocation84_spill] sm:$0xff] %v10492_v1  ;;  %v707_v59 = vadd.f32 %v10147_v51, %v484_v5  ;;  %v909_v51 = vadd.f32 %v10092_v9, %v10095_v61  ;;  %v1315_v9 = vadd.f32 %v10220_v8, %v10226_v30  ;;  %v1316_v61 = vadd.f32 %v10228_v33, %v10231_v34  ;;  %v12892_v8 = vld [vmem:[#allocation22_spill] sm:$0xff]  ;;  %v12893_v30 = vld [vmem:[#allocation21_spill] sm:$0xff]  ;;  %v12894_v33 = vld [vmem:[#allocation23_spill] sm:$0xff] }
 0x20b   :  { %v10496_v28 = vpop.f32.mrf.mxu0 }
 0x20c   :  { %12885 = vst [vmem:[#allocation86_spill] sm:$0xff] %v10496_v28  ;;  %v494_v28 = vadd.f32 %v9990_v55, %v9988_v54  ;;  %v901_v54 = vadd.f32 %v10048_v6, %v10051_v37  ;;  %v917_v6 = vadd.f32 %v10149_v3, %v707_v59  ;;  %v1119_v29 = vadd.f32 %v10344_v60, %v909_v51  ;;  %v12905_v51 = vld [vmem:[#allocation32_spill] sm:$0xff] }
 0x20d   :  { %v10498_v41 = vpop.f32.mrf.mxu0  ;;  %v1320_v59 = vadd.f32 %v12893_v30, %v12892_v8  ;;  %v10607_v8 = vpop.f32.mrf.mxu1  ;;  %v10611_v30 = vadd.f32 %v10353_v42, %v10356_v27  ;;  %v12916_v42 = vld [vmem:[#allocation42_spill] sm:$0xff] }
 0x20e   :  { %12886 = vst [vmem:[#allocation87_spill] sm:$0xff] %v10498_v41  ;;  %v504_v41 = vadd.f32 %v10009_v16, %v10007_v13  ;;  %v711_v38 = vadd.f32 %v10174_v15, %v494_v28  ;;  %v1976_v13 = vld [vmem:[%s12889_s30] sm:$0x3]  ;;  %v1984_v16 = vsub.s32 1, %v1979_v47  ;;  %v1111_v37 = vadd.f32 %v10276_v10, %v901_v54  ;;  %v12895_v28 = vld [vmem:[#allocation24_spill] sm:$0xff] }
 0x20f   :  { %v10502_v14 = vpop.f32.mrf.mxu0  ;;  %v1322_v47 = vadd.f32 %v12895_v28, %v10289_v62  ;;  %v12903_v62 = vld [vmem:[#allocation31_spill] sm:$0xff]  ;;  %v10632_v27 = vadd.f32 %v12916_v42, %v10383_v63  ;;  %v12929_v42 = vld [vmem:[#allocation52_spill] sm:$0xff] }
 0x210   :  { %12888 = vst [vmem:[#allocation89_spill] sm:$0xff] %v10502_v14  ;;  %v703_v14 = vadd.f32 %v10120_v53, %v474_v21  ;;  %v715_v31 = vadd.f32 %v10203_v0, %v504_v41  ;;  %v905_v53 = vadd.f32 %v10070_v56, %v10073_v50  ;;  %v921_v41 = vadd.f32 %v10176_v45, %v711_v38 }
 0x211   :  { %v10509_v1 = vpop.f32.mrf.mxu0  ;;  %v10547_v50 = vrot.slane %v1976_v13, %v1980_v43  ;;  %v10557_v3 = vrot.slane %v1976_v13, %v1984_v16  ;;  %v1317_v45 = vadd.f32 %v10238_v17, %v1107_v46  ;;  %v1321_v34 = vadd.f32 %v12894_v33, %v1111_v37  ;;  %v12901_v43 = vld [vmem:[#allocation29_spill] sm:$0xff]  ;;  %v12902_v16 = vld [vmem:[#allocation30_spill] sm:$0xff] }
 0x212   :  { %v913_v15 = vadd.f32 %v10122_v26, %v703_v14  ;;  %v925_v21 = vadd.f32 %v10205_v58, %v715_v31  ;;  %v1115_v56 = vadd.f32 %v10319_v49, %v905_v53  ;;  %v12890_v58 = vld [vmem:[#allocation19_spill] sm:$0xff]  ;;  %v12891_v49 = vld [vmem:[#allocation20_spill] sm:$0xff]  ;;  %v1524_v13 = vadd.f32 %v10430_v44, %v1314_v32  ;;  %v12904_v46 = vld [vmem:[#allocation33_spill] sm:$0xff] }
 0x213   :  { %v10519_v36 = vpop.f32.mrf.mxu0  ;;  %v1318_v10 = vadd.f32 %v12890_v58, %v10246_v48  ;;  %v1319_v14 = vadd.f32 %v12891_v49, %v10263_v4  ;;  %v12897_v48 = vld [vmem:[#allocation26_spill] sm:$0xff]  ;;  %v12899_v4 = vld [vmem:[#allocation28_spill] sm:$0xff]  ;;  %v12900_v31 = vld [vmem:[#allocation27_spill] sm:$0xff]  ;;  %v10585_v53 = vadd.f32 %v12902_v16, %v10332_v40  ;;  %v1127_v37 = vadd.f32 %v10385_v24, %v917_v6 }
 0x214   :  { %v1123_v17 = vadd.f32 %v10363_v52, %v913_v15  ;;  %v1323_v38 = vadd.f32 %v12898_v18, %v12897_v48  ;;  %v1324_v60 = vadd.f32 %v12900_v31, %v12899_v4  ;;  %v10580_v54 = vadd.f32 %v12901_v43, %v1115_v56  ;;  %v12907_v56 = vld [vmem:[#allocation34_spill] sm:$0xff]  ;;  %v12908_v44 = vld [vmem:[#allocation35_spill] sm:$0xff]  ;;  %v12909_v24 = vld [vmem:[#allocation37_spill] sm:$0xff] }
 0x215   :  { %v10527_v55 = vpop.f32.mrf.mxu0  ;;  %v10589_v52 = vadd.f32 %v12903_v62, %v10337_v22  ;;  %v10593_v15 = vadd.f32 %v12905_v51, %v12904_v46  ;;  %v10599_v49 = vadd.f32 %v12907_v56, %v1119_v29  ;;  %v10603_v32 = vadd.f32 %v12908_v44, %v10351_v7  ;;  %v12910_v6 = vld [vmem:[#allocation36_spill] sm:$0xff]  ;;  %v12911_v29 = vld [vmem:[#allocation38_spill] sm:$0xff]  ;;  %v12913_v7 = vld [vmem:[#allocation39_spill] sm:$0xff] }
 0x216   :  { %v1131_v40 = vadd.f32 %v10407_v35, %v921_v41  ;;  %v1525_v22 = vadd.f32 %v10434_v57, %v1315_v9  ;;  %v10615_v33 = vadd.f32 %v12910_v6, %v12909_v24  ;;  %v10618_v28 = vadd.f32 %v12911_v29, %v1123_v17  ;;  %v12912_v48 = vld [vmem:[#allocation40_spill] sm:$0xff]  ;;  %v12915_v57 = vld [vmem:[#allocation41_spill] sm:$0xff]  ;;  %v12917_v17 = vld [vmem:[#allocation43_spill] sm:$0xff]  ;;  %v10656_v6 = vpop.f32.mrf.mxu1 }
 0x217   :  { %v10542_v0 = vpop.f32.mrf.mxu0  ;;  %v10622_v18 = vadd.f32 %v12913_v7, %v12912_v48  ;;  %v10628_v41 = vadd.f32 %v12915_v57, %v10378_v2  ;;  %v1734_v9 = vadd.f32 %v10432_v12, %v1524_v13  ;;  %v1526_v4 = vadd.f32 %v10438_v39, %v1316_v61  ;;  %v12918_v43 = vld [vmem:[#allocation45_spill] sm:$0xff]  ;;  %v12919_v16 = vld [vmem:[#allocation44_spill] sm:$0xff]  ;;  %v12920_v46 = vld [vmem:[#allocation46_spill] sm:$0xff] }
 0x218   :  { %v10637_v31 = vadd.f32 %v12917_v17, %v1127_v37  ;;  %v10641_v62 = vadd.f32 %v12919_v16, %v12918_v43  ;;  %v10645_v51 = vadd.f32 %v12920_v46, %v10400_v25  ;;  %v12921_v2 = vld [vmem:[#allocation48_spill] sm:$0xff]  ;;  %v12922_v56 = vld [vmem:[#allocation47_spill] sm:$0xff]  ;;  %v12923_v24 = vld [vmem:[#allocation49_spill] sm:$0xff] }
 0x219   :  { %v10555_v26 = vpop.f32.mrf.mxu0  ;;  %v10649_v44 = vadd.f32 %v12922_v56, %v12921_v2  ;;  %v10652_v12 = vadd.f32 %v12923_v24, %v1131_v40  ;;  %v12924_v39 = vld [vmem:[#allocation58_spill] sm:$0xff]  ;;  %v12925_v13 = vld [vmem:[#allocation60_spill] sm:$0xff]  ;;  %v12926_v48 = vld [vmem:[#allocation51_spill] sm:$0xff] }
 0x21a   :  { %v1735_v61 = vadd.f32 %v12924_v39, %v1525_v22  ;;  %v1527_v37 = vadd.f32 %v12925_v13, %v1317_v45  ;;  %v12927_v7 = vld [vmem:[#allocation50_spill] sm:$0xff]  ;;  %v12928_v25 = vld [vmem:[#allocation53_spill] sm:$0xff]  ;;  %v12930_v43 = vld [vmem:[#allocation56_spill] sm:$0xff] }
 0x21b   :  { %v10573_v5 = vpop.f32.mrf.mxu0  ;;  %v10660_v57 = vadd.f32 %v12927_v7, %v12926_v48  ;;  %v10664_v17 = vadd.f32 %v12929_v42, %v12928_v25  ;;  %v1135_v16 = vadd.f32 %v12930_v43, %v925_v21  ;;  %v12931_v46 = vld [vmem:[#allocation61_spill] sm:$0xff]  ;;  %v12932_v56 = vld [vmem:[#allocation59_spill] sm:$0xff]  ;;  %v12935_v48 = vld [vmem:[#allocation66_spill] sm:$0xff] }
 0x21c   :  { %12896 = vst [vmem:[#allocation19_spill] sm:$0xff] %v10573_v5  ;;  %v1528_v40 = vadd.f32 %v12931_v46, %v1318_v10  ;;  %v1736_v22 = vadd.f32 %v12932_v56, %v1526_v4  ;;  %v12933_v24 = vld [vmem:[#allocation63_spill] sm:$0xff]  ;;  %v1531_v7 = vadd.f32 %v12935_v48, %v1321_v34  ;;  %v12937_v25 = vld [vmem:[#allocation69_spill] sm:$0xff]  ;;  %v12938_v21 = vld [vmem:[#allocation62_spill] sm:$0xff]  ;;  %v1699_v10 = vpop.f32.mrf.mxu1 }
 0x21d   :  { %v10596_v58 = vpop.f32.mrf.mxu0  ;;  %v1529_v45 = vadd.f32 %v12933_v24, %v1319_v14  ;;  %v1533_v42 = vadd.f32 %v12937_v25, %v1323_v38  ;;  %v1737_v43 = vadd.f32 %v12938_v21, %v1527_v37  ;;  %v12939_v14 = vld [vmem:[#allocation55_spill] sm:$0xff]  ;;  %v12940_v24 = vld [vmem:[#allocation54_spill] sm:$0xff]  ;;  %v12943_v34 = vld [vmem:[#allocation65_spill] sm:$0xff] }
 0x21e   :  { %12906 = vst [vmem:[#allocation20_spill] sm:$0xff] %v10596_v58  ;;  %v12947_v25 = vld [vmem:[#allocation74_spill] sm:$0xff] }
 0x21f   :  { %v10624_v35 = vpop.f32.mrf.mxu0  ;;  %v1741_v21 = vadd.f32 %v12947_v25, %v1531_v7 }
 0x220   :  { %12914 = vst [vmem:[#allocation22_spill] sm:$0xff] %v10624_v35  ;;  %v12936_v35 = vld [vmem:[#allocation67_spill] sm:$0xff] }
 0x221   :  { %v1865_v63 = vpop.f32.mrf.mxu0  ;;  %v1532_v58 = vadd.f32 %v12936_v35, %v1322_v47  ;;  %v12944_v47 = vld [vmem:[#allocation70_spill] sm:$0xff] }
 0x222   :  { %v1944_v29 = vadd.f32 %v1865_v63, %v1734_v9  ;;  %v12934_v63 = vld [vmem:[#allocation64_spill] sm:$0xff]  ;;  %v1534_v35 = vadd.f32 %v12944_v47, %v1324_v60 }
 0x223   :  { %v1867_v2 = vpop.f32.mrf.mxu0  ;;  %v1530_v13 = vadd.f32 %v12934_v63, %v1320_v59  ;;  %v12945_v63 = vld [vmem:[#allocation68_spill] sm:$0xff] }
 0x224   :  { %v1988_v39 = vadd.f32 %v10547_v50, %v1944_v29  ;;  %v1945_v9 = vadd.f32 %v1867_v2, %v1735_v61  ;;  %v10679_v29 = vadd.f32 %v12940_v24, %v12939_v14  ;;  %v12941_v61 = vld [vmem:[#allocation57_spill] sm:$0xff]  ;;  %v1738_v2 = vadd.f32 %v12943_v34, %v1528_v40  ;;  %v12950_v40 = vld [vmem:[#allocation72_spill] sm:$0xff]  ;;  %v1701_v34 = vpop.f32.mrf.mxu1 }
 0x225   :  { %v1869_v5 = vpop.f32.mrf.mxu0  ;;  %v10682_v59 = vadd.f32 %v12941_v61, %v1135_v16  ;;  %v1739_v48 = vadd.f32 %v12945_v63, %v1529_v45  ;;  %v12948_v14 = vld [vmem:[#allocation77_spill] sm:$0xff]  ;;  %v12949_v16 = vld [vmem:[#allocation80_spill] sm:$0xff]  ;;  %v1535_v60 = vadd.f32 %v12950_v40, %v10580_v54 }
 0x226   :  { %v2020_v46 = vmax.f32 %v1988_v39, 0.0  ;;  %v1989_v4 = vadd.f32 %v10557_v3, %v1945_v9  ;;  %v1946_v56 = vadd.f32 %v1869_v5, %v1736_v22  ;;  %v12946_v5 = vld [vmem:[#allocation71_spill] sm:$0xff]  ;;  %v1742_v24 = vadd.f32 %v12948_v14, %v1532_v58  ;;  %v12953_v47 = vld [vmem:[#allocation76_spill] sm:$0xff] }
 0x227   :  { %12942 = vst [vmem:[#allocation21_spill] sm:$0xff] %v10682_v59  ;;  %v1871_v38 = vpop.f32.mrf.mxu0  ;;  %v1740_v22 = vadd.f32 %v12946_v5, %v1530_v13  ;;  %v1743_v61 = vadd.f32 %v12949_v16, %v1533_v42  ;;  %v12951_v13 = vld [vmem:[#allocation73_spill] sm:$0xff]  ;;  %v12952_v58 = vld [vmem:[#allocation75_spill] sm:$0xff]  ;;  %v1705_v16 = vpop.f32.mrf.mxu1 }
 0x228   :  { %2052 = vst [vmem:[#allocation2 + $0xb0] sm:$0xff] %v2020_v46  ;;  %v2021_v37 = vmax.f32 %v1989_v4, 0.0  ;;  %v1990_v39 = vadd.f32 %v10547_v50, %v1946_v56  ;;  %v1947_v9 = vadd.f32 %v1871_v38, %v1737_v43  ;;  %v10698_v43 = vadd.f32 %v10488_v11, %v1534_v35  ;;  %v12954_v11 = vld [vmem:[#allocation78_spill] sm:$0xff] }
 0x229   :  { %v1875_v59 = vpop.f32.mrf.mxu0  ;;  %v1536_v7 = vadd.f32 %v12951_v13, %v10585_v53  ;;  %v1537_v42 = vadd.f32 %v12952_v58, %v10589_v52  ;;  %v1538_v38 = vadd.f32 %v12953_v47, %v10593_v15  ;;  %v12955_v53 = vld [vmem:[#allocation79_spill] sm:$0xff]  ;;  %v12956_v52 = vld [vmem:[#allocation81_spill] sm:$0xff]  ;;  %v12957_v15 = vld [vmem:[#allocation82_spill] sm:$0xff] }
 0x22a   :  { %2053 = vst [vmem:[#allocation2] sm:$0xff] %v2021_v37  ;;  %v10694_v45 = vmax.f32 %v1990_v39, 0.0  ;;  %v1991_v4 = vadd.f32 %v10557_v3, %v1947_v9  ;;  %v1948_v56 = vadd.f32 %v1875_v59, %v1738_v2  ;;  %v1539_v2 = vadd.f32 %v12954_v11, %v10599_v49  ;;  %v12959_v13 = vld [vmem:[#allocation88_spill] sm:$0xff] }
 0x22b   :  { %v1877_v54 = vpop.f32.mrf.mxu0  ;;  %v1540_v35 = vadd.f32 %v12955_v53, %v10603_v32  ;;  %v1541_v9 = vadd.f32 %v12956_v52, %v10611_v30  ;;  %v1542_v25 = vadd.f32 %v12957_v15, %v10615_v33  ;;  %v10726_v58 = vadd.f32 %v12959_v13, %v1536_v7  ;;  %v12960_v32 = vld [vmem:[#allocation83_spill] sm:$0xff]  ;;  %v12961_v47 = vld [vmem:[#allocation84_spill] sm:$0xff]  ;;  %v1707_v52 = vpop.f32.mrf.mxu1 }
 0x22c   :  { %v10706_v63 = vmax.f32 %v1991_v4, 0.0  ;;  %v1992_v39 = vadd.f32 %v10547_v50, %v1948_v56  ;;  %v1949_v5 = vadd.f32 %v1877_v54, %v1739_v48  ;;  %v10710_v59 = vpack.c.bf16 %v10694_v45, %v2020_v46  ;;  %v12958_v56 = vld [vmem:[#allocation85_spill] sm:$0xff] }
 0x22d   :  { %v1879_v14 = vpop.f32.mrf.mxu0  ;;  %v1745_v49 = vadd.f32 %v12958_v56, %v1535_v60  ;;  %v1543_v30 = vadd.f32 %v12960_v32, %v10618_v28  ;;  %v1544_v33 = vadd.f32 %v12961_v47, %v10622_v18  ;;  %v10737_v60 = vadd.f32 %v10535_v23, %v1538_v38  ;;  %v1709_v32 = vpop.f32.mrf.mxu1 }
 0x22e   :  { %v2024_v40 = vmax.f32 %v1992_v39, 0.0  ;;  %v1993_v48 = vadd.f32 %v10557_v3, %v1949_v5  ;;  %v1950_v4 = vadd.f32 %v1879_v14, %v1740_v22  ;;  %v10722_v46 = vpack.c.bf16 %v10706_v63, %v2021_v37 }
 0x22f   :  { %v1881_v54 = vpop.f32.mrf.mxu0  ;;  %v10733_v39 = vadd.f32 %v10515_v19, %v1537_v42  ;;  %v10740_v7 = vadd.f32 %v10565_v20, %v1539_v2  ;;  %v10743_v28 = vadd.f32 %v10607_v8, %v1540_v35  ;;  %v10746_v18 = vadd.f32 %v10656_v6, %v1541_v9  ;;  %v2150_v11 = vld [vmem:[#allocation2 + $0xb0] sm:$0xfc]  ;;  %v12962_v8 = vld [vmem:[#allocation86_spill] sm:$0xff] }
 0x230   :  { %2056 = vst [vmem:[#allocation2 + $0x50] sm:$0xff] %v2024_v40  ;;  %v2025_v22 = vmax.f32 %v1993_v48, 0.0  ;;  %v1994_v37 = vadd.f32 %v10547_v50, %v1950_v4  ;;  %v1951_v5 = vadd.f32 %v1881_v54, %v1741_v21  ;;  %v10748_v53 = vadd.f32 %v1699_v10, %v1542_v25  ;;  %v2590_v2 = vld [vmem:[#allocation2 + $0xb0] sm:$0xf0]  ;;  %v12963_v25 = vld [vmem:[#allocation87_spill] sm:$0xff] }
 0x231   :  { %v1885_v19 = vpop.f32.mrf.mxu0  ;;  %v2151_v42 = vld [vmem:[#allocation2] sm:$0xfc]  ;;  %v10753_v15 = vadd.f32 %v1701_v34, %v1543_v30  ;;  %v1545_v6 = vadd.f32 %v12962_v8, %v10628_v41  ;;  %v10757_v35 = vadd.f32 %v1705_v16, %v1544_v33  ;;  %v1546_v14 = vadd.f32 %v12963_v25, %v10632_v27  ;;  %v8943_v25 = vld [vmem:[%s12817_s6 + $0x238] sm:$0xff]  }
 0x232   :  { %2057 = vst [vmem:[#allocation2 + $0x68] sm:$0xff] %v2025_v22  ;;  %v10750_v21 = vmax.f32 %v1994_v37, 0.0  ;;  %v1995_v23 = vadd.f32 %v10557_v3, %v1951_v5  ;;  %v1952_v38 = vadd.f32 %v1885_v19, %v1742_v24  ;;  %v2591_v20 = vld [vmem:[#allocation2] sm:$0xf0]  ;;  %v2155_v10 = vpack.c.bf16 %v10706_v63, %v2151_v42 }
 0x233   :  { %v1887_v9 = vpop.f32.mrf.mxu0  ;;  %v2595_v56 = vpack.c.bf16 %v10706_v63, %v2591_v20  ;;  %v2154_v16 = vpack.c.bf16 %v10694_v45, %v2150_v11  ;;  %v2594_v13 = vpack.c.bf16 %v10694_v45, %v2590_v2  ;;  %v10787_v2 = vpop.f32.mrf.mxu1 }
 0x234   :  { %2058 = vst [vmem:[#allocation2 + $0x30] sm:$0xff] %v10750_v21  ;;  %v10763_v48 = vmax.f32 %v1995_v23, 0.0  ;;  %v1996_v24 = vadd.f32 %v10547_v50, %v1952_v38  ;;  %v1953_v4 = vadd.f32 %v1887_v9, %v1743_v61  ;;  %v10768_v41 = vpack.c.bf16 %v10750_v21, %v2024_v40 }
 0x235   :  { %v1889_v34 = vpop.f32.mrf.mxu0  ;;  %v10777_v61 = vadd.f32 %v1707_v52, %v1545_v6  ;;  %v2207_v63 = vrot.slane %v2155_v10, 1  ;;  %v2639_v11 = vrot.slane %v2595_v56, 2  ;;  %v2204_v23 = vrot.slane %v2154_v16, 1  ;;  %v8938_v10 = vld [vmem:[%s12817_s6 + $0x70] sm:$0xff]  }
 0x236   :  { %v2028_v30 = vmax.f32 %v1996_v24, 0.0  ;;  %v1997_v27 = vadd.f32 %v10557_v3, %v1953_v4  ;;  %v1954_v47 = vadd.f32 %v1889_v34, %v10698_v43  ;;  %v10775_v33 = vpack.c.bf16 %v10763_v48, %v2025_v22  ;;  %v8937_v43 = vld [vmem:[%s12817_s6 + $0x38] sm:$0xff]   ;;  %v8946_v16 = vld [vmem:[%s12817_s6 + $0x270] sm:$0xff]  }
 0x237   :  { %v1891_v54 = vpop.f32.mrf.mxu0  ;;  %v2205_v40 = vrot.slane %v10768_v41, 1  ;;  %v2637_v37 = vrot.slane %v10768_v41, 2  ;;  %v2636_v38 = vrot.slane %v2594_v13, 2 }
 0x238   :  { %2060 = vst [vmem:[#allocation2 + $0x80] sm:$0xff] %v2028_v30  ;;  %v2029_v5 = vmax.f32 %v1997_v27, 0.0  ;;  %v1998_v45 = vadd.f32 %v10547_v50, %v1954_v47  ;;  %v1955_v19 = vadd.f32 %v1891_v54, %v1745_v49  ;;  %v2208_v42 = vrot.slane %v10775_v33, 1 }
 0x239   :  { %v1895_v22 = vpop.f32.mrf.mxu0  ;;  %v2640_v52 = vrot.slane %v10775_v33, 2  ;;  %v3160_v20 = vld [vmem:[#allocation2 + $0x68] sm:$0xf0]  ;;  %v2638_v56 = vsel %vm2635_vm3, %v2636_v38, %v2637_v37  ;;  %v8939_v38 = vld [vmem:[%s12817_s6 + $0x30] sm:$0xff]  }
 0x23a   :  { %2061 = vst [vmem:[#allocation2 + $0x88] sm:$0xff] %v2029_v5  ;;  %v2030_v8 = vmax.f32 %v1998_v45, 0.0  ;;  %v1999_v6 = vadd.f32 %v10557_v3, %v1955_v19  ;;  %v1956_v49 = vadd.f32 %v1895_v22, %v10726_v58  ;;  %v2209_v9 = vsel %vm232_vm0, %v2207_v63, %v2208_v42  ;;  %v2858_v24 = vld [vmem:[#allocation2 + $0x68] sm:$0xfc]  ;;  %v2857_v45 = vld [vmem:[#allocation2 + $0x50] sm:$0xfc] }
 0x23b   :  { %v1897_v4 = vpop.f32.mrf.mxu0  ;;  %2366 = vmatprep.mubr.bf16.mxu1 %v2209_v9  ;;  %v2641_v34 = vsel %vm2635_vm3, %v2639_v11, %v2640_v52  ;;  %v2206_v58 = vsel %vm232_vm0, %v2204_v23, %v2205_v40  ;;  %v3164_v13 = vpack.c.bf16 %v10763_v48, %v3160_v20  ;;  %v12964_v19 = vld [vmem:[#allocation89_spill] sm:$0xff]  ;;  %v10823_v11 = vadd.f32 %v1709_v32, %v1546_v14  ;;  %v10829_v20 = vpop.f32.mrf.mxu1  ;;  %v8940_v32 = vld [vmem:[%s12817_s6 + $0x68] sm:$0xff]  }
 0x23c   :  { %2062 = vst [vmem:[#allocation2 + $0xe8] sm:$0xff] %v2030_v8  ;;  %v2031_v27 = vmax.f32 %v1999_v6, 0.0  ;;  %v10814_v47 = vadd.f32 %v10547_v50, %v1956_v49  ;;  %v1957_v54 = vadd.f32 %v1897_v4, %v10733_v39  ;;  %2798 = vmatprep.mubr.bf16.mxu0 %v2641_v34  ;;  %2367 = vmatmul.mubr.bf16.vlgmr.msra.gmra.mxu1 %v2206_v58 }
 0x23d   :  { %v10817_v63 = vpack.c.bf16 %v2030_v8, %v2028_v30  ;;  %v10821_v22 = vadd.f32 %v12964_v19, %v10637_v31  ;;  %v1899_v23 = vpop.f32.mrf.mxu0  ;;  %2799 = vmatmul.mubr.bf16.vlgmr.msra.gmra.mxu0 %v2638_v56  ;;  %7877 = vmatpush3.bf16.msra.mxu1 %v8937_v43  ;;  %v2882_v39 = vpack.c.bf16 %v10763_v48, %v2858_v24  ;;  %v8947_v43 = vld [vmem:[%s12817_s6 + $0x230] sm:$0xff]  }
 0x23e   :  { %2063 = vst [vmem:[#allocation2 + $0xb8] sm:$0xff] %v2031_v27  ;;  %v2032_v30 = vmax.f32 %v10814_v47, 0.0  ;;  %v10833_v8 = vadd.f32 %v10557_v3, %v1957_v54  ;;  %v1958_v31 = vadd.f32 %v1899_v23, %v10737_v60  ;;  %7878 = vmatprep.subr.bf16.mxu1 %v8938_v10  ;;  %v10836_v14 = vpack.c.bf16 %v2031_v27, %v2029_v5  ;;  %v8949_v60 = vld [vmem:[%s12817_s6 + $0x268] sm:$0xff]   ;;  %v10874_v47 = vpop.f32.mrf.mxu1 }
 0x23f   :  { %8033 = vmatpush3.bf16.msra.mxu0 %v8943_v25  ;;  %v1901_v6 = vpop.f32.mrf.mxu0  ;;  %v10845_v49 = vrot.slane %v10817_v63, 1  ;;  %v10848_v9 = vrot.slane %v10817_v63, 2  ;;  %v3207_v5 = vrot.slane %v3164_v13, 2  ;;  %v2881_v10 = vpack.c.bf16 %v10750_v21, %v2857_v45  ;;  %v8951_v23 = vld [vmem:[%s12817_s6 + $0x228] sm:$0xff]  }
 0x240   :  { %8034 = vmatprep.subr.bf16.mxu0 %v8946_v16  ;;  %2064 = vst [vmem:[#allocation2 + $0x60] sm:$0xff] %v2032_v30  ;;  %v2033_v25 = vmax.f32 %v10833_v8, 0.0  ;;  %v2002_v24 = vadd.f32 %v10547_v50, %v1958_v31  ;;  %v1959_v4 = vadd.f32 %v1901_v6, %v10740_v7  ;;  %v10858_v34 = vrot.slane %v10836_v14, 1  ;;  %v8941_v7 = vld [vmem:[%s12817_s6 + $0x28] sm:$0xff]  }
 0x241   :  { %v1905_v58 = vpop.f32.mrf.mxu0  ;;  %7879 = vmatpush3.bf16.msra.mxu1 %v8939_v38  ;;  %v10861_v56 = vrot.slane %v10836_v14, 2  ;;  %v2211_v16 = vsel %vm232_vm0, %v2205_v40, %v10845_v49  ;;  %v2643_v13 = vsel %vm2635_vm3, %v2637_v37, %v10848_v9  ;;  %v2941_v27 = vrot.slane %v2882_v39, 1  ;;  %v8944_v37 = vld [vmem:[%s12817_s6 + $0x60] sm:$0xff]   ;;  %v3426_v38 = vld [vmem:[#allocation2 + $0x68] sm:$0xc0] }
 0x242   :  { %2065 = vst [vmem:[#allocation2 + $0xf0] sm:$0xff] %v2033_v25  ;;  %v2034_v54 = vmax.f32 %v2002_v24, 0.0  ;;  %v2003_v45 = vadd.f32 %v10557_v3, %v1959_v4  ;;  %v1960_v19 = vadd.f32 %v1905_v58, %v10743_v28  ;;  %v2213_v40 = vsel %vm232_vm0, %v2208_v42, %v10858_v34  ;;  %7880 = vmatprep.subr.bf16.mxu1 %v8940_v32  ;;  %v8952_v42 = vld [vmem:[%s12817_s6 + $0x260] sm:$0xff]   ;;  %v10919_v58 = vpop.f32.mrf.mxu1 }
 0x243   :  { %8035 = vmatpush3.bf16.msra.mxu0 %v8947_v43  ;;  %v1907_v39 = vpop.f32.mrf.mxu0  ;;  %2374 = vmatprep.mubr.bf16.mxu1 %v2213_v40  ;;  %v2645_v28 = vsel %vm2635_vm3, %v2640_v52, %v10861_v56  ;;  %v10897_v8 = vsel %vm2635_vm3, %v3207_v5, %v10861_v56  ;;  %v10901_v31 = vsel %vm232_vm0, %v2941_v27, %v10858_v34  ;;  %v2938_v32 = vrot.slane %v2881_v10, 1  ;;  %v8945_v10 = vld [vmem:[%s12817_s6 + $0x20] sm:$0xff]  }
 0x244   :  { %8036 = vmatprep.subr.bf16.mxu0 %v8949_v60  ;;  %2066 = vst [vmem:[#allocation2 + $0x8] sm:$0xff] %v2034_v54  ;;  %v2035_v43 = vmax.f32 %v2003_v45, 0.0  ;;  %v10904_v6 = vadd.f32 %v10547_v50, %v1960_v19  ;;  %v1961_v52 = vadd.f32 %v1907_v39, %v10746_v18  ;;  %2806 = vmatprep.mubr.bf16.mxu0 %v2645_v28  ;;  %v3475_v45 = vrot.slane %v10836_v14, 3  ;;  %v8950_v28 = vld [vmem:[%s12817_s6 + $0x18] sm:$0xff]  }
 0x245   :  { %2375 = vmatmul.mubr.bf16.gmra.mxu1 %v2211_v16  ;;  %v10907_v60 = vpack.c.bf16 %v2034_v54, %v2032_v30  ;;  %v1548_v5 = vadd.f32 %v10509_v1, %v10641_v62  ;;  %v1909_v24 = vpop.f32.mrf.mxu0  ;;  %2807 = vmatmul.mubr.bf16.gmra.mxu0 %v2643_v13  ;;  %v10916_v4 = vsel %vm232_vm0, %v2938_v32, %v10845_v49  ;;  %v8948_v13 = vld [vmem:[%s12817_s6 + $0x58] sm:$0xff]  }
 0x246   :  { %7881 = vmatpush3.bf16.msra.mxu1 %v8941_v7  ;;  %v3430_v18 = vpack.c.bf16 %v10763_v48, %v3426_v38  ;;  %2067 = vst [vmem:[#allocation2 + $0x78] sm:$0xff] %v2035_v43  ;;  %v2036_v30 = vmax.f32 %v10904_v6, 0.0  ;;  %v10923_v1 = vadd.f32 %v10557_v3, %v1961_v52  ;;  %v1962_v62 = vadd.f32 %v1909_v24, %v10748_v53  ;;  %v8953_v48 = vld [vmem:[%s12817_s6 + $0x220] sm:$0xff]   ;;  %v8957_v6 = vld [vmem:[%s12817_s6 + $0x218] sm:$0xff]   ;;  %v8959_v24 = vld [vmem:[%s12817_s6 + $0x250] sm:$0xff]  }
 0x247   :  { %v10926_v16 = vpack.c.bf16 %v2035_v43, %v2033_v25  ;;  %7882 = vmatprep.subr.bf16.mxu1 %v8944_v37  ;;  %8037 = vmatpush3.bf16.msra.mxu0 %v8951_v23  ;;  %v1549_v7 = vadd.f32 %v10519_v36, %v10645_v51  ;;  %v1911_v27 = vpop.f32.mrf.mxu0  ;;  %v2214_v54 = vrot.slane %v10907_v60, 1  ;;  %v2646_v53 = vrot.slane %v10907_v60, 2  ;;  %v8956_v25 = vld [vmem:[%s12817_s6 + $0x258] sm:$0xff]   ;;  %v8954_v43 = vld [vmem:[%s12817_s6 + $0x50] sm:$0xff]  }
 0x248   :  { %8038 = vmatprep.subr.bf16.mxu0 %v8952_v42  ;;  %2068 = vst [vmem:[#allocation2 + $0x38] sm:$0xff] %v2036_v30  ;;  %v2037_v19 = vmax.f32 %v10923_v1, 0.0  ;;  %v2006_v40 = vadd.f32 %v10547_v50, %v1962_v62  ;;  %v1963_v37 = vadd.f32 %v1911_v27, %v10753_v15  ;;  %v1550_v51 = vadd.f32 %v10527_v55, %v10649_v44  ;;  %v10958_v42 = vpop.f32.mrf.mxu1 }
 0x249   :  { %v2216_v36 = vrot.slane %v10926_v16, 1  ;;  %v1915_v23 = vpop.f32.mrf.mxu0  ;;  %v2648_v38 = vrot.slane %v10926_v16, 2  ;;  %v10953_v39 = vsel %vm232_vm0, %v10845_v49, %v2214_v54  ;;  %v3474_v15 = vrot.slane %v3430_v18, 3 }
 0x24a   :  { %7883 = vmatpush3.bf16.msra.mxu1 %v8945_v10  ;;  %2069 = vst [vmem:[#allocation2 + $0x58] sm:$0xff] %v2037_v19  ;;  %v2038_v32 = vmax.f32 %v2006_v40, 0.0  ;;  %v2007_v55 = vadd.f32 %v10557_v3, %v1963_v37  ;;  %v1964_v44 = vadd.f32 %v1915_v23, %v10757_v35  ;;  %v1759_v27 = vadd.f32 %v10874_v47, %v1549_v7  ;;  %v1725_v40 = vpop.f32.mrf.mxu1  ;;  %v8961_v47 = vld [vmem:[%s12817_s6 + $0x210] sm:$0xff]  }
 0x24b   :  { %v10966_v49 = vsel %vm232_vm0, %v10858_v34, %v2216_v36  ;;  %7884 = vmatprep.subr.bf16.mxu1 %v8948_v13  ;;  %8039 = vmatpush3.bf16.msra.mxu0 %v8953_v48  ;;  %v1917_v52 = vpop.f32.mrf.mxu0  ;;  %v10979_v35 = vsel %vm2635_vm3, %v10861_v56, %v2648_v38  ;;  %v10985_v34 = vsel %vm2635_vm3, %v10848_v9, %v2646_v53 }
 0x24c   :  { %2382 = vmatprep.mubr.bf16.mxu1 %v10966_v49  ;;  %8040 = vmatprep.subr.bf16.mxu0 %v8956_v25  ;;  %v10993_v10 = vsel %vm3470_vm4, %v3474_v15, %v3475_v45  ;;  %2070 = vst [vmem:[#allocation2 + $0x40] sm:$0xff] %v2038_v32  ;;  %v2039_v18 = vmax.f32 %v2007_v55, 0.0  ;;  %v2008_v56 = vadd.f32 %v10547_v50, %v1964_v44 }
 0x24d   :  { %12965 = vst [vmem:[#allocation23_spill] sm:$0xff] %v10993_v10  ;;  %v1965_v1 = vadd.f32 %v1917_v52, %v10777_v61  ;;  %2814 = vmatprep.mubr.bf16.mxu0 %v10979_v35  ;;  %2383 = vmatmul.mubr.bf16.gmra.mxu1 %v10953_v39  ;;  %v10999_v62 = vpack.c.bf16 %v2038_v32, %v2036_v30  ;;  %v1919_v25 = vpop.f32.mrf.mxu0  ;;  %v8955_v61 = vld [vmem:[%s12817_s6 + $0x10] sm:$0xff]   ;;  %v12966_v32 = vld [vmem:[#allocation19_spill] sm:$0xff]  ;;  %v12781_v52 = vrot.slane %v10926_v16, 3  ;;  %v11275_v10 = vld [vmem:[#allocation2 + $0xb8] sm:$0xff] }
 0x24e   :  { %v1757_v13 = vadd.f32 %v10787_v2, %v10821_v22  ;;  %v1758_v48 = vadd.f32 %v10829_v20, %v1548_v5  ;;  %2815 = vmatmul.mubr.bf16.gmra.mxu0 %v10985_v34  ;;  %7885 = vmatpush3.bf16.msra.mxu1 %v8950_v28  ;;  %2071 = vst [vmem:[#allocation2 + $0xc8] sm:$0xff] %v2039_v18  ;;  %v11009_v37 = vmax.f32 %v2008_v56, 0.0  ;;  %v8958_v20 = vld [vmem:[%s12817_s6 + $0x48] sm:$0xff]  }
 0x24f   :  { %v2009_v30 = vadd.f32 %v10557_v3, %v1965_v1  ;;  %v1966_v2 = vadd.f32 %v1919_v25, %v10823_v11  ;;  %v11013_v22 = vpack.c.bf16 %v2039_v18, %v2037_v19  ;;  %7886 = vmatprep.subr.bf16.mxu1 %v8954_v43  ;;  %8041 = vmatpush3.bf16.msra.mxu0 %v8957_v6  ;;  %v1921_v23 = vpop.f32.mrf.mxu0  ;;  %v11025_v11 = vrot.slane %v10999_v62, 1  ;;  %v8962_v28 = vld [vmem:[%s12817_s6 + $0x248] sm:$0xff]   ;;  %v8964_v1 = vld [vmem:[%s12817_s6 + $0x40] sm:$0xff]  }
 0x250   :  { %v1551_v5 = vadd.f32 %v10542_v0, %v10652_v12  ;;  %v1760_v7 = vadd.f32 %v10919_v58, %v1550_v51  ;;  %v11028_v19 = vrot.slane %v10999_v62, 2  ;;  %8042 = vmatprep.subr.bf16.mxu0 %v8959_v24  ;;  %2072 = vst [vmem:[#allocation2 + $0xe0] sm:$0xff] %v11009_v37  ;;  %v1967_v12 = vadd.f32 %v1921_v23, %v1757_v13  ;;  %v8960_v6 = vld [vmem:[%s12817_s6 + $0x8] sm:$0xff]   ;;  %v1727_v24 = vpop.f32.mrf.mxu1  ;;  %v8965_v23 = vld [vmem:[%s12817_s6] sm:$0xff]  }
 0x251   :  { %v11034_v15 = vmax.f32 %v2009_v30, 0.0  ;;  %v2010_v0 = vadd.f32 %v10547_v50, %v1966_v2  ;;  %v11038_v58 = vrot.slane %v11013_v22, 1  ;;  %v1552_v51 = vadd.f32 %v10555_v26, %v10660_v57  ;;  %v1925_v44 = vpop.f32.mrf.mxu0  ;;  %v8963_v56 = vld [vmem:[%s12817_s6 + $0x208] sm:$0xff]  }
 0x252   :  { %v1553_v55 = vadd.f32 %v12966_v32, %v10664_v17  ;;  %v11045_v43 = vrot.slane %v11013_v22, 2  ;;  %7887 = vmatpush3.bf16.msra.mxu1 %v8955_v61  ;;  %v2011_v26 = vadd.f32 %v10557_v3, %v1967_v12  ;;  %v1968_v57 = vadd.f32 %v1925_v44, %v1758_v48  ;;  %v8966_v61 = vld [vmem:[%s12817_s6 + $0x240] sm:$0xff]   ;;  %v8968_v12 = vld [vmem:[%s12817_s6 + $0x1f8] sm:$0xff]   ;;  %v12971_v32 = vld [vmem:[#allocation20_spill] sm:$0xff] }
 0x253   :  { %2073 = vst [vmem:[#allocation2 + $0x90] sm:$0xff] %v11034_v15  ;;  %v2042_v18 = vmax.f32 %v2010_v0, 0.0  ;;  %v11057_v17 = vsel %vm232_vm0, %v2216_v36, %v11038_v58  ;;  %7888 = vmatprep.subr.bf16.mxu1 %v8958_v20  ;;  %8043 = vmatpush3.bf16.msra.mxu0 %v8961_v47  ;;  %v1927_v13 = vpop.f32.mrf.mxu0  ;;  %v11076_v36 = vsel %vm232_vm0, %v2214_v54, %v11025_v11  ;;  %v8967_v0 = vld [vmem:[%s12817_s6 + $0x200] sm:$0xff]  }
 0x254   :  { %2390 = vmatprep.mubr.bf16.mxu1 %v11057_v17  ;;  %v11070_v48 = vsel %vm2635_vm3, %v2648_v38, %v11045_v43  ;;  %v11082_v25 = vsel %vm2635_vm3, %v2646_v53, %v11028_v19  ;;  %8044 = vmatprep.subr.bf16.mxu0 %v8962_v28  ;;  %v11087_v38 = vmax.f32 %v2011_v26, 0.0  ;;  %v2012_v30 = vadd.f32 %v10547_v50, %v1968_v57  ;;  %v1729_v28 = vpop.f32.mrf.mxu1 }
 0x255   :  { %2074 = vst [vmem:[#allocation2 + $0x70] sm:$0xff] %v2042_v18  ;;  %v1969_v2 = vadd.f32 %v1927_v13, %v1759_v27  ;;  %2822 = vmatprep.mubr.bf16.mxu0 %v11070_v48  ;;  %2391 = vmatmul.mubr.bf16.gmra.mxu1 %v11076_v36  ;;  %v11093_v54 = vpack.c.bf16 %v2042_v18, %v11009_v37  ;;  %v1929_v47 = vpop.f32.mrf.mxu0  ;;  %v8974_v18 = vld [vmem:[%s12817_s6 + $0x378] sm:$0xff]  }
 0x256   :  { %12967 = vst [vmem:[#allocation24_spill] sm:$0xff] %v11087_v38  ;;  %v1761_v53 = vadd.f32 %v10958_v42, %v1551_v5  ;;  %v1762_v20 = vadd.f32 %v1725_v40, %v1552_v51  ;;  %2823 = vmatmul.mubr.bf16.gmra.mxu0 %v11082_v25  ;;  %7889 = vmatpush3.bf16.msra.mxu1 %v8960_v6  ;;  %2075 = vst [vmem:[#allocation2 + $0xc0] sm:$0xff] %v11087_v38  ;;  %v11108_v42 = vmax.f32 %v2012_v30, 0.0  ;;  %v11121_v51 = vld [vmem:[#allocation2 + $0xc8] sm:$0xff] }
 0x257   :  { %12968 = vst [vmem:[#allocation26_spill] sm:$0xff] %v11093_v54  ;;  %v11105_v27 = vsel %vm3470_vm4, %v3475_v45, %v12781_v52  ;;  %v2013_v40 = vadd.f32 %v10557_v3, %v1969_v2  ;;  %v1970_v5 = vadd.f32 %v1929_v47, %v1760_v7  ;;  %8045 = vmatpush3.bf16.msra.mxu0 %v8963_v56  ;;  %12970 = vst [vmem:[#allocation28_spill] sm:$0xff] %v11121_v51  ;;  %v1931_v6 = vpop.f32.mrf.mxu0 }
 0x258   :  { %12969 = vst [vmem:[#allocation25_spill] sm:$0xff] %v11105_v27  ;;  %7890 = vmatprep.subr.bf16.mxu1 %v8964_v1  ;;  %v11119_v45 = vpack.c.bf16 %v11087_v38, %v11034_v15  ;;  %v1554_v44 = vadd.f32 %v12971_v32, %v10679_v29  ;;  %v1763_v7 = vadd.f32 %v1727_v24, %v1553_v55  ;;  %v12780_v26 = vrot.slane %v11093_v54, 2  ;;  %v11135_v55 = vld [vmem:[#allocation2 + $0x58] sm:$0xff]  ;;  %v1731_v32 = vpop.f32.mrf.mxu1 }
 0x259   :  { %8046 = vmatprep.subr.bf16.mxu0 %v8966_v61  ;;  %2076 = vst [vmem:[#allocation2 + $0xa8] sm:$0xff] %v11108_v42  ;;  %v11131_v56 = vmax.f32 %v2013_v40, 0.0  ;;  %v2014_v1 = vadd.f32 %v10547_v50, %v1970_v5  ;;  %v1971_v13 = vadd.f32 %v1931_v6, %v1761_v53  ;;  %12972 = vst [vmem:[#allocation27_spill] sm:$0xff] %v11135_v55  ;;  %v12973_v24 = vld [vmem:[#allocation21_spill] sm:$0xff]  ;;  %v12974_v61 = vld [vmem:[#allocation22_spill] sm:$0xff]  ;;  %v1935_v2 = vpop.f32.mrf.mxu0 }
 0x25a   :  { %v12783_v29 = vrot.slane %v11119_v45, 2  ;;  %v1555_v30 = vadd.f32 %v12974_v61, %v12973_v24  ;;  %7891 = vmatpush3.bf16.msra.mxu1 %v8965_v23  ;;  %v11143_v47 = vsel %vm2635_vm3, %v11028_v19, %v12780_v26  ;;  %v11147_v40 = vpack.c.bf16 %v11121_v51, %v11135_v55  ;;  %v11149_v53 = vld [vmem:[#allocation2 + $0x90] sm:$0xff] }
 0x25b   :  { %12975 = vst [vmem:[#allocation29_spill] sm:$0xff] %v11149_v53  ;;  %2077 = vst [vmem:[#allocation2 + $0xd0] sm:$0xff] %v11131_v56  ;;  %v2046_v6 = vmax.f32 %v2014_v1, 0.0  ;;  %v2015_v23 = vadd.f32 %v10557_v3, %v1971_v13  ;;  %v1972_v24 = vadd.f32 %v1935_v2, %v1762_v20  ;;  %8047 = vmatpush3.bf16.msra.mxu0 %v8967_v0  ;;  %7980 = vmatprep.subr.bf16.mxu1 %v8968_v12  ;;  %v1937_v52 = vpop.f32.mrf.mxu0 }
 0x25c   :  { %v11158_v61 = vsel %vm2635_vm3, %v11045_v43, %v12783_v29  ;;  %v1764_v26 = vadd.f32 %v1729_v28, %v1554_v44  ;;  %v2152_v57 = vld [vmem:[#allocation2 + $0x70] sm:$0x3]  ;;  %8136 = vmatprep.subr.bf16.mxu0 %v8974_v18  ;;  %v11162_v5 = vpack.c.bf16 %v11087_v38, %v11149_v53  ;;  %v12976_v1 = vrot.slane %v11119_v45, 1 }
 0x25d   :  { %v2592_v51 = vld [vmem:[#allocation2 + $0x70] sm:$0xf]  ;;  %v12977_v0 = vrot.slane %v11093_v54, 1  ;;  %2078 = vst [vmem:[#allocation2 + $0x10] sm:$0xff] %v2046_v6  ;;  %v11176_v28 = vmax.f32 %v2015_v23, 0.0  ;;  %v2016_v44 = vadd.f32 %v10547_v50, %v1972_v24  ;;  %v1973_v18 = vadd.f32 %v1937_v52, %v1763_v7  ;;  %v1939_v29 = vpop.f32.mrf.mxu0 }
 0x25e   :  { %v11168_v20 = vsel %vm232_vm0, %v11038_v58, %v12976_v1  ;;  %v2156_v13 = vpack.c.bf16 %v2152_v57, %v11009_v37  ;;  %v1765_v2 = vadd.f32 %v1731_v32, %v1555_v30  ;;  %v2153_v38 = vld [vmem:[#allocation2 + $0xc0] sm:$0x3]  ;;  %v2596_v1 = vpack.c.bf16 %v2592_v51, %v11009_v37 }
 0x25f   :  { %v11174_v12 = vsel %vm232_vm0, %v11025_v11, %v12977_v0  ;;  %12979 = vst [vmem:[#allocation31_spill] sm:$0xff] %v11176_v28  ;;  %v2593_v53 = vld [vmem:[#allocation2 + $0xc0] sm:$0xf]  ;;  %v12787_v27 = vrot.slane %v11147_v40, 2  ;;  %v3785_v55 = vrot.slane %v11162_v5, 2  ;;  %2079 = vst [vmem:[#allocation2 + $0x28] sm:$0xff] %v11176_v28  ;;  %v2017_v23 = vadd.f32 %v10557_v3, %v1973_v18  ;;  %v1941_v7 = vpop.f32.mrf.mxu0 }
 0x260   :  { %12978 = vst [vmem:[#allocation30_spill] sm:$0xff] %v11174_v12  ;;  %v2048_v6 = vmax.f32 %v2016_v44, 0.0  ;;  %v1974_v0 = vadd.f32 %v1939_v29, %v1764_v26  ;;  %v2157_v52 = vpack.c.bf16 %v2153_v38, %v11034_v15  ;;  %v2597_v57 = vpack.c.bf16 %v2593_v53, %v11034_v15  ;;  %v11282_v12 = vld [vmem:[#allocation2 + $0x38] sm:$0xff] }
 0x261   :  { %v11187_v30 = vrot.slane %v2156_v13, 1  ;;  %v11189_v32 = vrot.slane %v2596_v1, 2  ;;  %v11194_v51 = vsel %vm2635_vm3, %v12787_v27, %v3785_v55  ;;  %v11196_v24 = vmax.f32 %v2017_v23, 0.0 }
 0x262   :  { %2080 = vst [vmem:[#allocation2 + $0xa0] sm:$0xff] %v2048_v6  ;;  %v2018_v44 = vadd.f32 %v10547_v50, %v1974_v0  ;;  %v1975_v26 = vadd.f32 %v1941_v7, %v1765_v2  ;;  %v2224_v29 = vrot.slane %v2157_v52, 1  ;;  %v2656_v38 = vrot.slane %v2597_v57, 2  ;;  %v11199_v18 = vld [vmem:[#allocation2 + $0xd0] sm:$0xff] }
 0x263   :  { %12980 = vst [vmem:[#allocation33_spill] sm:$0xff] %v11199_v18  ;;  %v11206_v27 = vpack.c.bf16 %v11176_v28, %v11199_v18  ;;  %v2223_v50 = vsel %vm232_vm0, %v11025_v11, %v11187_v30  ;;  %v3483_v57 = vrot.slane %v11013_v22, 3  ;;  %v3487_v18 = vrot.slane %v11119_v45, 3  ;;  %v3994_v28 = vld [vmem:[#allocation2 + $0x80] sm:$0xc0] }
 0x264   :  { %v2050_v53 = vmax.f32 %v2018_v44, 0.0  ;;  %v2019_v13 = vadd.f32 %v10557_v3, %v1975_v26  ;;  %v2225_v1 = vsel %vm232_vm0, %v11038_v58, %v2224_v29  ;;  %v2657_v6 = vsel %vm2635_vm3, %v11045_v43, %v2656_v38  ;;  %v3161_v2 = vld [vmem:[#allocation2 + $0x10] sm:$0xf] }
 0x265   :  { %2398 = vmatprep.mubr.bf16.mxu1 %v2225_v1  ;;  %v2879_v23 = vld [vmem:[#allocation2 + $0x10] sm:$0x3]  ;;  %2830 = vmatprep.mubr.bf16.mxu0 %v2657_v6  ;;  %v2655_v3 = vsel %vm2635_vm3, %v11028_v19, %v11189_v32  ;;  %v3165_v58 = vpack.c.bf16 %v3161_v2, %v11108_v42  ;;  %v12788_v52 = vrot.slane %v11206_v27, 2  ;;  %v12985_v6 = vrot.slane %v10926_v16, 3  ;;  %v3159_v2 = vld [vmem:[#allocation2 + $0x50] sm:$0xf0] }
 0x266   :  { %2082 = vst [vmem:[#allocation2 + $0x20] sm:$0xff] %v2050_v53  ;;  %v2051_v0 = vmax.f32 %v2019_v13, 0.0  ;;  %2399 = vmatmul.mubr.bf16.gmra.mxu1 %v2223_v50  ;;  %2831 = vmatmul.mubr.bf16.gmra.mxu0 %v2655_v3  ;;  %v3162_v43 = vld [vmem:[#allocation2 + $0x28] sm:$0xf]  ;;  %v2891_v11 = vpack.c.bf16 %v2879_v23, %v11108_v42  ;;  %v11223_v53 = vld [vmem:[#allocation2 + $0x78] sm:$0xff]  ;;  %v11248_v3 = vld [vmem:[#allocation2 + $0xf0] sm:$0xff] }
 0x267   :  { %2406 = vmatprep.mubr.bf16.mxu1 %v2224_v29  ;;  %v2880_v7 = vld [vmem:[#allocation2 + $0x28] sm:$0x3]  ;;  %2838 = vmatprep.mubr.bf16.mxu0 %v2656_v38  ;;  %v3166_v44 = vpack.c.bf16 %v3162_v43, %v11131_v56  ;;  %v11221_v26 = vrot.slane %v3165_v58, 2  ;;  %12981 = vst [vmem:[#allocation32_spill] sm:$0xff] %v11223_v53  ;;  %v11228_v19 = vsel %vm2635_vm3, %v3785_v55, %v12788_v52  ;;  %12988 = vst [vmem:[#allocation38_spill] sm:$0xff] %v11248_v3 }
 0x268   :  { %2083 = vst [vmem:[#allocation2 + $0x98] sm:$0xff] %v2051_v0  ;;  %12982 = vst [vmem:[#allocation34_spill] sm:$0xff] %v11228_v19  ;;  %v11230_v29 = vld [vmem:[#allocation2 + $0x8] sm:$0xff]  ;;  %v2892_v13 = vpack.c.bf16 %v2880_v7, %v11131_v56  ;;  %v11233_v1 = vrot.slane %v2891_v11, 1  ;;  %v11238_v38 = vsel %vm3470_vm4, %v12985_v6, %v3483_v57  ;;  %v12987_v0 = vrot.slane %v11093_v54, 2  ;;  %v11254_v7 = vld [vmem:[#allocation2 + $0x60] sm:$0xff] }
 0x269   :  { %12983 = vst [vmem:[#allocation35_spill] sm:$0xff] %v11230_v29  ;;  %12986 = vst [vmem:[#allocation36_spill] sm:$0xff] %v11238_v38  ;;  %v3428_v50 = vld [vmem:[#allocation2 + $0x28] sm:$0x3f]  ;;  %v11240_v23 = vrot.slane %v3166_v44, 2  ;;  %v11252_v43 = vpack.c.bf16 %v11223_v53, %v11248_v3  ;;  %v11256_v11 = vld [vmem:[#allocation2 + $0x40] sm:$0xff]  ;;  %v11295_v19 = vsel %vm3470_vm4, %v3483_v57, %v3487_v18 }
 0x26a   :  { %12984 = vst [vmem:[#allocation37_spill] sm:$0xff] %v11233_v1  ;;  %v11246_v55 = vsel %vm2635_vm3, %v12987_v0, %v11221_v26  ;;  %v3427_v58 = vld [vmem:[#allocation2 + $0x10] sm:$0x3f]  ;;  %12989 = vst [vmem:[#allocation40_spill] sm:$0xff] %v11254_v7  ;;  %v11260_v44 = vrot.slane %v2892_v13, 1  ;;  %v12992_v52 = vrot.slane %v11093_v54, 1  ;;  %v11279_v13 = vpack.c.bf16 %v11230_v29, %v11254_v7 }
 0x26b   :  { %12990 = vst [vmem:[#allocation39_spill] sm:$0xff] %v11256_v11  ;;  %v11258_v6 = vld [vmem:[#allocation2 + $0x70] sm:$0xff]  ;;  %v12994_v38 = vrot.slane %v11119_v45, 2  ;;  %v3432_v3 = vpack.c.bf16 %v3428_v50, %v11131_v56  ;;  %12998 = vst [vmem:[#allocation44_spill] sm:$0xff] %v11295_v19  ;;  %v3431_v56 = vpack.c.bf16 %v3427_v58, %v11108_v42  ;;  %v3163_v50 = vpack.c.bf16 %v10750_v21, %v3159_v2  ;;  %v11302_v7 = vld [vmem:[#allocation2 + $0xe8] sm:$0xff] }
 0x26c   :  { %12991 = vst [vmem:[#allocation41_spill] sm:$0xff] %v11258_v6  ;;  %v11266_v0 = vsel %vm232_vm0, %v12992_v52, %v11233_v1  ;;  %v11284_v52 = vld [vmem:[#allocation2 + $0xe0] sm:$0xff]  ;;  %v11286_v1 = vld [vmem:[#allocation2 + $0x10] sm:$0xff]  ;;  %v3995_v19 = vld [vmem:[#allocation2 + $0x88] sm:$0xc0]  ;;  %v4043_v29 = vrot.slane %v11252_v43, 3 }
 0x26d   :  { %12993 = vst [vmem:[#allocation42_spill] sm:$0xff] %v11266_v0  ;;  %v11273_v53 = vsel %vm2635_vm3, %v12994_v38, %v11240_v23  ;;  %12995 = vst [vmem:[#allocation43_spill] sm:$0xff] %v11284_v52  ;;  %v12997_v0 = vrot.slane %v11119_v45, 1  ;;  %v11306_v45 = vpack.c.bf16 %v11256_v11, %v11282_v12  ;;  %v11312_v57 = vrot.slane %v3432_v3, 3  ;;  %v11316_v42 = vld [vmem:[#allocation2 + $0xa8] sm:$0xff]  ;;  %v8978_v11 = vld [vmem:[%s12817_s6 + $0x370] sm:$0xff]  }
 0x26e   :  { %12996 = vst [vmem:[#allocation45_spill] sm:$0xff] %v11286_v1  ;;  %2407 = vmatmul.mubr.bf16.gmra.mxu1 %v11187_v30  ;;  %2839 = vmatmul.mubr.bf16.gmra.mxu0 %v11189_v32  ;;  %13000 = vst [vmem:[#allocation48_spill] sm:$0xff] %v11316_v42  ;;  %v12801_v30 = vrot.slane %v11093_v54, 3  ;;  %v11319_v2 = vrot.slane %v3431_v56, 3  ;;  %v3999_v58 = vpack.c.bf16 %v11275_v10, %v3995_v19 }
 0x26f   :  { %v11292_v38 = vsel %vm232_vm0, %v12997_v0, %v11260_v44  ;;  %v11310_v0 = vpack.c.bf16 %v11258_v6, %v11284_v52  ;;  %12999 = vst [vmem:[#allocation46_spill] sm:$0xff] %v11312_v57  ;;  %2542 = vmatprep.mubr.bf16.mxu1 %v10722_v46  ;;  %v3715_v21 = vld [vmem:[#allocation2 + $0x98] sm:$0xf]  ;;  %3366 = vmatprep.mubr.bf16.mxu0 %v10897_v8  ;;  %v4040_v6 = vrot.slane %v11279_v13, 3  ;;  %v11372_v52 = vld [vmem:[#allocation2 + $0xa0] sm:$0xff] }
 0x270   :  { %13001 = vst [vmem:[#allocation47_spill] sm:$0xff] %v11319_v2  ;;  %v11326_v3 = vpack.c.bf16 %v11286_v1, %v11316_v42  ;;  %v3727_v32 = vpack.c.bf16 %v3715_v21, %v11196_v24  ;;  %v11331_v46 = vsel %vm3470_vm4, %v3487_v18, %v11312_v57  ;;  %v11337_v19 = vsel %vm3470_vm4, %v12801_v30, %v11319_v2  ;;  %v3996_v57 = vld [vmem:[#allocation2 + $0x20] sm:$0x3f]  ;;  %v3997_v2 = vld [vmem:[#allocation2 + $0x98] sm:$0x3f] }
 0x271   :  { %13002 = vst [vmem:[#allocation49_spill] sm:$0xff] %v11331_v46  ;;  %13003 = vst [vmem:[#allocation58_spill] sm:$0xff] %v11337_v19  ;;  %v4042_v56 = vrot.slane %v3999_v58, 3  ;;  %v3998_v8 = vpack.c.bf16 %v11302_v7, %v3994_v28  ;;  %v3204_v1 = vrot.slane %v3163_v50, 2  ;;  %v4047_v21 = vrot.slane %v11147_v40, 3  ;;  %v8969_v28 = vld [vmem:[%s12817_s6 + $0x1b8] sm:$0xff]  }
 0x272   :  { %v11341_v42 = vrot.slane %v3727_v32, 2  ;;  %v4045_v18 = vrot.slane %v11306_v45, 3  ;;  %v4051_v30 = vrot.slane %v11162_v5, 3  ;;  %v4049_v58 = vrot.slane %v11310_v0, 3 }
 0x273   :  { %v11346_v46 = vsel %vm3470_vm4, %v4042_v56, %v4043_v29  ;;  %v4039_v54 = vrot.slane %v3998_v8, 3  ;;  %v13005_v50 = vrot.slane %v11206_v27, 2  ;;  %v11360_v19 = vsel %vm3470_vm4, %v4043_v29, %v4047_v21  ;;  %v8970_v8 = vld [vmem:[%s12817_s6 + $0x1f0] sm:$0xff]  }
 0x274   :  { %13004 = vst [vmem:[#allocation60_spill] sm:$0xff] %v11346_v46  ;;  %13006 = vst [vmem:[#allocation51_spill] sm:$0xff] %v11360_v19  ;;  %v11363_v56 = vsel %vm3470_vm4, %v4040_v6, %v4045_v18  ;;  %v4055_v5 = vrot.slane %v11206_v27, 3  ;;  %v8975_v46 = vld [vmem:[%s12817_s6 + $0x338] sm:$0xff]   ;;  %v11378_v29 = vsel %vm3470_vm4, %v4047_v21, %v4051_v30  ;;  %v4053_v27 = vrot.slane %v11326_v3, 3 }
 0x275   :  { %v11357_v32 = vsel %vm2635_vm3, %v13005_v50, %v11341_v42  ;;  %13007 = vst [vmem:[#allocation50_spill] sm:$0xff] %v11363_v56  ;;  %v11375_v50 = vsel %vm3470_vm4, %v4039_v54, %v4040_v6  ;;  %v11381_v56 = vsel %vm3470_vm4, %v4045_v18, %v4049_v58  ;;  %v3206_v19 = vsel %vm2635_vm3, %v3204_v1, %v10848_v9 }
 0x276   :  { %2543 = vmatmul.mubr.bf16.vlgmr.msra.gmra.mxu1 %v10710_v59  ;;  %v11391_v54 = vsel %vm3470_vm4, %v4051_v30, %v4055_v5  ;;  %v4001_v6 = vpack.c.bf16 %v3997_v2, %v11196_v24  ;;  %v4000_v21 = vpack.c.bf16 %v3996_v57, %v11372_v52  ;;  %3367 = vmatmul.mubr.bf16.vlgmr.msra.gmra.mxu0 %v3206_v19  ;;  %v8971_v59 = vld [vmem:[%s12817_s6 + $0x1b0] sm:$0xff]   ;;  %v8972_v57 = vld [vmem:[%s12817_s6 + $0x1e8] sm:$0xff]  }
 0x277   :  { %2550 = vmatprep.mubr.bf16.mxu1 %v10775_v33  ;;  %v11397_v18 = vsel %vm3470_vm4, %v4049_v58, %v4053_v27  ;;  %7981 = vmatpush3.bf16.msra.mxu1 %v8969_v28  ;;  %v8979_v33 = vld [vmem:[%s12817_s6 + $0x330] sm:$0xff]   ;;  %v8983_v19 = vld [vmem:[%s12817_s6 + $0x328] sm:$0xff]   ;;  %v8984_v58 = vld [vmem:[%s12817_s6 + $0x360] sm:$0xff]  }
 0x278   :  { %3374 = vmatprep.mubr.bf16.mxu0 %v10979_v35  ;;  %v11403_v9 = vrot.slane %v4001_v6, 3  ;;  %v11405_v1 = vrot.slane %v4000_v21, 3  ;;  %7982 = vmatprep.subr.bf16.mxu1 %v8970_v8  ;;  %v8981_v35 = vld [vmem:[%s12817_s6 + $0x368] sm:$0xff]   ;;  %v8977_v28 = vld [vmem:[%s12817_s6 + $0x1a0] sm:$0xff]   ;;  %v8989_v8 = vld [vmem:[%s12817_s6 + $0x318] sm:$0xff]  }
 0x279   :  { %8137 = vmatpush3.bf16.msra.mxu0 %v8975_v46  ;;  %v8973_v46 = vld [vmem:[%s12817_s6 + $0x1a8] sm:$0xff]   ;;  %v8987_v6 = vld [vmem:[%s12817_s6 + $0x190] sm:$0xff]  }
 0x27a   :  { %8138 = vmatprep.subr.bf16.mxu0 %v8978_v11  ;;  %v11418_v30 = vsel %vm3470_vm4, %v4055_v5, %v11403_v9  ;;  %v11422_v2 = vsel %vm3470_vm4, %v4053_v27, %v11405_v1  ;;  %v8976_v11 = vld [vmem:[%s12817_s6 + $0x1e0] sm:$0xff]   ;;  %v8991_v27 = vld [vmem:[%s12817_s6 + $0x350] sm:$0xff]   ;;  %v8990_v21 = vld [vmem:[%s12817_s6 + $0x1c8] sm:$0xff]  }
 0x27b   :  { %7983 = vmatpush3.bf16.msra.mxu1 %v8971_v59  ;;  %v8985_v5 = vld [vmem:[%s12817_s6 + $0x320] sm:$0xff]   ;;  %v8993_v59 = vld [vmem:[%s12817_s6 + $0x310] sm:$0xff]  }
 0x27c   :  { %7984 = vmatprep.subr.bf16.mxu1 %v8972_v57  ;;  %v8996_v57 = vld [vmem:[%s12817_s6 + $0x1c0] sm:$0xff]  }
 0x27d   :  { %8139 = vmatpush3.bf16.msra.mxu0 %v8979_v33  ;;  %v8998_v33 = vld [vmem:[%s12817_s6 + $0x340] sm:$0xff]  }
 0x27e   :  { %2551 = vmatmul.mubr.bf16.gmra.mxu1 %v10768_v41  ;;  %8140 = vmatprep.subr.bf16.mxu0 %v8981_v35  ;;  %v8980_v41 = vld [vmem:[%s12817_s6 + $0x1d8] sm:$0xff]   ;;  %v8997_v35 = vld [vmem:[%s12817_s6 + $0x180] sm:$0xff]  }
 0x27f   :  { %3375 = vmatmul.mubr.bf16.gmra.mxu0 %v10985_v34  ;;  %2558 = vmatprep.mubr.bf16.mxu1 %v10836_v14  ;;  %v8988_v14 = vld [vmem:[%s12817_s6 + $0x358] sm:$0xff]  }
 0x280   :  { %3382 = vmatprep.mubr.bf16.mxu0 %v11070_v48  ;;  %7985 = vmatpush3.bf16.msra.mxu1 %v8973_v46  ;;  %v8982_v34 = vld [vmem:[%s12817_s6 + $0x198] sm:$0xff]   ;;  %v8986_v48 = vld [vmem:[%s12817_s6 + $0x1d0] sm:$0xff]   ;;  %v8999_v46 = vld [vmem:[%s12817_s6 + $0x300] sm:$0xff]  }
 0x281   :  { %7986 = vmatprep.subr.bf16.mxu1 %v8976_v11  ;;  %8141 = vmatpush3.bf16.msra.mxu0 %v8983_v19  ;;  %v9000_v11 = vld [vmem:[%s12817_s6 + $0x2f8] sm:$0xff]  }
 0x282   :  { %8142 = vmatprep.subr.bf16.mxu0 %v8984_v58  ;;  %v3777_v58 = vrot.slane %v11252_v43, 2  ;;  %v9001_v43 = vld [vmem:[%s12817_s6 + $0x2b8] sm:$0xff]  }
 0x284   :  { %7987 = vmatpush3.bf16.msra.mxu1 %v8977_v28  ;;  %v2116_v28 = vpack.c.bf16 %v11009_v37, %v11009_v37  ;;  %v9002_v37 = vld [vmem:[%s12817_s6 + $0x2f0] sm:$0xff]  }
 0x285   :  { %7988 = vmatprep.subr.bf16.mxu1 %v8980_v41  ;;  %8143 = vmatpush3.bf16.msra.mxu0 %v8985_v5  ;;  %v3774_v5 = vrot.slane %v11279_v13, 2  ;;  %v9010_v13 = vld [vmem:[%s12817_s6 + $0x470] sm:$0xff]  }
 0x286   :  { %2559 = vmatmul.mubr.bf16.gmra.mxu1 %v10817_v63  ;;  %8144 = vmatprep.subr.bf16.mxu0 %v8988_v14 }
 0x287   :  { %3383 = vmatmul.mubr.bf16.gmra.mxu0 %v11082_v25  ;;  %2566 = vmatprep.mubr.bf16.mxu1 %v10926_v16  ;;  %v8994_v16 = vld [vmem:[%s12817_s6 + $0x348] sm:$0xff]  }
 0x288   :  { %3390 = vmatprep.mubr.bf16.mxu0 %v11158_v61  ;;  %7989 = vmatpush3.bf16.msra.mxu1 %v8982_v34  ;;  %v8992_v25 = vld [vmem:[%s12817_s6 + $0x188] sm:$0xff]   ;;  %v13008_v34 = vrot.slane %v11147_v40, 2  ;;  %v3779_v40 = vrot.slane %v11306_v45, 2 }
 0x289   :  { %7990 = vmatprep.subr.bf16.mxu1 %v8986_v48  ;;  %8145 = vmatpush3.bf16.msra.mxu0 %v8989_v8  ;;  %v8995_v61 = vld [vmem:[%s12817_s6 + $0x308] sm:$0xff]   ;;  %v9003_v8 = vld [vmem:[%s12817_s6 + $0x2b0] sm:$0xff]  }
 0x28a   :  { %8146 = vmatprep.subr.bf16.mxu0 %v8991_v27  ;;  %v3782_v48 = vsel %vm2635_vm3, %v3777_v58, %v13008_v34  ;;  %v9013_v27 = vld [vmem:[%s12817_s6 + $0x468] sm:$0xff]  }
 0x28b   :  { %v9015_v45 = vld [vmem:[%s12817_s6 + $0x428] sm:$0xff]  }
 0x28c   :  { %7991 = vmatpush3.bf16.msra.mxu1 %v8987_v6  ;;  %v9005_v6 = vld [vmem:[%s12817_s6 + $0x2a8] sm:$0xff]  }
 0x28d   :  { %7992 = vmatprep.subr.bf16.mxu1 %v8990_v21  ;;  %8147 = vmatpush3.bf16.msra.mxu0 %v8993_v59  ;;  %v9008_v21 = vld [vmem:[%s12817_s6 + $0x2e0] sm:$0xff]   ;;  %v3780_v59 = vsel %vm2635_vm3, %v3774_v5, %v3779_v40 }
 0x28e   :  { %2567 = vmatmul.mubr.bf16.gmra.mxu1 %v10907_v60  ;;  %8148 = vmatprep.subr.bf16.mxu0 %v8994_v16  ;;  %v9016_v16 = vld [vmem:[%s12817_s6 + $0x460] sm:$0xff]  }
 0x28f   :  { %3391 = vmatmul.mubr.bf16.gmra.mxu0 %v11143_v47  ;;  %2574 = vmatprep.mubr.bf16.mxu1 %v11013_v22  ;;  %v9006_v22 = vld [vmem:[%s12817_s6 + $0x478] sm:$0xff]   ;;  %v2117_v47 = vpack.c.bf16 %v11034_v15, %v11034_v15 }
 0x290   :  { %3398 = vmatprep.mubr.bf16.mxu0 %v11273_v53  ;;  %7993 = vmatpush3.bf16.msra.mxu1 %v8992_v25  ;;  %v3693_v53 = vld [vmem:[#allocation2 + $0x88] sm:$0xf0]  ;;  %v9009_v25 = vld [vmem:[%s12817_s6 + $0x2a0] sm:$0xff]  }
 0x291   :  { %8149 = vmatpush3.bf16.msra.mxu0 %v8995_v61  ;;  %7994 = vmatprep.subr.bf16.mxu1 %v8996_v57  ;;  %v3717_v19 = vpack.c.bf16 %v11275_v10, %v3693_v53  ;;  %v9017_v61 = vld [vmem:[%s12817_s6 + $0x420] sm:$0xff]   ;;  %v3783_v57 = vrot.slane %v11310_v0, 2  ;;  %v9021_v0 = vld [vmem:[%s12817_s6 + $0x418] sm:$0xff]   ;;  %v3787_v53 = vrot.slane %v11326_v3, 2 }
 0x292   :  { %8150 = vmatprep.subr.bf16.mxu0 %v8998_v33  ;;  %v9018_v33 = vld [vmem:[%s12817_s6 + $0x2d0] sm:$0xff]   ;;  %v9028_v3 = vld [vmem:[%s12817_s6 + $0x2c0] sm:$0xff]  }
 0x293   :  { %v3776_v41 = vrot.slane %v3717_v19, 2  ;;  %v3714_v19 = vld [vmem:[#allocation2 + $0x20] sm:$0xf] }
 0x294   :  { %7995 = vmatpush3.bf16.msra.mxu1 %v8997_v35  ;;  %v3784_v35 = vsel %vm2635_vm3, %v3779_v40, %v3783_v57 }
 0x295   :  { %8151 = vmatpush3.bf16.msra.mxu0 %v8999_v46  ;;  %8084 = vmatprep.subr.bf16.mxu1 %v9000_v11  ;;  %v3778_v15 = vsel %vm2635_vm3, %v3776_v41, %v3777_v58  ;;  %v9023_v46 = vld [vmem:[%s12817_s6 + $0x450] sm:$0xff]   ;;  %v13009_v11 = vld [vmem:[#allocation34_spill] sm:$0xff]  ;;  %v9024_v58 = vld [vmem:[%s12817_s6 + $0x288] sm:$0xff]  }
 0x296   :  { %2575 = vmatmul.mubr.bf16.gmra.mxu1 %v10999_v62  ;;  %8240 = vmatprep.subr.bf16.mxu0 %v9006_v22  ;;  %v9019_v22 = vld [vmem:[%s12817_s6 + $0x290] sm:$0xff]   ;;  %v13010_v41 = vld [vmem:[#allocation30_spill] sm:$0xff] }
 0x297   :  { %3399 = vmatmul.mubr.bf16.gmra.mxu0 %v11246_v55  ;;  %2582 = vmatprep.mubr.bf16.mxu1 %v2117_v47  ;;  %v3692_v55 = vld [vmem:[#allocation2 + $0x80] sm:$0xf0]  ;;  %v9025_v47 = vld [vmem:[%s12817_s6 + $0x410] sm:$0xff]  }
 0x298   :  { %3406 = vmatprep.mubr.bf16.mxu0 %v11240_v23  ;;  %v3716_v23 = vpack.c.bf16 %v11302_v7, %v3692_v55  ;;  %v3726_v55 = vpack.c.bf16 %v3714_v19, %v11372_v52  ;;  %v13025_v19 = vld [vmem:[#allocation24_spill] sm:$0xff] }
 0x29a   :  { %v3773_v14 = vrot.slane %v3716_v23, 2  ;;  %v9030_v23 = vld [vmem:[%s12817_s6 + $0x440] sm:$0xff]  }
 0x29e   :  { %2583 = vmatmul.mubr.bf16.gmra.mxu1 %v2116_v28  ;;  %v9027_v28 = vld [vmem:[%s12817_s6 + $0x408] sm:$0xff]  }
 0x29f   :  { %3407 = vmatmul.mubr.bf16.gmra.mxu0 %v11221_v26  ;;  %3100 = vmatprep.mubr.bf16.mxu1 %v10901_v31  ;;  %v9007_v31 = vld [vmem:[%s12817_s6 + $0x438] sm:$0xff]   ;;  %v3775_v26 = vsel %vm2635_vm3, %v3773_v14, %v3774_v5  ;;  %v9029_v5 = vld [vmem:[%s12817_s6 + $0x280] sm:$0xff]  }
 0x2a0   :  { %3935 = vmatprep.mubr.bf16.mxu0 %v3778_v15  ;;  %v3788_v15 = vsel %vm2635_vm3, %v3783_v57, %v3787_v53  ;;  %v9031_v14 = vld [vmem:[%s12817_s6 + $0x400] sm:$0xff]  }
 0x2a1   :  { %v13019_v57 = vld [vmem:[#allocation35_spill] sm:$0xff] }
 0x2a6   :  { %3101 = vmatmul.mubr.bf16.vlgmr.msra.gmra.mxu1 %v10916_v4  ;;  %v9004_v4 = vld [vmem:[%s12817_s6 + $0x2e8] sm:$0xff]  }
 0x2a7   :  { %3936 = vmatmul.mubr.bf16.vlgmr.msra.gmra.mxu0 %v3775_v26  ;;  %3108 = vmatprep.mubr.bf16.mxu1 %v10966_v49  ;;  %v9011_v49 = vld [vmem:[%s12817_s6 + $0x430] sm:$0xff]  }
 0x2a8   :  { %8085 = vmatpush3.bf16.msra.mxu1 %v9001_v43  ;;  %3943 = vmatprep.mubr.bf16.mxu0 %v3782_v48  ;;  %v9032_v43 = vld [vmem:[%s12817_s6 + $0x3f8] sm:$0xff]   ;;  %v13014_v48 = vld [vmem:[#allocation23_spill] sm:$0xff] }
 0x2a9   :  { %8086 = vmatprep.subr.bf16.mxu1 %v9002_v37  ;;  %8241 = vmatpush3.bf16.msra.mxu0 %v9007_v31  ;;  %v3791_v37 = vrot.slane %v3726_v55, 2  ;;  %v3425_v31 = vld [vmem:[#allocation2 + $0x50] sm:$0xc0]  ;;  %v9045_v55 = vld [vmem:[%s12817_s6 + $0x388] sm:$0xff]  }
 0x2aa   :  { %8242 = vmatprep.subr.bf16.mxu0 %v9010_v13  ;;  %v13012_v26 = vld [vmem:[#allocation37_spill] sm:$0xff]  ;;  %v13013_v13 = vld [vmem:[#allocation38_spill] sm:$0xff] }
 0x2ab   :  { %v4263_v34 = vpack.c.bf16 %v13013_v13, %v11275_v10  ;;  %v9034_v10 = vld [vmem:[%s12817_s6 + $0x3f0] sm:$0xff]  }
 0x2ac   :  { %8087 = vmatpush3.bf16.msra.mxu1 %v9003_v8  ;;  %v9199_v8 = vld [vmem:[#allocation2 + $0x30] sm:$0xff] }
 0x2ad   :  { %8088 = vmatprep.subr.bf16.mxu1 %v9004_v4  ;;  %8243 = vmatpush3.bf16.msra.mxu0 %v9011_v49  ;;  %v3429_v4 = vpack.c.bf16 %v9199_v8, %v3425_v31  ;;  %v3472_v49 = vrot.slane %v10817_v63, 3  ;;  %v13018_v63 = vld [vmem:[#allocation25_spill] sm:$0xff] }
 0x2ae   :  { %3109 = vmatmul.mubr.bf16.gmra.mxu1 %v10953_v39  ;;  %8244 = vmatprep.subr.bf16.mxu0 %v9013_v27  ;;  %v9012_v39 = vld [vmem:[%s12817_s6 + $0x2d8] sm:$0xff]  }
 0x2af   :  { %3944 = vmatmul.mubr.bf16.gmra.mxu0 %v3780_v59  ;;  %3116 = vmatprep.mubr.bf16.mxu1 %v11057_v17  ;;  %v9020_v17 = vld [vmem:[%s12817_s6 + $0x458] sm:$0xff]   ;;  %v3471_v40 = vrot.slane %v3429_v4, 3 }
 0x2b0   :  { %3951 = vmatprep.mubr.bf16.mxu0 %v11194_v51  ;;  %8089 = vmatpush3.bf16.msra.mxu1 %v9005_v6  ;;  %v9014_v51 = vld [vmem:[%s12817_s6 + $0x298] sm:$0xff]  }
 0x2b1   :  { %8090 = vmatprep.subr.bf16.mxu1 %v9008_v21  ;;  %8245 = vmatpush3.bf16.msra.mxu0 %v9015_v45  ;;  %v3473_v6 = vsel %vm3470_vm4, %v3471_v40, %v3472_v49  ;;  %v13016_v21 = vld [vmem:[#allocation32_spill] sm:$0xff]  ;;  %v13017_v45 = vld [vmem:[#allocation27_spill] sm:$0xff]  ;;  %v13032_v31 = vld [vmem:[#allocation49_spill] sm:$0xff] }
 0x2b2   :  { %8246 = vmatprep.subr.bf16.mxu0 %v9016_v16  ;;  %v4265_v59 = vpack.c.bf16 %v13017_v45, %v13016_v21  ;;  %v9035_v16 = vld [vmem:[%s12817_s6 + $0x3b0] sm:$0xff]  }
 0x2b3   :  { %v13035_v8 = vld [vmem:[#allocation45_spill] sm:$0xff] }
 0x2b4   :  { %8091 = vmatpush3.bf16.msra.mxu1 %v9009_v25  ;;  %v9036_v25 = vld [vmem:[%s12817_s6 + $0x3e8] sm:$0xff]   ;;  %v4270_v4 = vpack.c.bf16 %v11372_v52, %v13035_v8 }
 0x2b5   :  { %8092 = vmatprep.subr.bf16.mxu1 %v9012_v39  ;;  %8247 = vmatpush3.bf16.msra.mxu0 %v9017_v61  ;;  %v9037_v39 = vld [vmem:[%s12817_s6 + $0x3a8] sm:$0xff]  }
 0x2b6   :  { %3117 = vmatmul.mubr.bf16.gmra.mxu1 %v11076_v36  ;;  %8248 = vmatprep.subr.bf16.mxu0 %v9020_v17  ;;  %v9022_v36 = vld [vmem:[%s12817_s6 + $0x2c8] sm:$0xff]   ;;  %v4264_v17 = vpack.c.bf16 %v11282_v12, %v13019_v57  ;;  %v3481_v12 = vrot.slane %v10999_v62, 3  ;;  %v9042_v62 = vld [vmem:[%s12817_s6 + $0x3d0] sm:$0xff]  }
 0x2b7   :  { %3952 = vmatmul.mubr.bf16.gmra.mxu0 %v3784_v35  ;;  %3124 = vmatprep.mubr.bf16.mxu1 %v11168_v20  ;;  %v9026_v20 = vld [vmem:[%s12817_s6 + $0x448] sm:$0xff]  }
 0x2b8   :  { %3959 = vmatprep.mubr.bf16.mxu0 %v13009_v11  ;;  %8093 = vmatpush3.bf16.msra.mxu1 %v9014_v51  ;;  %v9038_v51 = vld [vmem:[%s12817_s6 + $0x3e0] sm:$0xff]   ;;  %v13022_v35 = vld [vmem:[#allocation36_spill] sm:$0xff]  ;;  %v9040_v11 = vld [vmem:[%s12817_s6 + $0x3d8] sm:$0xff]  }
 0x2b9   :  { %8094 = vmatprep.subr.bf16.mxu1 %v9018_v33  ;;  %8249 = vmatpush3.bf16.msra.mxu0 %v9021_v0  ;;  %v13021_v33 = vld [vmem:[#allocation29_spill] sm:$0xff] }
 0x2ba   :  { %8250 = vmatprep.subr.bf16.mxu0 %v9023_v46  ;;  %v9039_v46 = vld [vmem:[%s12817_s6 + $0x3a0] sm:$0xff]  }
 0x2bc   :  { %8095 = vmatpush3.bf16.msra.mxu1 %v9019_v22  ;;  %v9041_v22 = vld [vmem:[%s12817_s6 + $0x398] sm:$0xff]  }
 0x2bd   :  { %8096 = vmatprep.subr.bf16.mxu1 %v9022_v36  ;;  %8251 = vmatpush3.bf16.msra.mxu0 %v9025_v47  ;;  %v13023_v47 = vld [vmem:[#allocation39_spill] sm:$0xff] }
 0x2be   :  { %3125 = vmatmul.mubr.bf16.gmra.mxu1 %v13010_v41  ;;  %8252 = vmatprep.subr.bf16.mxu0 %v9026_v20  ;;  %v9043_v41 = vld [vmem:[%s12817_s6 + $0x390] sm:$0xff]  }
 0x2bf   :  { %3960 = vmatmul.mubr.bf16.gmra.mxu0 %v3788_v15  ;;  %3132 = vmatprep.mubr.bf16.mxu1 %v11292_v38  ;;  %v13011_v38 = vld [vmem:[#allocation42_spill] sm:$0xff]  ;;  %v9044_v15 = vld [vmem:[%s12817_s6 + $0x3c8] sm:$0xff]  }
 0x2c0   :  { %3967 = vmatprep.mubr.bf16.mxu0 %v11357_v32  ;;  %8097 = vmatpush3.bf16.msra.mxu1 %v9024_v58  ;;  %v3792_v32 = vsel %vm2635_vm3, %v3787_v53, %v3791_v37  ;;  %v13024_v53 = vld [vmem:[#allocation43_spill] sm:$0xff]  ;;  %v13026_v58 = vld [vmem:[#allocation33_spill] sm:$0xff] }
 0x2c1   :  { %8253 = vmatpush3.bf16.msra.mxu0 %v9027_v28  ;;  %8098 = vmatprep.subr.bf16.mxu1 %v9028_v3  ;;  %v4266_v20 = vpack.c.bf16 %v13024_v53, %v13023_v47  ;;  %v4269_v28 = vpack.c.bf16 %v13026_v58, %v13025_v19  ;;  %v13027_v3 = vld [vmem:[#allocation44_spill] sm:$0xff]  ;;  %v13041_v47 = vld [vmem:[#allocation50_spill] sm:$0xff] }
 0x2c2   :  { %8254 = vmatprep.subr.bf16.mxu0 %v9030_v23  ;;  %v13028_v23 = vld [vmem:[#allocation26_spill] sm:$0xff] }
 0x2c4   :  { %8099 = vmatpush3.bf16.msra.mxu1 %v9029_v5  ;;  %v13029_v5 = vrot.slane %v13028_v23, 3 }
 0x2c5   :  { %8255 = vmatpush3.bf16.msra.mxu0 %v9031_v14  ;;  %8188 = vmatprep.subr.bf16.mxu1 %v9032_v43  ;;  %v13030_v43 = vld [vmem:[#allocation41_spill] sm:$0xff] }
 0x2c6   :  { %3133 = vmatmul.mubr.bf16.gmra.mxu1 %v13011_v38  ;;  %v3486_v14 = vsel %vm3470_vm4, %v3481_v12, %v13029_v5 }
 0x2c7   :  { %3968 = vmatmul.mubr.bf16.gmra.mxu0 %v3792_v32  ;;  %3140 = vmatprep.mubr.bf16.mxu1 %v11260_v44  ;;  %v9033_v44 = vld [vmem:[%s12817_s6 + $0x3b8] sm:$0xff]   ;;  %v9046_v32 = vld [vmem:[%s12817_s6 + $0x3c0] sm:$0xff]  }
 0x2c8   :  { %3975 = vmatprep.mubr.bf16.mxu0 %v11341_v42  ;;  %v13015_v42 = vld [vmem:[#allocation40_spill] sm:$0xff] }
 0x2c9   :  { %v4262_v27 = vpack.c.bf16 %v13015_v42, %v11302_v7  ;;  %v3477_v7 = vrot.slane %v10907_v60, 3  ;;  %v13020_v60 = vld [vmem:[#allocation28_spill] sm:$0xff] }
 0x2ca   :  { %v4267_v0 = vpack.c.bf16 %v13021_v33, %v13020_v60 }
 0x2cb   :  { %v3478_v61 = vsel %vm3470_vm4, %v3472_v49, %v3477_v7  ;;  %v3482_v36 = vsel %vm3470_vm4, %v3477_v7, %v3481_v12  ;;  %v13036_v49 = vld [vmem:[#allocation58_spill] sm:$0xff] }
 0x2ce   :  { %3141 = vmatmul.mubr.bf16.gmra.mxu1 %v13012_v26  ;;  %v13033_v26 = vld [vmem:[#allocation31_spill] sm:$0xff] }
 0x2cf   :  { %3976 = vmatmul.mubr.bf16.gmra.mxu0 %v3791_v37  ;;  %3633 = vmatprep.mubr.bf16.mxu1 %v13014_v48  ;;  %v13031_v37 = vld [vmem:[#allocation48_spill] sm:$0xff]  ;;  %v13034_v13 = vpack.c.bf16 %v11196_v24, %v13033_v26  ;;  %v4261_v48 = vld [vmem:[#allocation2 + $0x98] sm:$0xff]  ;;  %v4260_v24 = vld [vmem:[#allocation2 + $0x20] sm:$0xff] }
 0x2d0   :  { %4435 = vmatprep.mubr.bf16.mxu0 %v4263_v34  ;;  %v4268_v38 = vpack.c.bf16 %v13031_v37, %v13030_v43  ;;  %v9047_v34 = vld [vmem:[%s12817_s6 + $0x380] sm:$0xff]   ;;  %v4273_v40 = vpack.c.bf16 %v4261_v48, %v4261_v48  ;;  %v4272_v42 = vpack.c.bf16 %v4260_v24, %v4260_v24 }
 0x2d6   :  { %3634 = vmatmul.mubr.bf16.vlgmr.msra.gmra.mxu1 %v3473_v6 }
 0x2d7   :  { %4436 = vmatmul.mubr.bf16.vlgmr.msra.gmra.mxu0 %v4262_v27  ;;  %3641 = vmatprep.mubr.bf16.mxu1 %v13018_v63  ;;  %v13038_v27 = vld [vmem:[#allocation47_spill] sm:$0xff] }
 0x2d8   :  { %8189 = vmatpush3.bf16.msra.mxu1 %v9033_v44  ;;  %4443 = vmatprep.mubr.bf16.mxu0 %v4265_v59  ;;  %v13037_v44 = vld [vmem:[#allocation46_spill] sm:$0xff] }
 0x2d9   :  { %8190 = vmatprep.subr.bf16.mxu1 %v9034_v10  ;;  %v13039_v10 = vld [vmem:[#allocation60_spill] sm:$0xff] }
 0x2dc   :  { %8191 = vmatpush3.bf16.msra.mxu1 %v9035_v16 }
 0x2dd   :  { %8192 = vmatprep.subr.bf16.mxu1 %v9036_v25 }
 0x2de   :  { %3642 = vmatmul.mubr.bf16.gmra.mxu1 %v3478_v61 }
 0x2df   :  { %4444 = vmatmul.mubr.bf16.gmra.mxu0 %v4264_v17  ;;  %3649 = vmatprep.mubr.bf16.mxu1 %v13022_v35  ;;  %v13040_v17 = vld [vmem:[#allocation51_spill] sm:$0xff] }
 0x2e0   :  { %4451 = vmatprep.mubr.bf16.mxu0 %v4267_v0  ;;  %8193 = vmatpush3.bf16.msra.mxu1 %v9037_v39 }
 0x2e1   :  { %8194 = vmatprep.subr.bf16.mxu1 %v9038_v51 }
 0x2e4   :  { %8195 = vmatpush3.bf16.msra.mxu1 %v9039_v46 }
 0x2e5   :  { %8196 = vmatprep.subr.bf16.mxu1 %v9040_v11 }
 0x2e6   :  { %3650 = vmatmul.mubr.bf16.gmra.mxu1 %v3482_v36 }
 0x2e7   :  { %4452 = vmatmul.mubr.bf16.gmra.mxu0 %v4266_v20  ;;  %3657 = vmatprep.mubr.bf16.mxu1 %v13027_v3 }
 0x2e8   :  { %4459 = vmatprep.mubr.bf16.mxu0 %v4269_v28  ;;  %8197 = vmatpush3.bf16.msra.mxu1 %v9041_v22 }
 0x2e9   :  { %8198 = vmatprep.subr.bf16.mxu1 %v9042_v62 }
 0x2ec   :  { %8199 = vmatpush3.bf16.msra.mxu1 %v9043_v41 }
 0x2ed   :  { %8200 = vmatprep.subr.bf16.mxu1 %v9044_v15 }
 0x2ee   :  { %3658 = vmatmul.mubr.bf16.gmra.mxu1 %v3486_v14 }
 0x2ef   :  { %4460 = vmatmul.mubr.bf16.gmra.mxu0 %v4268_v38  ;;  %3665 = vmatprep.mubr.bf16.mxu1 %v13032_v31 }
 0x2f0   :  { %4467 = vmatprep.mubr.bf16.mxu0 %v13034_v13  ;;  %8201 = vmatpush3.bf16.msra.mxu1 %v9045_v55 }
 0x2f1   :  { %8202 = vmatprep.subr.bf16.mxu1 %v9046_v32 }
 0x2f4   :  { %8203 = vmatpush3.bf16.msra.mxu1 %v9047_v34 }
 0x2f6   :  { %3666 = vmatmul.mubr.bf16.gmra.mxu1 %v13036_v49 }
 0x2f7   :  { %4468 = vmatmul.mubr.bf16.gmra.mxu0 %v4270_v4  ;;  %3673 = vmatprep.mubr.bf16.mxu1 %v13037_v44 }
 0x2f8   :  { %4475 = vmatprep.mubr.bf16.mxu0 %v4273_v40 }
 0x2fc   :  { %v7840_v6 = vpop.f32.mrf.mxu1 }
 0x2fd   :  { %v7944_v21 = vpop.f32.mrf.mxu0 }
 0x2fe   :  { %3674 = vmatmul.mubr.bf16.gmra.mxu1 %v13038_v27  ;;  %v7841_v45 = vpop.f32.mrf.mxu1 }
 0x2ff   :  { %4476 = vmatmul.mubr.bf16.gmra.mxu0 %v4272_v42  ;;  %4201 = vmatprep.mubr.bf16.mxu1 %v13039_v10  ;;  %v11726_v59 = vadd.f32 %v7841_v45, %v7840_v6  ;;  %v7945_v52 = vpop.f32.mrf.mxu0 }
 0x300   :  { %v11728_v63 = vadd.f32 %v7945_v52, %v7944_v21  ;;  %v7843_v16 = vpop.f32.mrf.mxu1  ;;  %v9048_v52 = vld [vmem:[%s13042_s24 + $0x78] sm:$0xff]  }
 0x301   :  { %v11730_v7 = vpop.f32.mrf.mxu0 }
 0x302   :  { %v7844_v25 = vpop.f32.mrf.mxu1 }
 0x303   :  { %v11732_v39 = vadd.f32 %v7844_v25, %v7843_v16  ;;  %v11734_v61 = vpop.f32.mrf.mxu0  ;;  %v9338_v25 = vmov 0.0  }
 0x304   :  { %8454 = vmatprep.subr.bf16.mxu1 %v9338_v25  ;;  %8482 = vmatprep.subr.bf16.mxu0 %v9338_v25 }
 0x305   :  { %v7846_v57 = vpop.f32.mrf.mxu1  ;;  %v7950_v51 = vpop.f32.mrf.mxu0  ;;  %8498 = vmatprep.mubr.msk.bf16.mxu0 %vm9339_vm5, %v9338_v25 }
 0x306   :  { %4202 = vmatmul.mubr.bf16.vlgmr.msra.gmra.mxu1 %v11375_v50 }
 0x307   :  { %4209 = vmatprep.mubr.bf16.mxu1 %v13040_v17  ;;  %v7847_v60 = vpop.f32.mrf.mxu1  ;;  %v7951_v0 = vpop.f32.mrf.mxu0  ;;  %8455 = vmatpush3.bf16.msra.mxu1 %v9048_v52 }
 0x308   :  { %v11738_v33 = vadd.f32 %v7847_v60, %v7846_v57  ;;  %v11740_v35 = vadd.f32 %v7951_v0, %v7950_v51  ;;  %8456 = vmatprep.subr.bf16.mxu1 %v9338_v25 }
 0x309   :  { %v7849_v46 = vpop.f32.mrf.mxu1  ;;  %v11742_v12 = vpop.f32.mrf.mxu0 }
 0x30b   :  { %v7850_v11 = vpop.f32.mrf.mxu1  ;;  %v11746_v36 = vpop.f32.mrf.mxu0 }
 0x30c   :  { %v11744_v22 = vadd.f32 %v7850_v11, %v7849_v46 }
 0x30d   :  { %v7852_v50 = vpop.f32.mrf.mxu1 }
 0x30e   :  { %4210 = vmatmul.mubr.bf16.gmra.mxu1 %v13041_v47  ;;  %v7956_v53 = vpop.f32.mrf.mxu0 }
 0x30f   :  { %4217 = vmatprep.mubr.bf16.mxu1 %v11378_v29  ;;  %v7853_v20 = vpop.f32.mrf.mxu1 }
 0x310   :  { %v11750_v62 = vadd.f32 %v7853_v20, %v7852_v50  ;;  %v7957_v19 = vpop.f32.mrf.mxu0  ;;  %v7949_v20 = vadd.f32 %v11734_v61, %v11730_v7 }
 0x311   :  { %v11752_v58 = vadd.f32 %v7957_v19, %v7956_v53  ;;  %v11754_v28 = vpop.f32.mrf.mxu1 }
 0x312   :  { %v11756_v3 = vpop.f32.mrf.mxu0 }
 0x313   :  { %v11758_v41 = vpop.f32.mrf.mxu1 }
 0x314   :  { %v11760_v15 = vpop.f32.mrf.mxu0 }
 0x315   :  { %v7858_v55 = vpop.f32.mrf.mxu1 }
 0x316   :  { %4218 = vmatmul.mubr.bf16.gmra.mxu1 %v11381_v56  ;;  %v7962_v29 = vpop.f32.mrf.mxu0 }
 0x317   :  { %4225 = vmatprep.mubr.bf16.mxu1 %v11391_v54  ;;  %v7859_v23 = vpop.f32.mrf.mxu1 }
 0x318   :  { %v11764_v5 = vadd.f32 %v7859_v23, %v7858_v55  ;;  %v7963_v14 = vpop.f32.mrf.mxu0 }
 0x319   :  { %v11766_v43 = vadd.f32 %v7963_v14, %v7962_v29  ;;  %v11770_v37 = vpop.f32.mrf.mxu1 }
 0x31a   :  { %v11772_v38 = vpop.f32.mrf.mxu0 }
 0x31b   :  { %v11774_v32 = vpop.f32.mrf.mxu1 }
 0x31c   :  { %v11776_v56 = vpop.f32.mrf.mxu0 }
 0x31e   :  { %4226 = vmatmul.mubr.bf16.gmra.mxu1 %v11397_v18 }
 0x31f   :  { %4233 = vmatprep.mubr.bf16.mxu1 %v11418_v30 }
 0x326   :  { %v7864_v54 = vpop.f32.mrf.mxu1  ;;  %4234 = vmatmul.mubr.bf16.gmra.mxu1 %v11422_v2  ;;  %v7968_v31 = vpop.f32.mrf.mxu0 }
 0x327   :  { %4241 = vmatprep.mubr.bf16.mxu1 %v11403_v9 }
 0x328   :  { %v7865_v26 = vpop.f32.mrf.mxu1  ;;  %v7969_v18 = vpop.f32.mrf.mxu0 }
 0x329   :  { %v11780_v13 = vadd.f32 %v7865_v26, %v7864_v54  ;;  %v11782_v34 = vadd.f32 %v7969_v18, %v7968_v31  ;;  %v9051_v26 = vld [vmem:[%s13042_s24 + $0x68] sm:$0xff]  }
 0x32a   :  { %v11784_v30 = vpop.f32.mrf.mxu1  ;;  %v11786_v48 = vpop.f32.mrf.mxu0 }
 0x32c   :  { %v11788_v8 = vpop.f32.mrf.mxu1  ;;  %v11790_v4 = vpop.f32.mrf.mxu0 }
 0x32e   :  { %v7870_v49 = vpop.f32.mrf.mxu1  ;;  %4242 = vmatmul.mubr.bf16.gmra.mxu1 %v11405_v1  ;;  %v7974_v2 = vpop.f32.mrf.mxu0 }
 0x32f   :  { %8470 = vmatprep.mubr.msk.bf16.mxu1 %vm9339_vm5, %v9338_v25 }
 0x330   :  { %v7871_v40 = vpop.f32.mrf.mxu1  ;;  %v7975_v44 = vpop.f32.mrf.mxu0 }
 0x331   :  { %v11793_v9 = vadd.f32 %v7871_v40, %v7870_v49  ;;  %v11795_v24 = vadd.f32 %v7975_v44, %v7974_v2 }
 0x332   :  { %v7873_v42 = vpop.f32.mrf.mxu1  ;;  %v7977_v27 = vpop.f32.mrf.mxu0 }
 0x333   :  { %v7955_v42 = vadd.f32 %v11746_v36, %v11742_v12  ;;  %v7857_v12 = vadd.f32 %v11758_v41, %v11754_v28 }
 0x334   :  { %v7874_v6 = vpop.f32.mrf.mxu1  ;;  %v7978_v10 = vpop.f32.mrf.mxu0 }
 0x336   :  { %v7892_v21 = vpop.f32.mrf.mxu1  ;;  %v8048_v45 = vpop.f32.mrf.mxu0 }
 0x338   :  { %v7893_v16 = vpop.f32.mrf.mxu1  ;;  %v8049_v57 = vpop.f32.mrf.mxu0 }
 0x339   :  { %v7894_v1 = vadd.f32 %v7893_v16, %v7892_v21  ;;  %v11802_v17 = vadd.f32 %v8049_v57, %v8048_v45 }
 0x33a   :  { %v7895_v51 = vpop.f32.mrf.mxu1  ;;  %v11806_v0 = vpop.f32.mrf.mxu0 }
 0x33b   :  { %v2545_v60 = vadd.f32 %v7894_v1, %v11726_v59  ;;  %v9049_v59 = vld [vmem:[%s13042_s24 + $0x70] sm:$0xff]  }
 0x33c   :  { %v7896_v46 = vpop.f32.mrf.mxu1  ;;  %v11808_v47 = vpop.f32.mrf.mxu0  ;;  %8457 = vmatpush3.bf16.msra.mxu1 %v9049_v59 }
 0x33d   :  { %v7897_v11 = vadd.f32 %v7896_v46, %v7895_v51  ;;  %v11811_v50 = vadd.f32 %v11728_v63, %v2545_v60  ;;  %8458 = vmatprep.subr.bf16.mxu1 %v9338_v25 }
 0x33e   :  { %v7898_v53 = vpop.f32.mrf.mxu1 }
 0x33f   :  { %v2548_v19 = vadd.f32 %v7897_v11, %v11732_v39  ;;  %v8054_v55 = vpop.f32.mrf.mxu0  ;;  %v9050_v39 = vld [vmem:[%s13042_s24 + $0x38] sm:$0xff]   ;;  %v7961_v11 = vadd.f32 %v11760_v15, %v11756_v3  ;;  %v9054_v3 = vld [vmem:[%s13042_s24 + $0x28] sm:$0xff]  }
 0x340   :  { %v7899_v29 = vpop.f32.mrf.mxu1  ;;  %8483 = vmatpush3.bf16.msra.mxu0 %v9050_v39  ;;  %8459 = vmatpush3.bf16.msra.mxu1 %v9051_v26  ;;  %v7967_v26 = vadd.f32 %v11776_v56, %v11772_v38 }
 0x341   :  { %v7900_v23 = vadd.f32 %v7899_v29, %v7898_v53  ;;  %v8055_v14 = vpop.f32.mrf.mxu0  ;;  %v11819_v54 = vadd.f32 %v7949_v20, %v2548_v19  ;;  %8484 = vmatprep.subr.bf16.mxu0 %v9338_v25  ;;  %8460 = vmatprep.subr.bf16.mxu1 %v9338_v25 }
 0x342   :  { %v11821_v31 = vadd.f32 %v8055_v14, %v8054_v55  ;;  %v7901_v63 = vpop.f32.mrf.mxu1  ;;  %v7863_v14 = vadd.f32 %v11774_v32, %v11770_v37  ;;  %v9055_v37 = vld [vmem:[%s13042_s24 + $0x20] sm:$0xff]  }
 0x343   :  { %v2553_v7 = vadd.f32 %v7900_v23, %v11738_v33  ;;  %v11825_v61 = vpop.f32.mrf.mxu0  ;;  %v9052_v33 = vld [vmem:[%s13042_s24 + $0x30] sm:$0xff]  }
 0x344   :  { %v7902_v18 = vpop.f32.mrf.mxu1  ;;  %8485 = vmatpush3.bf16.msra.mxu0 %v9052_v33 }
 0x345   :  { %v7903_v49 = vadd.f32 %v7902_v18, %v7901_v63  ;;  %v11833_v2 = vpop.f32.mrf.mxu0  ;;  %v11836_v40 = vadd.f32 %v11740_v35, %v2553_v7  ;;  %8486 = vmatprep.subr.bf16.mxu0 %v9338_v25 }
 0x346   :  { %v7904_v44 = vpop.f32.mrf.mxu1 }
 0x347   :  { %v2556_v27 = vadd.f32 %v7903_v49, %v11744_v22  ;;  %v8060_v6 = vpop.f32.mrf.mxu0 }
 0x348   :  { %v7905_v10 = vpop.f32.mrf.mxu1  ;;  %8487 = vmatpush3.bf16.msra.mxu0 %v9054_v3 }
 0x349   :  { %v7906_v35 = vadd.f32 %v7905_v10, %v7904_v44  ;;  %v8061_v21 = vpop.f32.mrf.mxu0  ;;  %v11846_v45 = vadd.f32 %v7955_v42, %v2556_v27  ;;  %8488 = vmatprep.subr.bf16.mxu0 %v9338_v25  ;;  %v9057_v10 = vld [vmem:[%s13042_s24 + $0x18] sm:$0xff]  }
 0x34a   :  { %v11848_v52 = vadd.f32 %v8061_v21, %v8060_v6  ;;  %v7907_v16 = vpop.f32.mrf.mxu1  ;;  %v7869_v21 = vadd.f32 %v11788_v8, %v11784_v30  ;;  %v9059_v30 = vld [vmem:[%s13042_s24 + $0x10] sm:$0xff]  }
 0x34b   :  { %v2561_v1 = vadd.f32 %v7906_v35, %v11750_v62  ;;  %v11852_v57 = vpop.f32.mrf.mxu0 }
 0x34c   :  { %v7908_v51 = vpop.f32.mrf.mxu1  ;;  %8489 = vmatpush3.bf16.msra.mxu0 %v9055_v37 }
 0x34d   :  { %v7909_v22 = vadd.f32 %v7908_v51, %v7907_v16  ;;  %v11856_v36 = vpop.f32.mrf.mxu0  ;;  %v11859_v60 = vadd.f32 %v11752_v58, %v2561_v1  ;;  %v9053_v58 = vld [vmem:[%s13042_s24 + $0x60] sm:$0xff]   ;;  %8490 = vmatprep.subr.bf16.mxu0 %v9338_v25 }
 0x34e   :  { %v7910_v46 = vpop.f32.mrf.mxu1  ;;  %8461 = vmatpush3.bf16.msra.mxu1 %v9053_v58 }
 0x34f   :  { %v2564_v53 = vadd.f32 %v7909_v22, %v7857_v12  ;;  %v8066_v20 = vpop.f32.mrf.mxu0  ;;  %8462 = vmatprep.subr.bf16.mxu1 %v9338_v25 }
 0x350   :  { %v7911_v19 = vpop.f32.mrf.mxu1  ;;  %8491 = vmatpush3.bf16.msra.mxu0 %v9057_v10 }
 0x351   :  { %v7912_v62 = vadd.f32 %v7911_v19, %v7910_v46  ;;  %v8067_v55 = vpop.f32.mrf.mxu0  ;;  %v11863_v59 = vadd.f32 %v7961_v11, %v2564_v53  ;;  %8492 = vmatprep.subr.bf16.mxu0 %v9338_v25  ;;  %v9058_v11 = vld [vmem:[%s13042_s24 + $0x50] sm:$0xff]  }
 0x352   :  { %v11865_v29 = vadd.f32 %v8067_v55, %v8066_v20  ;;  %v7913_v28 = vpop.f32.mrf.mxu1  ;;  %v9060_v55 = vld [vmem:[%s13042_s24 + $0x8] sm:$0xff]  }
 0x353   :  { %v2569_v41 = vadd.f32 %v7912_v62, %v11764_v5  ;;  %v11868_v23 = vpop.f32.mrf.mxu0 }
 0x354   :  { %v7914_v15 = vpop.f32.mrf.mxu1  ;;  %8493 = vmatpush3.bf16.msra.mxu0 %v9059_v30 }
 0x355   :  { %v7915_v63 = vadd.f32 %v7914_v15, %v7913_v28  ;;  %v11878_v7 = vpop.f32.mrf.mxu0  ;;  %v11881_v39 = vadd.f32 %v11766_v43, %v2569_v41  ;;  %v9056_v43 = vld [vmem:[%s13042_s24 + $0x58] sm:$0xff]   ;;  %8494 = vmatprep.subr.bf16.mxu0 %v9338_v25  ;;  %v9061_v28 = vld [vmem:[%s13042_s24 + $0x48] sm:$0xff]  }
 0x356   :  { %v7916_v5 = vpop.f32.mrf.mxu1  ;;  %8463 = vmatpush3.bf16.msra.mxu1 %v9056_v43  ;;  %v9063_v43 = vld [vmem:[%s13042_s24 + $0x40] sm:$0xff]  }
 0x357   :  { %v2572_v18 = vadd.f32 %v7915_v63, %v7863_v14  ;;  %v8072_v49 = vpop.f32.mrf.mxu0  ;;  %8464 = vmatprep.subr.bf16.mxu1 %v9338_v25  ;;  %v9062_v14 = vld [vmem:[%s13042_s24] sm:$0xff]  }
 0x358   :  { %v7917_v32 = vpop.f32.mrf.mxu1  ;;  %8495 = vmatpush3.bf16.msra.mxu0 %v9060_v55 }
 0x359   :  { %v7918_v33 = vadd.f32 %v7917_v32, %v7916_v5  ;;  %v8073_v44 = vpop.f32.mrf.mxu0  ;;  %v11893_v42 = vadd.f32 %v7967_v26, %v2572_v18  ;;  %8496 = vmatprep.subr.bf16.mxu0 %v9338_v25 }
 0x35a   :  { %v11895_v27 = vadd.f32 %v8073_v44, %v8072_v49  ;;  %v7919_v38 = vpop.f32.mrf.mxu1  ;;  %8465 = vmatpush3.bf16.msra.mxu1 %v9058_v11 }
 0x35b   :  { %v2577_v56 = vadd.f32 %v7918_v33, %v11780_v13  ;;  %v11900_v6 = vpop.f32.mrf.mxu0  ;;  %v7973_v13 = vadd.f32 %v11790_v4, %v11786_v48  ;;  %8466 = vmatprep.subr.bf16.mxu1 %v9338_v25 }
 0x35c   :  { %v7920_v35 = vpop.f32.mrf.mxu1  ;;  %8497 = vmatpush3.bf16.msra.mxu0 %v9062_v14 }
 0x35d   :  { %v7921_v16 = vadd.f32 %v7920_v35, %v7919_v38  ;;  %v11907_v1 = vpop.f32.mrf.mxu0  ;;  %v11910_v51 = vadd.f32 %v11782_v34, %v2577_v56  ;;  %8538 = vmatprep.subr.bf16.mxu0 %v9338_v25  ;;  %v8053_v56 = vadd.f32 %v11808_v47, %v11806_v0 }
 0x35e   :  { %v7922_v12 = vpop.f32.mrf.mxu1  ;;  %8467 = vmatpush3.bf16.msra.mxu1 %v9061_v28 }
 0x35f   :  { %v2580_v22 = vadd.f32 %v7921_v16, %v7869_v21  ;;  %v8078_v46 = vpop.f32.mrf.mxu0  ;;  %8468 = vmatprep.subr.bf16.mxu1 %v9338_v25 }
 0x360   :  { %v7923_v8 = vpop.f32.mrf.mxu1 }
 0x361   :  { %v7924_v34 = vadd.f32 %v7923_v8, %v7922_v12  ;;  %v8079_v53 = vpop.f32.mrf.mxu0  ;;  %v11921_v20 = vadd.f32 %v7973_v13, %v2580_v22 }
 0x362   :  { %v11923_v19 = vadd.f32 %v8079_v53, %v8078_v46  ;;  %v7925_v48 = vpop.f32.mrf.mxu1  ;;  %8469 = vmatpush3.bf16.msra.mxu1 %v9063_v43 }
 0x363   :  { %v2585_v4 = vadd.f32 %v7924_v34, %v11793_v9  ;;  %v8081_v62 = vpop.f32.mrf.mxu0  ;;  %8510 = vmatprep.subr.bf16.mxu1 %v9338_v25 }
 0x364   :  { %v7926_v41 = vpop.f32.mrf.mxu1 }
 0x365   :  { %v8082_v58 = vpop.f32.mrf.mxu0  ;;  %v11935_v3 = vadd.f32 %v11795_v24, %v2585_v4 }
 0x366   :  { %v7996_v15 = vpop.f32.mrf.mxu1 }
 0x367   :  { %v8152_v9 = vpop.f32.mrf.mxu0 }
 0x368   :  { %v7997_v63 = vpop.f32.mrf.mxu1 }
 0x369   :  { %v7998_v5 = vadd.f32 %v7997_v63, %v7996_v15  ;;  %v8153_v26 = vpop.f32.mrf.mxu0 }
 0x36a   :  { %v11942_v18 = vadd.f32 %v8153_v26, %v8152_v9  ;;  %v7999_v24 = vpop.f32.mrf.mxu1 }
 0x36b   :  { %v3148_v49 = vadd.f32 %v7998_v5, %v11811_v50  ;;  %v11946_v37 = vpop.f32.mrf.mxu0 }
 0x36c   :  { %v8000_v32 = vpop.f32.mrf.mxu1 }
 0x36d   :  { %v8001_v33 = vadd.f32 %v8000_v32, %v7999_v24  ;;  %v11955_v44 = vpop.f32.mrf.mxu0  ;;  %v11958_v38 = vadd.f32 %v11802_v17, %v3148_v49 }
 0x36e   :  { %v8002_v50 = vpop.f32.mrf.mxu1 }
 0x36f   :  { %v3149_v10 = vadd.f32 %v8001_v33, %v11819_v54  ;;  %v8158_v35 = vpop.f32.mrf.mxu0  ;;  %v8059_v54 = vadd.f32 %v11833_v2, %v11825_v61 }
 0x370   :  { %v8003_v21 = vpop.f32.mrf.mxu1 }
 0x371   :  { %v8004_v16 = vadd.f32 %v8003_v21, %v8002_v50  ;;  %v8159_v12 = vpop.f32.mrf.mxu0  ;;  %v11964_v13 = vadd.f32 %v8053_v56, %v3149_v10 }
 0x372   :  { %v11966_v22 = vadd.f32 %v8159_v12, %v8158_v35  ;;  %v8005_v46 = vpop.f32.mrf.mxu1 }
 0x373   :  { %v3150_v17 = vadd.f32 %v8004_v16, %v11836_v40  ;;  %v11969_v11 = vpop.f32.mrf.mxu0 }
 0x374   :  { %v8006_v30 = vpop.f32.mrf.mxu1 }
 0x375   :  { %v8007_v8 = vadd.f32 %v8006_v30, %v8005_v46  ;;  %v11971_v34 = vpop.f32.mrf.mxu0  ;;  %v11974_v0 = vadd.f32 %v11821_v31, %v3150_v17 }
 0x376   :  { %v8008_v47 = vpop.f32.mrf.mxu1 }
 0x377   :  { %v3151_v53 = vadd.f32 %v8007_v8, %v11846_v45  ;;  %v8164_v48 = vpop.f32.mrf.mxu0  ;;  %v8065_v45 = vadd.f32 %v11856_v36, %v11852_v57 }
 0x378   :  { %v8009_v4 = vpop.f32.mrf.mxu1 }
 0x379   :  { %v8010_v62 = vadd.f32 %v8009_v4, %v8008_v47  ;;  %v8165_v55 = vpop.f32.mrf.mxu0  ;;  %v11979_v40 = vadd.f32 %v8059_v54, %v3151_v53 }
 0x37a   :  { %v11981_v28 = vadd.f32 %v8165_v55, %v8164_v48  ;;  %v8011_v41 = vpop.f32.mrf.mxu1 }
 0x37b   :  { %v3152_v58 = vadd.f32 %v8010_v62, %v11859_v60  ;;  %v11984_v15 = vpop.f32.mrf.mxu0 }
 0x37c   :  { %v8012_v31 = vpop.f32.mrf.mxu1 }
 0x37d   :  { %v8013_v9 = vadd.f32 %v8012_v31, %v8011_v41  ;;  %v11986_v14 = vpop.f32.mrf.mxu0  ;;  %v11989_v61 = vadd.f32 %v11848_v52, %v3152_v58 }
 0x37e   :  { %v8014_v2 = vpop.f32.mrf.mxu1 }
 0x37f   :  { %v3153_v63 = vadd.f32 %v8013_v9, %v11863_v59  ;;  %v8170_v5 = vpop.f32.mrf.mxu0  ;;  %v8071_v59 = vadd.f32 %v11878_v7, %v11868_v23 }
 0x380   :  { %v8015_v26 = vpop.f32.mrf.mxu1 }
 0x381   :  { %v8016_v24 = vadd.f32 %v8015_v26, %v8014_v2  ;;  %v8171_v49 = vpop.f32.mrf.mxu0  ;;  %v11994_v60 = vadd.f32 %v8065_v45, %v3153_v63 }
 0x382   :  { %v11996_v43 = vadd.f32 %v8171_v49, %v8170_v5  ;;  %v8017_v32 = vpop.f32.mrf.mxu1 }
 0x383   :  { %v3154_v33 = vadd.f32 %v8016_v24, %v11881_v39  ;;  %v11999_v50 = vpop.f32.mrf.mxu0 }
 0x384   :  { %v8018_v52 = vpop.f32.mrf.mxu1 }
 0x385   :  { %v8019_v56 = vadd.f32 %v8018_v52, %v8017_v32  ;;  %v12001_v10 = vpop.f32.mrf.mxu0  ;;  %v12004_v57 = vadd.f32 %v11865_v29, %v3154_v33 }
 0x386   :  { %v8020_v36 = vpop.f32.mrf.mxu1 }
 0x387   :  { %v3155_v35 = vadd.f32 %v8019_v56, %v11893_v42  ;;  %v8176_v21 = vpop.f32.mrf.mxu0  ;;  %v8077_v42 = vadd.f32 %v11907_v1, %v11900_v6 }
 0x388   :  { %v8021_v16 = vpop.f32.mrf.mxu1 }
 0x389   :  { %v8022_v12 = vadd.f32 %v8021_v16, %v8020_v36  ;;  %v8177_v46 = vpop.f32.mrf.mxu0  ;;  %v12009_v39 = vadd.f32 %v8071_v59, %v3155_v35  ;;  %v8157_v59 = vadd.f32 %v11955_v44, %v11946_v37 }
 0x38a   :  { %v12011_v17 = vadd.f32 %v8177_v46, %v8176_v21  ;;  %v8023_v30 = vpop.f32.mrf.mxu1 }
 0x38b   :  { %v3156_v8 = vadd.f32 %v8022_v12, %v11910_v51  ;;  %v8179_v47 = vpop.f32.mrf.mxu0 }
 0x38c   :  { %v8024_v29 = vpop.f32.mrf.mxu1 }
 0x38d   :  { %v8025_v54 = vadd.f32 %v8024_v29, %v8023_v30  ;;  %v8180_v53 = vpop.f32.mrf.mxu0  ;;  %v12015_v48 = vadd.f32 %v11895_v27, %v3156_v8 }
 0x38e   :  { %v12017_v23 = vadd.f32 %v8180_v53, %v8179_v47  ;;  %v8026_v7 = vpop.f32.mrf.mxu1 }
 0x38f   :  { %v3157_v4 = vadd.f32 %v8025_v54, %v11921_v20  ;;  %v8182_v62 = vpop.f32.mrf.mxu0 }
 0x390   :  { %v8027_v55 = vpop.f32.mrf.mxu1 }
 0x391   :  { %v8028_v41 = vadd.f32 %v8027_v55, %v8026_v7  ;;  %v8183_v58 = vpop.f32.mrf.mxu0  ;;  %v12022_v51 = vadd.f32 %v8077_v42, %v3157_v4 }
 0x392   :  { %v12024_v31 = vadd.f32 %v8183_v58, %v8182_v62  ;;  %v8029_v9 = vpop.f32.mrf.mxu1 }
 0x393   :  { %v3158_v27 = vadd.f32 %v8028_v41, %v11935_v3  ;;  %v8185_v2 = vpop.f32.mrf.mxu0 }
 0x394   :  { %v8030_v45 = vpop.f32.mrf.mxu1 }
 0x395   :  { %v8186_v63 = vpop.f32.mrf.mxu0  ;;  %v12028_v5 = vadd.f32 %v11923_v19, %v3158_v27 }
 0x396   :  { %v8100_v6 = vpop.f32.mrf.mxu1 }
 0x397   :  { %v12030_v1 = vpop.f32.mrf.mxu0 }
 0x398   :  { %v8101_v20 = vpop.f32.mrf.mxu1 }
 0x399   :  { %v8102_v26 = vadd.f32 %v8101_v20, %v8100_v6  ;;  %v12032_v24 = vpop.f32.mrf.mxu0 }
 0x39a   :  { %v8103_v49 = vpop.f32.mrf.mxu1 }
 0x39b   :  { %v3681_v32 = vadd.f32 %v8102_v26, %v11958_v38  ;;  %v12035_v33 = vpop.f32.mrf.mxu0 }
 0x39c   :  { %v8104_v52 = vpop.f32.mrf.mxu1 }
 0x39d   :  { %v8105_v3 = vadd.f32 %v8104_v52, %v8103_v49  ;;  %v12037_v56 = vpop.f32.mrf.mxu0  ;;  %v12040_v36 = vadd.f32 %v11942_v18, %v3681_v32 }
 0x39e   :  { %v8106_v19 = vpop.f32.mrf.mxu1 }
 0x39f   :  { %v3682_v35 = vadd.f32 %v8105_v3, %v11964_v13  ;;  %v12045_v21 = vpop.f32.mrf.mxu0  ;;  %v8163_v13 = vadd.f32 %v11971_v34, %v11969_v11 }
 0x3a0   :  { %v8107_v16 = vpop.f32.mrf.mxu1 }
 0x3a1   :  { %v8108_v12 = vadd.f32 %v8107_v16, %v8106_v19  ;;  %v12047_v38 = vpop.f32.mrf.mxu0  ;;  %v12049_v46 = vadd.f32 %v8157_v59, %v3682_v35 }
 0x3a2   :  { %v8109_v30 = vpop.f32.mrf.mxu1 }
 0x3a3   :  { %v3683_v8 = vadd.f32 %v8108_v12, %v11974_v0  ;;  %v12052_v47 = vpop.f32.mrf.mxu0 }
 0x3a4   :  { %v8110_v18 = vpop.f32.mrf.mxu1 }
 0x3a5   :  { %v8111_v29 = vadd.f32 %v8110_v18, %v8109_v30  ;;  %v12054_v54 = vpop.f32.mrf.mxu0  ;;  %v12057_v37 = vadd.f32 %v11966_v22, %v3683_v8 }
 0x3a6   :  { %v8112_v44 = vpop.f32.mrf.mxu1 }
 0x3a7   :  { %v3684_v53 = vadd.f32 %v8111_v29, %v11979_v40  ;;  %v12062_v7 = vpop.f32.mrf.mxu0  ;;  %v8169_v40 = vadd.f32 %v11986_v14, %v11984_v15 }
 0x3a8   :  { %v8113_v42 = vpop.f32.mrf.mxu1 }
 0x3a9   :  { %v8114_v4 = vadd.f32 %v8113_v42, %v8112_v44  ;;  %v12064_v0 = vpop.f32.mrf.mxu0  ;;  %v12066_v62 = vadd.f32 %v8163_v13, %v3684_v53 }
 0x3aa   :  { %v8115_v55 = vpop.f32.mrf.mxu1 }
 0x3ab   :  { %v3685_v41 = vadd.f32 %v8114_v4, %v11989_v61  ;;  %v12069_v58 = vpop.f32.mrf.mxu0 }
 0x3ac   :  { %v8116_v22 = vpop.f32.mrf.mxu1 }
 0x3ad   :  { %v8117_v9 = vadd.f32 %v8116_v22, %v8115_v55  ;;  %v12071_v27 = vpop.f32.mrf.mxu0  ;;  %v12074_v11 = vadd.f32 %v11981_v28, %v3685_v41 }
 0x3ae   :  { %v8118_v34 = vpop.f32.mrf.mxu1 }
 0x3af   :  { %v3686_v2 = vadd.f32 %v8117_v9, %v11994_v60  ;;  %v12079_v45 = vpop.f32.mrf.mxu0  ;;  %v8175_v60 = vadd.f32 %v12001_v10, %v11999_v50 }
 0x3b0   :  { %v8119_v63 = vpop.f32.mrf.mxu1 }
 0x3b1   :  { %v8120_v6 = vadd.f32 %v8119_v63, %v8118_v34  ;;  %v12081_v61 = vpop.f32.mrf.mxu0  ;;  %v12083_v20 = vadd.f32 %v8169_v40, %v3686_v2 }
 0x3b2   :  { %v8121_v26 = vpop.f32.mrf.mxu1 }
 0x3b3   :  { %v3687_v49 = vadd.f32 %v8120_v6, %v12004_v57  ;;  %v12086_v32 = vpop.f32.mrf.mxu0  ;;  %v8258_v6 = vadd.f32 %v12032_v24, %v12030_v1  ;;  %v8264_v24 = vadd.f32 %v12047_v38, %v12045_v21 }
 0x3b4   :  { %v8122_v28 = vpop.f32.mrf.mxu1 }
 0x3b5   :  { %v8123_v52 = vadd.f32 %v8122_v28, %v8121_v26  ;;  %v12088_v3 = vpop.f32.mrf.mxu0  ;;  %v12091_v15 = vadd.f32 %v11996_v43, %v3687_v49 }
 0x3b6   :  { %v8124_v14 = vpop.f32.mrf.mxu1 }
 0x3b7   :  { %v3688_v19 = vadd.f32 %v8123_v52, %v12009_v39  ;;  %v12096_v59 = vpop.f32.mrf.mxu0 }
 0x3b8   :  { %v8125_v35 = vpop.f32.mrf.mxu1 }
 0x3b9   :  { %v8126_v16 = vadd.f32 %v8125_v35, %v8124_v14  ;;  %v12098_v57 = vpop.f32.mrf.mxu0  ;;  %v12100_v12 = vadd.f32 %v8175_v60, %v3688_v19  ;;  %v8261_v14 = vadd.f32 %v12037_v56, %v12035_v33 }
 0x3ba   :  { %v8127_v30 = vpop.f32.mrf.mxu1 }
 0x3bb   :  { %v3689_v8 = vadd.f32 %v8126_v16, %v12015_v48  ;;  %v12103_v18 = vpop.f32.mrf.mxu0 }
 0x3bc   :  { %v8128_v43 = vpop.f32.mrf.mxu1 }
 0x3bd   :  { %v8129_v29 = vadd.f32 %v8128_v43, %v8127_v30  ;;  %v12105_v44 = vpop.f32.mrf.mxu0  ;;  %v12108_v50 = vadd.f32 %v12011_v17, %v3689_v8 }
 0x3be   :  { %v8130_v10 = vpop.f32.mrf.mxu1 }
 0x3bf   :  { %v3690_v39 = vadd.f32 %v8129_v29, %v12022_v51  ;;  %v12111_v13 = vpop.f32.mrf.mxu0 }
 0x3c0   :  { %v8131_v53 = vpop.f32.mrf.mxu1 }
 0x3c1   :  { %v8132_v42 = vadd.f32 %v8131_v53, %v8130_v10  ;;  %v12113_v4 = vpop.f32.mrf.mxu0  ;;  %v12116_v48 = vadd.f32 %v12017_v23, %v3690_v39  ;;  %v12125_v23 = vld [vmem:[#allocation7] ss:$0 sm:$0xff]  ;;  %v8267_v39 = vadd.f32 %v12054_v54, %v12052_v47  ;;  %v8270_v47 = vadd.f32 %v12064_v0, %v12062_v7 }
 0x3c2   :  { %v8133_v55 = vpop.f32.mrf.mxu1  ;;  %v8273_v7 = vadd.f32 %v12071_v27, %v12069_v58  ;;  %v9065_v58 = vld [vmem:[%s13042_s24 + $0xb8] sm:$0xff]   ;;  %v8276_v27 = vadd.f32 %v12081_v61, %v12079_v45  ;;  %v8279_v45 = vadd.f32 %v12088_v3, %v12086_v32 }
 0x3c3   :  { %v3691_v41 = vadd.f32 %v8132_v42, %v12028_v5  ;;  %v8289_v22 = vpop.f32.mrf.mxu0  ;;  %v9072_v32 = vld [vmem:[%s13042_s24 + $0xd8] sm:$0xff]  }
 0x3c4   :  { %v8134_v9 = vpop.f32.mrf.mxu1 }
 0x3c5   :  { %v8290_v34 = vpop.f32.mrf.mxu0  ;;  %v12120_v17 = vadd.f32 %v12024_v31, %v3691_v41  ;;  %v9066_v9 = vld [vmem:[%s13042_s24 + $0xf0] sm:$0xff]  }
 0x3c6   :  { %v8204_v40 = vpop.f32.mrf.mxu1 }
 0x3c8   :  { %v8205_v51 = vpop.f32.mrf.mxu1 }
 0x3c9   :  { %v8206_v2 = vadd.f32 %v8205_v51, %v8204_v40 }
 0x3ca   :  { %v8207_v63 = vpop.f32.mrf.mxu1 }
 0x3cb   :  { %v4249_v26 = vadd.f32 %v8206_v2, %v12040_v36 }
 0x3cc   :  { %v8208_v49 = vpop.f32.mrf.mxu1 }
 0x3cd   :  { %v4483_v28 = vadd.f32 %v8258_v6, %v4249_v26  ;;  %v8209_v5 = vadd.f32 %v8208_v49, %v8207_v63  ;;  %v9068_v6 = vld [vmem:[%s13042_s24 + $0xe8] sm:$0xff]  }
 0x3ce   :  { %v8210_v52 = vpop.f32.mrf.mxu1 }
 0x3cf   :  { %v4501_v31 = vadd.f32 %v12125_v23, %v4483_v28  ;;  %v4250_v60 = vadd.f32 %v8209_v5, %v12049_v46  ;;  %v9064_v46 = vld [vmem:[%s13042_s24 + $0xf8] sm:$0xff]  }
 0x3d0   :  { %v8211_v19 = vpop.f32.mrf.mxu1 }
 0x3d1   :  { %v4512_v35 = vmax.f32 %v4501_v31, 0.0  ;;  %v4484_v16 = vadd.f32 %v8261_v14, %v4250_v60  ;;  %v8212_v30 = vadd.f32 %v8211_v19, %v8210_v52 }
 0x3d2   :  { %v8213_v1 = vpop.f32.mrf.mxu1 }
 0x3d3   :  { %4523 = vst [vmem:[#allocation3] sm:$0xff] %v4512_v35  ;;  %v4502_v36 = vadd.f32 %v12125_v23, %v4484_v16  ;;  %v4251_v8 = vadd.f32 %v8212_v30, %v12057_v37  ;;  %v9070_v16 = vld [vmem:[%s13042_s24 + $0xe0] sm:$0xff]  }
 0x3d4   :  { %v8214_v43 = vpop.f32.mrf.mxu1 }
 0x3d5   :  { %v4513_v29 = vmax.f32 %v4502_v36, 0.0  ;;  %v4485_v33 = vadd.f32 %v8264_v24, %v4251_v8  ;;  %v8215_v56 = vadd.f32 %v8214_v43, %v8213_v1 }
 0x3d6   :  { %v8216_v10 = vpop.f32.mrf.mxu1 }
 0x3d7   :  { %4524 = vst [vmem:[#allocation3 + $0x8] sm:$0xff] %v4513_v29  ;;  %v4503_v21 = vadd.f32 %v12125_v23, %v4485_v33  ;;  %v4252_v38 = vadd.f32 %v8215_v56, %v12066_v62  ;;  %v4540_v53 = vpack.c.bf16 %v4513_v29, %v4512_v35 }
 0x3d8   :  { %v8217_v42 = vpop.f32.mrf.mxu1 }
 0x3d9   :  { %v4514_v37 = vmax.f32 %v4503_v21, 0.0  ;;  %v4486_v55 = vadd.f32 %v8267_v39, %v4252_v38  ;;  %v8218_v41 = vadd.f32 %v8217_v42, %v8216_v10  ;;  %8499 = vmatmul.mubr.bf16.vlgmr.msra.gmra.mxu0 %v4540_v53  ;;  %v9069_v38 = vld [vmem:[%s13042_s24 + $0xa8] sm:$0xff]  }
 0x3da   :  { %v8219_v22 = vpop.f32.mrf.mxu1  ;;  %8539 = vmatpush3.bf16.msra.mxu0 %v9064_v46  ;;  %8502 = vmatprep.mubr.msk.bf16.mxu0 %vm9339_vm5, %v9338_v25  ;;  %v8282_v46 = vadd.f32 %v12098_v57, %v12096_v59  ;;  %v9074_v59 = vld [vmem:[%s13042_s24 + $0xd0] sm:$0xff]  }
 0x3db   :  { %4525 = vst [vmem:[#allocation3 + $0x10] sm:$0xff] %v4514_v37  ;;  %v4504_v54 = vadd.f32 %v12125_v23, %v4486_v55  ;;  %v4253_v62 = vadd.f32 %v8218_v41, %v12074_v11  ;;  %8540 = vmatprep.subr.bf16.mxu0 %v9338_v25 }
 0x3dc   :  { %v8220_v34 = vpop.f32.mrf.mxu1 }
 0x3dd   :  { %v4515_v40 = vmax.f32 %v4504_v54, 0.0  ;;  %v4487_v51 = vadd.f32 %v8270_v47, %v4253_v62  ;;  %v8221_v2 = vadd.f32 %v8220_v34, %v8219_v22  ;;  %v8285_v54 = vadd.f32 %v12105_v44, %v12103_v18 }
 0x3de   :  { %v8222_v63 = vpop.f32.mrf.mxu1  ;;  %8541 = vmatpush3.bf16.msra.mxu0 %v9066_v9  ;;  %v4559_v31 = vld [vmem:[#allocation3 + $0x2] sm:$0xff]  ;;  %v8288_v18 = vadd.f32 %v12113_v4, %v12111_v13 }
 0x3df   :  { %4526 = vst [vmem:[#allocation3 + $0x18] sm:$0xff] %v4515_v40  ;;  %v4505_v0 = vadd.f32 %v12125_v23, %v4487_v51  ;;  %v4254_v11 = vadd.f32 %v8221_v2, %v12083_v20  ;;  %8542 = vmatprep.subr.bf16.mxu0 %v9338_v25  ;;  %v4541_v26 = vpack.c.bf16 %v4515_v40, %v4514_v37  ;;  %v9076_v40 = vld [vmem:[%s13042_s24 + $0xc8] sm:$0xff]   ;;  %v9078_v13 = vld [vmem:[%s13042_s24 + $0xc0] sm:$0xff]  }
 0x3e0   :  { %v8223_v49 = vpop.f32.mrf.mxu1 }
 0x3e1   :  { %v4516_v28 = vmax.f32 %v4505_v0, 0.0  ;;  %v4488_v5 = vadd.f32 %v8273_v7, %v4254_v11  ;;  %v8224_v52 = vadd.f32 %v8223_v49, %v8222_v63  ;;  %8503 = vmatmul.mubr.bf16.gmra.mxu0 %v4541_v26  ;;  %v9073_v0 = vld [vmem:[%s13042_s24 + $0x98] sm:$0xff]  }
 0x3e2   :  { %v8225_v14 = vpop.f32.mrf.mxu1  ;;  %v4560_v60 = vld [vmem:[#allocation3 + $0xa] sm:$0xff]  ;;  %8543 = vmatpush3.bf16.msra.mxu0 %v9068_v6  ;;  %8506 = vmatprep.mubr.msk.bf16.mxu0 %vm9339_vm5, %v9338_v25 }
 0x3e3   :  { %4527 = vst [vmem:[#allocation3 + $0x20] sm:$0xff] %v4516_v28  ;;  %v4506_v20 = vadd.f32 %v12125_v23, %v4488_v5  ;;  %v4255_v19 = vadd.f32 %v8224_v52, %v12091_v15  ;;  %v4565_v35 = vpack.c.bf16 %v4560_v60, %v4559_v31  ;;  %8544 = vmatprep.subr.bf16.mxu0 %v9338_v25  ;;  %v9067_v15 = vld [vmem:[%s13042_s24 + $0xb0] sm:$0xff]   ;;  %v9080_v31 = vld [vmem:[%s13042_s24 + $0x178] sm:$0xff]  }
 0x3e4   :  { %v8226_v30 = vpop.f32.mrf.mxu1 }
 0x3e5   :  { %v4517_v1 = vmax.f32 %v4506_v20, 0.0  ;;  %v4489_v24 = vadd.f32 %v8276_v27, %v4255_v19  ;;  %v8227_v36 = vadd.f32 %v8226_v30, %v8225_v14  ;;  %8471 = vmatmul.mubr.bf16.vlgmr.msra.gmra.mxu1 %v4565_v35  ;;  %v9079_v20 = vld [vmem:[%s13042_s24 + $0x80] sm:$0xff]   ;;  %v9084_v19 = vld [vmem:[%s13042_s24 + $0x168] sm:$0xff]   ;;  %v9081_v30 = vld [vmem:[%s13042_s24 + $0x138] sm:$0xff]  }
 0x3e6   :  { %8511 = vmatpush3.bf16.msra.mxu1 %v9065_v58  ;;  %v8228_v61 = vpop.f32.mrf.mxu1  ;;  %8474 = vmatprep.mubr.msk.bf16.mxu1 %vm9339_vm5, %v9338_v25  ;;  %v4561_v39 = vld [vmem:[#allocation3 + $0x12] sm:$0xff]  ;;  %v9077_v58 = vld [vmem:[%s13042_s24 + $0x88] sm:$0xff]  }
 0x3e7   :  { %4528 = vst [vmem:[#allocation3 + $0x28] sm:$0xff] %v4517_v1  ;;  %v4507_v8 = vadd.f32 %v12125_v23, %v4489_v24  ;;  %v4256_v43 = vadd.f32 %v8227_v36, %v12100_v12  ;;  %8512 = vmatprep.subr.bf16.mxu1 %v9338_v25  ;;  %8545 = vmatpush3.bf16.msra.mxu0 %v9070_v16  ;;  %v4796_v35 = vld [vmem:[#allocation3 + $0xc] sm:$0xff]  ;;  %v4795_v16 = vld [vmem:[#allocation3 + $0x4] sm:$0xff] }
 0x3e8   :  { %v4542_v29 = vpack.c.bf16 %v4517_v1, %v4516_v28  ;;  %v8229_v3 = vpop.f32.mrf.mxu1  ;;  %8546 = vmatprep.subr.bf16.mxu0 %v9338_v25  ;;  %v9086_v24 = vld [vmem:[%s13042_s24 + $0x160] sm:$0xff]  }
 0x3e9   :  { %v4518_v33 = vmax.f32 %v4507_v8, 0.0  ;;  %v4490_v56 = vadd.f32 %v8279_v45, %v4256_v43  ;;  %v8230_v10 = vadd.f32 %v8229_v3, %v8228_v61  ;;  %v9083_v45 = vld [vmem:[%s13042_s24 + $0x130] sm:$0xff]  }
 0x3ea   :  { %8507 = vmatmul.mubr.bf16.gmra.mxu0 %v4542_v29  ;;  %8513 = vmatpush3.bf16.msra.mxu1 %v9067_v15  ;;  %v8231_v12 = vpop.f32.mrf.mxu1  ;;  %v4562_v21 = vld [vmem:[#allocation3 + $0x1a] sm:$0xff] }
 0x3eb   :  { %8554 = vmatprep.mubr.msk.bf16.mxu0 %vm9339_vm5, %v9338_v25  ;;  %4529 = vst [vmem:[#allocation3 + $0x30] sm:$0xff] %v4518_v33  ;;  %v4508_v53 = vadd.f32 %v12125_v23, %v4490_v56  ;;  %v4257_v42 = vadd.f32 %v8230_v10, %v12108_v50  ;;  %8514 = vmatprep.subr.bf16.mxu1 %v9338_v25  ;;  %v9071_v50 = vld [vmem:[%s13042_s24 + $0xa0] sm:$0xff]   ;;  %v9088_v15 = vld [vmem:[%s13042_s24 + $0x158] sm:$0xff]   ;;  %v9092_v10 = vld [vmem:[%s13042_s24 + $0x148] sm:$0xff]  }
 0x3ec   :  { %v4566_v37 = vpack.c.bf16 %v4562_v21, %v4561_v39  ;;  %8547 = vmatpush3.bf16.msra.mxu0 %v9072_v32  ;;  %v8232_v57 = vpop.f32.mrf.mxu1  ;;  %v12201_v55 = vpack.c.bf16 %v4518_v33, %v4517_v1  ;;  %v4801_v1 = vpack.c.bf16 %v4796_v35, %v4795_v16  ;;  %v4798_v8 = vld [vmem:[#allocation3 + $0x1c] sm:$0xff]  ;;  %v4797_v29 = vld [vmem:[#allocation3 + $0x14] sm:$0xff]  ;;  %v9085_v32 = vld [vmem:[%s13042_s24 + $0x128] sm:$0xff]  }
 0x3ed   :  { %8548 = vmatprep.subr.bf16.mxu0 %v9338_v25  ;;  %v4519_v41 = vmax.f32 %v4508_v53, 0.0  ;;  %v4491_v22 = vadd.f32 %v8282_v46, %v4257_v42  ;;  %v8233_v9 = vadd.f32 %v8232_v57, %v8231_v12  ;;  %v4802_v3 = vpack.c.bf16 %v4798_v8, %v4797_v29  ;;  %v9090_v33 = vld [vmem:[%s13042_s24 + $0x150] sm:$0xff]   ;;  %v9087_v56 = vld [vmem:[%s13042_s24 + $0x120] sm:$0xff]   ;;  %v9089_v39 = vld [vmem:[%s13042_s24 + $0x118] sm:$0xff]  }
 0x3ee   :  { %8475 = vmatmul.mubr.bf16.gmra.mxu1 %v4566_v37  ;;  %v8234_v47 = vpop.f32.mrf.mxu1  ;;  %v4563_v7 = vld [vmem:[#allocation3 + $0x22] sm:$0xff]  ;;  %v9091_v42 = vld [vmem:[%s13042_s24 + $0x110] sm:$0xff]   ;;  %v9120_v8 = vld [vmem:[%s13043_s25 + $0x18] sm:$0xff]  }
 0x3ef   :  { %8515 = vmatpush3.bf16.msra.mxu1 %v9069_v38  ;;  %8478 = vmatprep.mubr.msk.bf16.mxu1 %vm9339_vm5, %v9338_v25  ;;  %4530 = vst [vmem:[#allocation3 + $0x38] sm:$0xff] %v4519_v41  ;;  %v4509_v62 = vadd.f32 %v12125_v23, %v4491_v22  ;;  %v4258_v34 = vadd.f32 %v8233_v9, %v12116_v48  ;;  %v4799_v12 = vld [vmem:[#allocation3 + $0x24] sm:$0xff]  ;;  %v9098_v22 = vld [vmem:[%s13042_s24 + $0x1f0] sm:$0xff]  }
 0x3f0   :  { %8516 = vmatprep.subr.bf16.mxu1 %v9338_v25  ;;  %8549 = vmatpush3.bf16.msra.mxu0 %v9074_v59  ;;  %v8235_v51 = vpop.f32.mrf.mxu1  ;;  %v9094_v38 = vld [vmem:[%s13042_s24 + $0x140] sm:$0xff]   ;;  %v9096_v59 = vld [vmem:[%s13042_s24 + $0x1f8] sm:$0xff]  }
 0x3f1   :  { %8550 = vmatprep.subr.bf16.mxu0 %v9338_v25  ;;  %v4520_v2 = vmax.f32 %v4509_v62, 0.0  ;;  %v4492_v63 = vadd.f32 %v8285_v54, %v4258_v34  ;;  %v8236_v6 = vadd.f32 %v8235_v51, %v8234_v47  ;;  %v5207_v53 = vld [vmem:[#allocation3 + $0x1e] sm:$0xff]  ;;  %v9100_v54 = vld [vmem:[%s13042_s24 + $0x1e8] sm:$0xff]  }
 0x3f2   :  { %v8237_v44 = vpop.f32.mrf.mxu1  ;;  %v4564_v48 = vld [vmem:[#allocation3 + $0x2a] sm:$0xff]  ;;  %v9095_v47 = vld [vmem:[%s13042_s24 + $0x100] sm:$0xff]   ;;  %v9097_v34 = vld [vmem:[%s13042_s24 + $0x1b8] sm:$0xff]  }
 0x3f3   :  { %8517 = vmatpush3.bf16.msra.mxu1 %v9071_v50  ;;  %4531 = vst [vmem:[#allocation3 + $0x40] sm:$0xff] %v4520_v2  ;;  %v4510_v11 = vadd.f32 %v12125_v23, %v4492_v63  ;;  %v4259_v26 = vadd.f32 %v8236_v6, %v12120_v17  ;;  %v4567_v49 = vpack.c.bf16 %v4564_v48, %v4563_v7  ;;  %v9075_v17 = vld [vmem:[%s13042_s24 + $0x90] sm:$0xff]   ;;  %v5208_v50 = vld [vmem:[#allocation3 + $0x26] sm:$0xff]  ;;  %v9104_v6 = vld [vmem:[%s13042_s24 + $0x1d8] sm:$0xff]  }
 0x3f4   :  { %8518 = vmatprep.subr.bf16.mxu1 %v9338_v25  ;;  %8551 = vmatpush3.bf16.msra.mxu0 %v9076_v40  ;;  %v8238_v4 = vpop.f32.mrf.mxu1  ;;  %v12229_v28 = vpack.c.bf16 %v4520_v2, %v4519_v41  ;;  %v4800_v46 = vld [vmem:[#allocation3 + $0x2c] sm:$0xff]  ;;  %v9102_v40 = vld [vmem:[%s13042_s24 + $0x1e0] sm:$0xff]  }
 0x3f5   :  { %8552 = vmatprep.subr.bf16.mxu0 %v9338_v25  ;;  %v4521_v5 = vmax.f32 %v4510_v11, 0.0  ;;  %v4493_v52 = vadd.f32 %v8288_v18, %v4259_v26  ;;  %v12305_v21 = vpack.c.bf16 %v4800_v46, %v4799_v12  ;;  %v9093_v41 = vld [vmem:[%s13042_s24 + $0x108] sm:$0xff]   ;;  %v9099_v2 = vld [vmem:[%s13042_s24 + $0x1b0] sm:$0xff]   ;;  %v9103_v48 = vld [vmem:[%s13042_s24 + $0x1a0] sm:$0xff]  }
 0x3f6   :  { %8479 = vmatmul.mubr.bf16.gmra.mxu1 %v4567_v49  ;;  %v4936_v61 = vld [vmem:[#allocation3 + $0x32] sm:$0xff]  ;;  %v9101_v44 = vld [vmem:[%s13042_s24 + $0x1a8] sm:$0xff]   ;;  %v9110_v4 = vld [vmem:[%s13042_s24 + $0x1c0] sm:$0xff]  }
 0x3f7   :  { %8519 = vmatpush3.bf16.msra.mxu1 %v9073_v0  ;;  %8526 = vmatprep.mubr.msk.bf16.mxu1 %vm9339_vm5, %v9338_v25  ;;  %4532 = vst [vmem:[#allocation3 + $0x48] sm:$0xff] %v4521_v5  ;;  %v4511_v14 = vadd.f32 %v12125_v23, %v4493_v52  ;;  %v9082_v23 = vld [vmem:[%s13042_s24 + $0x170] sm:$0xff]   ;;  %v9108_v0 = vld [vmem:[%s13042_s24 + $0x1c8] sm:$0xff]  }
 0x3f8   :  { %8520 = vmatprep.subr.bf16.mxu1 %v9338_v25  ;;  %8553 = vmatpush3.bf16.msra.mxu0 %v9078_v13  ;;  %v5209_v9 = vld [vmem:[#allocation3 + $0x2e] sm:$0xff]  ;;  %v5210_v63 = vld [vmem:[#allocation3 + $0x36] sm:$0xff] }
 0x3f9   :  { %8594 = vmatprep.subr.bf16.mxu0 %v9338_v25  ;;  %v4522_v60 = vmax.f32 %v4511_v14, 0.0  ;;  %v5213_v62 = vpack.c.bf16 %v5209_v9, %v5208_v50  ;;  %v9106_v7 = vld [vmem:[%s13042_s24 + $0x1d0] sm:$0xff]   ;;  %v9109_v52 = vld [vmem:[%s13042_s24 + $0x188] sm:$0xff]   ;;  %v9112_v14 = vld [vmem:[%s13042_s24 + $0x238] sm:$0xff]  }
 0x3fa   :  { %v4937_v36 = vld [vmem:[#allocation3 + $0x3a] sm:$0xff]  ;;  %v9125_v50 = vld [vmem:[%s13043_s25 + $0x48] sm:$0xff]  }
 0x3fb   :  { %8521 = vmatpush3.bf16.msra.mxu1 %v9075_v17  ;;  %8555 = vmatmul.mubr.bf16.vlgmr.msra.gmra.mxu0 %v4566_v37  ;;  %4533 = vst [vmem:[#allocation3 + $0x50] sm:$0xff] %v4522_v60  ;;  %v12252_v27 = vpack.c.bf16 %v4522_v60, %v4521_v5  ;;  %v4940_v43 = vpack.c.bf16 %v4937_v36, %v4936_v61  ;;  %v5206_v37 = vld [vmem:[#allocation3 + $0x16] sm:$0xff]  ;;  %v5211_v51 = vld [vmem:[#allocation3 + $0x3e] sm:$0xff]  ;;  %v9118_v36 = vld [vmem:[%s13042_s24 + $0x208] sm:$0xff]  }
 0x3fc   :  { %8522 = vmatprep.subr.bf16.mxu1 %v9338_v25  ;;  %8595 = vmatpush3.bf16.msra.mxu0 %v9080_v31  ;;  %v5212_v57 = vpack.c.bf16 %v5207_v53, %v5206_v37  ;;  %v5214_v18 = vpack.c.bf16 %v5211_v51, %v5210_v63  ;;  %v5074_v11 = vld [vmem:[#allocation3 + $0x3c] sm:$0xff]  ;;  %v5073_v26 = vld [vmem:[#allocation3 + $0x34] sm:$0xff] }
 0x3fd   :  { %8596 = vmatprep.subr.bf16.mxu0 %v9338_v25  ;;  %8558 = vmatprep.mubr.msk.bf16.mxu0 %vm9339_vm5, %v9338_v25  ;;  %v5077_v13 = vpack.c.bf16 %v5074_v11, %v5073_v26  ;;  %v9107_v5 = vld [vmem:[%s13042_s24 + $0x190] sm:$0xff]   ;;  %v9111_v17 = vld [vmem:[%s13042_s24 + $0x180] sm:$0xff]  }
 0x3fe   :  { %v9113_v60 = vld [vmem:[%s13042_s24 + $0x230] sm:$0xff]   ;;  %v5347_v16 = vld [vmem:[#allocation3 + $0x44] sm:$0xff] }
 0x3ff   :  { %8523 = vmatpush3.bf16.msra.mxu1 %v9077_v58  ;;  %v5484_v58 = vld [vmem:[#allocation3 + $0x46] sm:$0xff] }
 0x400   :  { %8524 = vmatprep.subr.bf16.mxu1 %v9338_v25  ;;  %8597 = vmatpush3.bf16.msra.mxu0 %v9082_v23  ;;  %v9127_v51 = vld [vmem:[%s13043_s25 + $0x40] sm:$0xff]  }
 0x401   :  { %8598 = vmatprep.subr.bf16.mxu0 %v9338_v25 }
 0x402   :  { %v5485_v31 = vld [vmem:[#allocation3 + $0x4e] sm:$0xff] }
 0x403   :  { %8525 = vmatpush3.bf16.msra.mxu1 %v9079_v20  ;;  %8559 = vmatmul.mubr.bf16.gmra.mxu0 %v4567_v49  ;;  %v9105_v49 = vld [vmem:[%s13042_s24 + $0x198] sm:$0xff]   ;;  %v5488_v23 = vpack.c.bf16 %v5485_v31, %v5484_v58  ;;  %v9114_v20 = vld [vmem:[%s13042_s24 + $0x228] sm:$0xff]  }
 0x404   :  { %8566 = vmatprep.subr.bf16.mxu1 %v9338_v25  ;;  %8599 = vmatpush3.bf16.msra.mxu0 %v9084_v19  ;;  %v9115_v19 = vld [vmem:[%s13042_s24 + $0x220] sm:$0xff]   ;;  %v5348_v35 = vld [vmem:[#allocation3 + $0x4c] sm:$0xff] }
 0x405   :  { %8600 = vmatprep.subr.bf16.mxu0 %v9338_v25  ;;  %8562 = vmatprep.mubr.msk.bf16.mxu0 %vm9339_vm5, %v9338_v25 }
 0x406   :  { %8527 = vmatmul.mubr.bf16.vlgmr.msra.gmra.mxu1 %v4801_v1  ;;  %v5351_v1 = vpack.c.bf16 %v5348_v35, %v5347_v16 }
 0x407   :  { %8567 = vmatpush3.bf16.msra.mxu1 %v9081_v30  ;;  %8530 = vmatprep.mubr.msk.bf16.mxu1 %vm9339_vm5, %v9338_v25  ;;  %v9116_v30 = vld [vmem:[%s13042_s24 + $0x218] sm:$0xff]  }
 0x408   :  { %8568 = vmatprep.subr.bf16.mxu1 %v9338_v25  ;;  %8601 = vmatpush3.bf16.msra.mxu0 %v9086_v24  ;;  %v9117_v24 = vld [vmem:[%s13042_s24 + $0x210] sm:$0xff]  }
 0x409   :  { %8602 = vmatprep.subr.bf16.mxu0 %v9338_v25 }
 0x40b   :  { %8569 = vmatpush3.bf16.msra.mxu1 %v9083_v45  ;;  %8563 = vmatmul.mubr.bf16.gmra.mxu0 %v4940_v43  ;;  %v9119_v45 = vld [vmem:[%s13042_s24 + $0x200] sm:$0xff]  }
 0x40c   :  { %8570 = vmatprep.subr.bf16.mxu1 %v9338_v25  ;;  %8603 = vmatpush3.bf16.msra.mxu0 %v9088_v15 }
 0x40d   :  { %8604 = vmatprep.subr.bf16.mxu0 %v9338_v25  ;;  %8610 = vmatprep.mubr.msk.bf16.mxu0 %vm9339_vm5, %v9338_v25 }
 0x40e   :  { %8531 = vmatmul.mubr.bf16.gmra.mxu1 %v4802_v3 }
 0x40f   :  { %8571 = vmatpush3.bf16.msra.mxu1 %v9085_v32  ;;  %8534 = vmatprep.mubr.msk.bf16.mxu1 %vm9339_vm5, %v9338_v25 }
 0x410   :  { %8572 = vmatprep.subr.bf16.mxu1 %v9338_v25  ;;  %8605 = vmatpush3.bf16.msra.mxu0 %v9090_v33 }
 0x411   :  { %8606 = vmatprep.subr.bf16.mxu0 %v9338_v25 }
 0x413   :  { %8573 = vmatpush3.bf16.msra.mxu1 %v9087_v56 }
 0x414   :  { %8574 = vmatprep.subr.bf16.mxu1 %v9338_v25  ;;  %8607 = vmatpush3.bf16.msra.mxu0 %v9092_v10 }
 0x415   :  { %8608 = vmatprep.subr.bf16.mxu0 %v9338_v25 }
 0x416   :  { %8535 = vmatmul.mubr.bf16.gmra.mxu1 %v12305_v21 }
 0x417   :  { %8575 = vmatpush3.bf16.msra.mxu1 %v9089_v39  ;;  %8582 = vmatprep.mubr.msk.bf16.mxu1 %vm9339_vm5, %v9338_v25 }
 0x418   :  { %8576 = vmatprep.subr.bf16.mxu1 %v9338_v25  ;;  %8609 = vmatpush3.bf16.msra.mxu0 %v9094_v38  ;;  %v9122_v38 = vld [vmem:[%s13043_s25 + $0x58] sm:$0xff]  }
 0x419   :  { %8650 = vmatprep.subr.bf16.mxu0 %v9338_v25 }
 0x41b   :  { %8577 = vmatpush3.bf16.msra.mxu1 %v9091_v42  ;;  %8611 = vmatmul.mubr.bf16.vlgmr.msra.gmra.mxu0 %v5212_v57 }
 0x41c   :  { %8578 = vmatprep.subr.bf16.mxu1 %v9338_v25  ;;  %8651 = vmatpush3.bf16.msra.mxu0 %v9096_v59 }
 0x41d   :  { %8652 = vmatprep.subr.bf16.mxu0 %v9338_v25  ;;  %8614 = vmatprep.mubr.msk.bf16.mxu0 %vm9339_vm5, %v9338_v25 }
 0x41f   :  { %8579 = vmatpush3.bf16.msra.mxu1 %v9093_v41  ;;  %v9123_v41 = vld [vmem:[%s13043_s25 + $0x50] sm:$0xff]  }
 0x420   :  { %8580 = vmatprep.subr.bf16.mxu1 %v9338_v25  ;;  %8653 = vmatpush3.bf16.msra.mxu0 %v9098_v22  ;;  %v9124_v22 = vld [vmem:[%s13043_s25 + $0x8] sm:$0xff]  }
 0x421   :  { %8654 = vmatprep.subr.bf16.mxu0 %v9338_v25 }
 0x423   :  { %8581 = vmatpush3.bf16.msra.mxu1 %v9095_v47  ;;  %8615 = vmatmul.mubr.bf16.gmra.mxu0 %v5213_v62 }
 0x424   :  { %8622 = vmatprep.subr.bf16.mxu1 %v9338_v25  ;;  %8655 = vmatpush3.bf16.msra.mxu0 %v9100_v54 }
 0x425   :  { %8656 = vmatprep.subr.bf16.mxu0 %v9338_v25  ;;  %8618 = vmatprep.mubr.msk.bf16.mxu0 %vm9339_vm5, %v9338_v25 }
 0x426   :  { %8583 = vmatmul.mubr.bf16.vlgmr.msra.gmra.mxu1 %v4802_v3 }
 0x427   :  { %8623 = vmatpush3.bf16.msra.mxu1 %v9097_v34  ;;  %8586 = vmatprep.mubr.msk.bf16.mxu1 %vm9339_vm5, %v9338_v25 }
 0x428   :  { %8624 = vmatprep.subr.bf16.mxu1 %v9338_v25  ;;  %8657 = vmatpush3.bf16.msra.mxu0 %v9102_v40  ;;  %v9126_v40 = vld [vmem:[%s13043_s25] sm:$0xff]  }
 0x429   :  { %8658 = vmatprep.subr.bf16.mxu0 %v9338_v25 }
 0x42b   :  { %8625 = vmatpush3.bf16.msra.mxu1 %v9099_v2  ;;  %8619 = vmatmul.mubr.bf16.gmra.mxu0 %v5214_v18 }
 0x42c   :  { %8626 = vmatprep.subr.bf16.mxu1 %v9338_v25  ;;  %8659 = vmatpush3.bf16.msra.mxu0 %v9104_v6 }
 0x42d   :  { %8660 = vmatprep.subr.bf16.mxu0 %v9338_v25  ;;  %8666 = vmatprep.mubr.msk.bf16.mxu0 %vm9339_vm5, %v9338_v25 }
 0x42e   :  { %8587 = vmatmul.mubr.bf16.gmra.mxu1 %v12305_v21 }
 0x42f   :  { %8627 = vmatpush3.bf16.msra.mxu1 %v9101_v44  ;;  %8590 = vmatprep.mubr.msk.bf16.mxu1 %vm9339_vm5, %v9338_v25 }
 0x430   :  { %8628 = vmatprep.subr.bf16.mxu1 %v9338_v25  ;;  %8661 = vmatpush3.bf16.msra.mxu0 %v9106_v7 }
 0x431   :  { %8662 = vmatprep.subr.bf16.mxu0 %v9338_v25 }
 0x433   :  { %8629 = vmatpush3.bf16.msra.mxu1 %v9103_v48 }
 0x434   :  { %8630 = vmatprep.subr.bf16.mxu1 %v9338_v25  ;;  %8663 = vmatpush3.bf16.msra.mxu0 %v9108_v0 }
 0x435   :  { %8664 = vmatprep.subr.bf16.mxu0 %v9338_v25 }
 0x436   :  { %8591 = vmatmul.mubr.bf16.gmra.mxu1 %v5077_v13 }
 0x437   :  { %8631 = vmatpush3.bf16.msra.mxu1 %v9105_v49  ;;  %8638 = vmatprep.mubr.msk.bf16.mxu1 %vm9339_vm5, %v9338_v25 }
 0x438   :  { %8632 = vmatprep.subr.bf16.mxu1 %v9338_v25  ;;  %8665 = vmatpush3.bf16.msra.mxu0 %v9110_v4 }
 0x439   :  { %8706 = vmatprep.subr.bf16.mxu0 %v9338_v25 }
 0x43b   :  { %8633 = vmatpush3.bf16.msra.mxu1 %v9107_v5  ;;  %8667 = vmatmul.mubr.bf16.vlgmr.msra.gmra.mxu0 %v5213_v62 }
 0x43c   :  { %8634 = vmatprep.subr.bf16.mxu1 %v9338_v25  ;;  %8670 = vmatprep.mubr.msk.bf16.mxu0 %vm9339_vm5, %v9338_v25 }
 0x43d   :  { %8707 = vmatpush3.bf16.msra.mxu0 %v9120_v8 }
 0x43e   :  { %8708 = vmatprep.subr.bf16.mxu0 %v9338_v25 }
 0x43f   :  { %8635 = vmatpush3.bf16.msra.mxu1 %v9109_v52 }
 0x440   :  { %8636 = vmatprep.subr.bf16.mxu1 %v9338_v25 }
 0x443   :  { %8637 = vmatpush3.bf16.msra.mxu1 %v9111_v17  ;;  %8671 = vmatmul.mubr.bf16.gmra.mxu0 %v5214_v18 }
 0x444   :  { %8678 = vmatprep.subr.bf16.mxu1 %v9338_v25  ;;  %8674 = vmatprep.mubr.msk.bf16.mxu0 %vm9339_vm5, %v9338_v25 }
 0x446   :  { %8639 = vmatmul.mubr.bf16.vlgmr.msra.gmra.mxu1 %v12305_v21  ;;  %v9121_v21 = vld [vmem:[%s13043_s25 + $0x10] sm:$0xff]  }
 0x447   :  { %8679 = vmatpush3.bf16.msra.mxu1 %v9112_v14  ;;  %8642 = vmatprep.mubr.msk.bf16.mxu1 %vm9339_vm5, %v9338_v25 }
 0x448   :  { %8680 = vmatprep.subr.bf16.mxu1 %v9338_v25  ;;  %8709 = vmatpush3.bf16.msra.mxu0 %v9121_v21 }
 0x449   :  { %8710 = vmatprep.subr.bf16.mxu0 %v9338_v25 }
 0x44b   :  { %8681 = vmatpush3.bf16.msra.mxu1 %v9113_v60  ;;  %8675 = vmatmul.mubr.bf16.gmra.mxu0 %v5488_v23 }
 0x44c   :  { %8682 = vmatprep.subr.bf16.mxu1 %v9338_v25  ;;  %8714 = vmatprep.mubr.msk.bf16.mxu0 %vm9339_vm5, %v9338_v25 }
 0x44d   :  { %8711 = vmatpush3.bf16.msra.mxu0 %v9124_v22 }
 0x44e   :  { %8643 = vmatmul.mubr.bf16.gmra.mxu1 %v5077_v13  ;;  %8712 = vmatprep.subr.bf16.mxu0 %v9338_v25 }
 0x44f   :  { %8683 = vmatpush3.bf16.msra.mxu1 %v9114_v20  ;;  %8646 = vmatprep.mubr.msk.bf16.mxu1 %vm9339_vm5, %v9338_v25 }
 0x450   :  { %8684 = vmatprep.subr.bf16.mxu1 %v9338_v25 }
 0x451   :  { %8713 = vmatpush3.bf16.msra.mxu0 %v9126_v40 }
 0x452   :  { %8718 = vmatprep.subr.bf16.mxu0 %v9338_v25 }
 0x453   :  { %8685 = vmatpush3.bf16.msra.mxu1 %v9115_v19 }
 0x454   :  { %8686 = vmatprep.subr.bf16.mxu1 %v9338_v25 }
 0x456   :  { %8647 = vmatmul.mubr.bf16.gmra.mxu1 %v5351_v1 }
 0x457   :  { %8687 = vmatpush3.bf16.msra.mxu1 %v9116_v30  ;;  %8694 = vmatprep.mubr.msk.bf16.mxu1 %vm9339_vm5, %v9338_v25 }
 0x458   :  { %8688 = vmatprep.subr.bf16.mxu1 %v9338_v25 }
 0x45b   :  { %8689 = vmatpush3.bf16.msra.mxu1 %v9117_v24 }
 0x45c   :  { %8690 = vmatprep.subr.bf16.mxu1 %v9338_v25 }
 0x45f   :  { %8691 = vmatpush3.bf16.msra.mxu1 %v9118_v36 }
 0x460   :  { %8692 = vmatprep.subr.bf16.mxu1 %v9338_v25 }
 0x463   :  { %8693 = vmatpush3.bf16.msra.mxu1 %v9119_v45 }
 0x464   :  { %8730 = vmatprep.subr.bf16.mxu1 %v9338_v25 }
 0x466   :  { %8695 = vmatmul.mubr.bf16.vlgmr.msra.gmra.mxu1 %v12201_v55 }
 0x467   :  { %8698 = vmatprep.mubr.msk.bf16.mxu1 %vm9339_vm5, %v9338_v25  ;;  %8731 = vmatpush3.bf16.msra.mxu1 %v9122_v38 }
 0x468   :  { %8732 = vmatprep.subr.bf16.mxu1 %v9338_v25 }
 0x46b   :  { %8733 = vmatpush3.bf16.msra.mxu1 %v9123_v41 }
 0x46c   :  { %8734 = vmatprep.subr.bf16.mxu1 %v9338_v25 }
 0x46e   :  { %8699 = vmatmul.mubr.bf16.gmra.mxu1 %v12229_v28 }
 0x46f   :  { %8702 = vmatprep.mubr.msk.bf16.mxu1 %vm9339_vm5, %v9338_v25  ;;  %8735 = vmatpush3.bf16.msra.mxu1 %v9125_v50 }
 0x470   :  { %8736 = vmatprep.subr.bf16.mxu1 %v9338_v25 }
 0x473   :  { %8737 = vmatpush3.bf16.msra.mxu1 %v9127_v51 }
 0x474   :  { %8754 = vmatprep.subr.bf16.mxu1 %v9338_v25 }
 0x476   :  { %8703 = vmatmul.mubr.bf16.gmra.mxu1 %v12252_v27 }
 0x477   :  { %8738 = vmatprep.mubr.msk.bf16.mxu1 %vm9339_vm5, %v9338_v25 }
 0x499   :  { %v4772_v61 = vpop.f32.mrf.mxu0 }
 0x49b   :  { %v8500_v15 = vpop.f32.mrf.mxu0 }
 0x49d   :  { %v4775_v55 = vpop.f32.mrf.mxu0 }
 0x49f   :  { %v8501_v43 = vpop.f32.mrf.mxu0 }
 0x4a1   :  { %v4780_v28 = vpop.f32.mrf.mxu0 }
 0x4a3   :  { %v8504_v29 = vpop.f32.mrf.mxu0 }
 0x4a5   :  { %v4667_v32 = vpop.f32.mrf.mxu1  ;;  %v4783_v3 = vpop.f32.mrf.mxu0 }
 0x4a6   :  { %v4773_v33 = vadd.f32 %v4772_v61, %v4667_v32 }
 0x4a7   :  { %v8472_v27 = vpop.f32.mrf.mxu1  ;;  %v8505_v56 = vpop.f32.mrf.mxu0 }
 0x4a9   :  { %v4670_v10 = vpop.f32.mrf.mxu1 }
 0x4aa   :  { %v4788_v46 = vpop.f32.mrf.mxu0 }
 0x4ab   :  { %v8473_v12 = vpop.f32.mrf.mxu1 }
 0x4ac   :  { %v8508_v39 = vpop.f32.mrf.mxu0 }
 0x4ae   :  { %v4675_v53 = vpop.f32.mrf.mxu1  ;;  %v4791_v42 = vpop.f32.mrf.mxu0 }
 0x4af   :  { %v4781_v37 = vadd.f32 %v4780_v28, %v4675_v53 }
 0x4b0   :  { %v8476_v59 = vpop.f32.mrf.mxu1  ;;  %v8509_v57 = vpop.f32.mrf.mxu0 }
 0x4b2   :  { %v4678_v9 = vpop.f32.mrf.mxu1 }
 0x4b4   :  { %v8477_v47 = vpop.f32.mrf.mxu1 }
 0x4b6   :  { %v4683_v54 = vpop.f32.mrf.mxu1 }
 0x4b7   :  { %v4789_v62 = vadd.f32 %v4788_v46, %v4683_v54 }
 0x4b8   :  { %v8480_v34 = vpop.f32.mrf.mxu1 }
 0x4ba   :  { %v4686_v2 = vpop.f32.mrf.mxu1 }
 0x4bb   :  { %v4792_v63 = vadd.f32 %v4791_v42, %v4686_v2  ;;  %v5040_v6 = vpop.f32.mrf.mxu0 }
 0x4bc   :  { %v8481_v18 = vpop.f32.mrf.mxu1 }
 0x4bd   :  { %v8556_v44 = vpop.f32.mrf.mxu0 }
 0x4bf   :  { %v5043_v7 = vpop.f32.mrf.mxu0 }
 0x4c1   :  { %v8557_v48 = vpop.f32.mrf.mxu0 }
 0x4c3   :  { %v5048_v0 = vpop.f32.mrf.mxu0 }
 0x4c5   :  { %v8560_v11 = vpop.f32.mrf.mxu0 }
 0x4c6   :  { %v4903_v26 = vpop.f32.mrf.mxu1 }
 0x4c7   :  { %v4926_v49 = vadd.f32 %v4903_v26, %v4773_v33  ;;  %v5051_v13 = vpop.f32.mrf.mxu0 }
 0x4c8   :  { %v8528_v4 = vpop.f32.mrf.mxu1 }
 0x4c9   :  { %v8561_v5 = vpop.f32.mrf.mxu0  ;;  %v5063_v52 = vadd.f32 %v5040_v6, %v4926_v49 }
 0x4ca   :  { %v4906_v17 = vpop.f32.mrf.mxu1 }
 0x4cb   :  { %v5056_v14 = vpop.f32.mrf.mxu0 }
 0x4cc   :  { %v8529_v31 = vpop.f32.mrf.mxu1 }
 0x4cd   :  { %v8564_v60 = vpop.f32.mrf.mxu0 }
 0x4ce   :  { %v4911_v58 = vpop.f32.mrf.mxu1 }
 0x4cf   :  { %v4928_v23 = vadd.f32 %v4911_v58, %v4781_v37  ;;  %v5059_v20 = vpop.f32.mrf.mxu0 }
 0x4d0   :  { %v8532_v19 = vpop.f32.mrf.mxu1 }
 0x4d1   :  { %v8565_v35 = vpop.f32.mrf.mxu0  ;;  %v5065_v16 = vadd.f32 %v5048_v0, %v4928_v23 }
 0x4d2   :  { %v4914_v30 = vpop.f32.mrf.mxu1 }
 0x4d4   :  { %v8533_v1 = vpop.f32.mrf.mxu1 }
 0x4d6   :  { %v4919_v24 = vpop.f32.mrf.mxu1 }
 0x4d7   :  { %v4930_v36 = vadd.f32 %v4919_v24, %v4789_v62 }
 0x4d8   :  { %v8536_v45 = vpop.f32.mrf.mxu1 }
 0x4d9   :  { %v5067_v61 = vadd.f32 %v5056_v14, %v4930_v36 }
 0x4da   :  { %v4922_v15 = vpop.f32.mrf.mxu1 }
 0x4db   :  { %v4931_v8 = vadd.f32 %v4922_v15, %v4792_v63  ;;  %v5314_v55 = vpop.f32.mrf.mxu0  ;;  %v7690_v15 = vld [vmem:[#allocation9] ss:$0 sm:$0xff] }
 0x4dc   :  { %v8537_v43 = vpop.f32.mrf.mxu1 }
 0x4dd   :  { %v8612_v28 = vpop.f32.mrf.mxu0  ;;  %v5068_v29 = vadd.f32 %v5059_v20, %v4931_v8 }
 0x4df   :  { %v5317_v32 = vpop.f32.mrf.mxu0 }
 0x4e1   :  { %v8613_v3 = vpop.f32.mrf.mxu0 }
 0x4e3   :  { %v5322_v33 = vpop.f32.mrf.mxu0 }
 0x4e5   :  { %v8616_v27 = vpop.f32.mrf.mxu0 }
 0x4e6   :  { %v5177_v56 = vpop.f32.mrf.mxu1 }
 0x4e7   :  { %v5200_v10 = vadd.f32 %v5177_v56, %v5063_v52  ;;  %v5325_v46 = vpop.f32.mrf.mxu0 }
 0x4e8   :  { %v8584_v12 = vpop.f32.mrf.mxu1 }
 0x4e9   :  { %v8617_v39 = vpop.f32.mrf.mxu0  ;;  %v5337_v21 = vadd.f32 %v5314_v55, %v5200_v10 }
 0x4ea   :  { %v5180_v38 = vpop.f32.mrf.mxu1 }
 0x4eb   :  { %v5330_v53 = vpop.f32.mrf.mxu0  ;;  %v9128_v38 = vld [vmem:[%s13043_s25 + $0x38] sm:$0xff]  }
 0x4ec   :  { %v8585_v42 = vpop.f32.mrf.mxu1 }
 0x4ed   :  { %v8620_v37 = vpop.f32.mrf.mxu0 }
 0x4ee   :  { %v5185_v59 = vpop.f32.mrf.mxu1 }
 0x4ef   :  { %v5202_v57 = vadd.f32 %v5185_v59, %v5065_v16  ;;  %v5333_v41 = vpop.f32.mrf.mxu0 }
 0x4f0   :  { %v8588_v22 = vpop.f32.mrf.mxu1 }
 0x4f1   :  { %v8621_v9 = vpop.f32.mrf.mxu0  ;;  %v5339_v47 = vadd.f32 %v5322_v33, %v5202_v57  ;;  %v9129_v57 = vld [vmem:[%s13043_s25 + $0x98] sm:$0xff]  }
 0x4f2   :  { %v5188_v50 = vpop.f32.mrf.mxu1 }
 0x4f4   :  { %v8589_v54 = vpop.f32.mrf.mxu1 }
 0x4f6   :  { %v5193_v62 = vpop.f32.mrf.mxu1 }
 0x4f7   :  { %v5204_v34 = vadd.f32 %v5193_v62, %v5067_v61  ;;  %v9130_v62 = vld [vmem:[%s13043_s25 + $0x30] sm:$0xff]  }
 0x4f8   :  { %v8592_v40 = vpop.f32.mrf.mxu1 }
 0x4f9   :  { %v5341_v51 = vadd.f32 %v5330_v53, %v5204_v34  ;;  %v9131_v34 = vld [vmem:[%s13043_s25 + $0x90] sm:$0xff]  }
 0x4fa   :  { %v5196_v2 = vpop.f32.mrf.mxu1 }
 0x4fb   :  { %v5205_v63 = vadd.f32 %v5196_v2, %v5068_v29  ;;  %v5588_v6 = vpop.f32.mrf.mxu0 }
 0x4fc   :  { %v8593_v18 = vpop.f32.mrf.mxu1 }
 0x4fd   :  { %v8668_v44 = vpop.f32.mrf.mxu0  ;;  %v5342_v7 = vadd.f32 %v5333_v41, %v5205_v63 }
 0x4fe   :  { %v9132_v44 = vld [vmem:[%s13043_s25 + $0x28] sm:$0xff]  }
 0x4ff   :  { %v5591_v48 = vpop.f32.mrf.mxu0 }
 0x501   :  { %v8669_v0 = vpop.f32.mrf.mxu0 }
 0x503   :  { %v5596_v11 = vpop.f32.mrf.mxu0 }
 0x505   :  { %v8672_v26 = vpop.f32.mrf.mxu0 }
 0x506   :  { %v5451_v49 = vpop.f32.mrf.mxu1  ;;  %v9135_v26 = vld [vmem:[%s13043_s25 + $0x80] sm:$0xff]  }
 0x507   :  { %v5599_v13 = vpop.f32.mrf.mxu0  ;;  %v5474_v36 = vadd.f32 %v5451_v49, %v5337_v21 }
 0x508   :  { %v8640_v4 = vpop.f32.mrf.mxu1 }
 0x509   :  { %v8673_v5 = vpop.f32.mrf.mxu0  ;;  %v5611_v45 = vadd.f32 %v5588_v6, %v5474_v36  ;;  %v9136_v4 = vld [vmem:[%s13043_s25 + $0x78] sm:$0xff]   ;;  %v9146_v36 = vld [vmem:[%s13043_s25 + $0xb0] sm:$0xff]  }
 0x50a   :  { %v5454_v52 = vpop.f32.mrf.mxu1  ;;  %v9137_v5 = vld [vmem:[%s13043_s25 + $0xd8] sm:$0xff]  }
 0x50b   :  { %v5604_v17 = vpop.f32.mrf.mxu0 }
 0x50c   :  { %v8641_v14 = vpop.f32.mrf.mxu1 }
 0x50d   :  { %v8676_v31 = vpop.f32.mrf.mxu0  ;;  %v9138_v14 = vld [vmem:[%s13043_s25 + $0x70] sm:$0xff]  }
 0x50e   :  { %v5459_v60 = vpop.f32.mrf.mxu1  ;;  %v9139_v31 = vld [vmem:[%s13043_s25 + $0xd0] sm:$0xff]  }
 0x50f   :  { %v5607_v58 = vpop.f32.mrf.mxu0  ;;  %v5476_v43 = vadd.f32 %v5459_v60, %v5339_v47  ;;  %v9140_v60 = vld [vmem:[%s13043_s25 + $0x68] sm:$0xff]  }
 0x510   :  { %v8644_v23 = vpop.f32.mrf.mxu1 }
 0x511   :  { %v8677_v20 = vpop.f32.mrf.mxu0  ;;  %v5613_v33 = vadd.f32 %v5596_v11, %v5476_v43  ;;  %v9134_v11 = vld [vmem:[%s13043_s25 + $0x20] sm:$0xff]  }
 0x512   :  { %v5462_v19 = vpop.f32.mrf.mxu1  ;;  %v9142_v23 = vld [vmem:[%s13043_s25 + $0x60] sm:$0xff]  }
 0x513   :  { %v9143_v20 = vld [vmem:[%s13043_s25 + $0xc0] sm:$0xff]  }
 0x514   :  { %v8645_v35 = vpop.f32.mrf.mxu1 }
 0x516   :  { %v5467_v16 = vpop.f32.mrf.mxu1 }
 0x517   :  { %v5478_v10 = vadd.f32 %v5467_v16, %v5341_v51  ;;  %v9144_v16 = vld [vmem:[%s13043_s25 + $0xb8] sm:$0xff]  }
 0x518   :  { %v8648_v30 = vpop.f32.mrf.mxu1 }
 0x519   :  { %v5615_v42 = vadd.f32 %v5604_v17, %v5478_v10  ;;  %v9145_v30 = vld [vmem:[%s13043_s25 + $0x118] sm:$0xff]  }
 0x51a   :  { %v5470_v1 = vpop.f32.mrf.mxu1 }
 0x51b   :  { %v5479_v41 = vadd.f32 %v5470_v1, %v5342_v7  ;;  %v9133_v7 = vld [vmem:[%s13043_s25 + $0x88] sm:$0xff]  }
 0x51c   :  { %v8649_v24 = vpop.f32.mrf.mxu1 }
 0x51d   :  { %v5616_v51 = vadd.f32 %v5607_v58, %v5479_v41  ;;  %v9141_v58 = vld [vmem:[%s13043_s25 + $0xc8] sm:$0xff]  }
 0x526   :  { %v5725_v61 = vpop.f32.mrf.mxu1 }
 0x527   :  { %v5748_v8 = vadd.f32 %v5725_v61, %v5611_v45  ;;  %v9147_v45 = vld [vmem:[%s13043_s25 + $0x110] sm:$0xff]   ;;  %v9148_v61 = vld [vmem:[%s13043_s25 + $0xa8] sm:$0xff]  }
 0x528   :  { %v8696_v55 = vpop.f32.mrf.mxu1 }
 0x529   :  { %v5761_v28 = vadd.f32 %v7690_v15, %v5748_v8  ;;  %v9150_v8 = vld [vmem:[%s13043_s25 + $0xa0] sm:$0xff]  }
 0x52a   :  { %v5728_v29 = vpop.f32.mrf.mxu1  ;;  %v9151_v55 = vld [vmem:[%s13043_s25 + $0x100] sm:$0xff]  }
 0x52b   :  { %v5767_v32 = vmax.f32 %v5761_v28, 0.0  ;;  %v9152_v29 = vld [vmem:[%s13043_s25 + $0xf8] sm:$0xff]  }
 0x52c   :  { %v8697_v3 = vpop.f32.mrf.mxu1 }
 0x52d   :  { %5774 = vst.msk [vmem:[#allocation4] sm:$0xff] %vm5773_vm6, %v5767_v32 }
 0x52e   :  { %v5733_v27 = vpop.f32.mrf.mxu1 }
 0x52f   :  { %v5750_v56 = vadd.f32 %v5733_v27, %v5613_v33  ;;  %v9153_v33 = vld [vmem:[%s13043_s25 + $0xf0] sm:$0xff]   ;;  %v9154_v27 = vld [vmem:[%s13043_s25 + $0xe8] sm:$0xff]  }
 0x530   :  { %v8700_v46 = vpop.f32.mrf.mxu1 }
 0x531   :  { %v5763_v12 = vadd.f32 %v7690_v15, %v5750_v56  ;;  %v9155_v56 = vld [vmem:[%s13043_s25 + $0xe0] sm:$0xff]   ;;  %v9156_v46 = vld [vmem:[%s12759_s8 + $0x8] sm:$0xff]  }
 0x532   :  { %v5736_v39 = vpop.f32.mrf.mxu1 }
 0x533   :  { %v5769_v21 = vmax.f32 %v5763_v12, 0.0  ;;  %v9157_v39 = vld [vmem:[%s12759_s8] sm:$0xff]  }
 0x534   :  { %v8701_v53 = vpop.f32.mrf.mxu1  ;;  %v5781_v37 = vld [vmem:[#allocation4] sm:$0x3]  ;;  %v5944_v59 = vld [vmem:[#allocation4 + $0x4] sm:$0x3]  ;;  %v5865_v49 = vld [vmem:[#allocation4 + $0x2] sm:$0x3] }
 0x535   :  { %5776 = vst.msk [vmem:[#allocation4 + $0x10] sm:$0xff] %vm5773_vm6, %v5769_v21  ;;  %v5782_v22 = vpack.c.bf16 %v5781_v37, %v5781_v37  ;;  %v5945_v9 = vpack.c.bf16 %v5944_v59, %v5944_v59  ;;  %v5866_v52 = vpack.c.bf16 %v5865_v49, %v5865_v49  ;;  %v6497_v21 = vld [vmem:[%s12769_s18] sm:$0x3] }
 0x536   :  { %v5741_v47 = vpop.f32.mrf.mxu1 }
 0x537   :  { %v5752_v50 = vadd.f32 %v5741_v47, %v5615_v42  ;;  %8715 = vmatmul.mubr.msk.bf16.vlgmr.msra.gmra.mxu0 %vm5773_vm6, %v5782_v22  ;;  %8739 = vmatmul.mubr.msk.bf16.vlgmr.msra.gmra.mxu1 %vm5773_vm6, %v5945_v9 }
 0x538   :  { %8719 = vmatpush3.bf16.msra.mxu0 %v9128_v38  ;;  %8755 = vmatpush3.bf16.msra.mxu1 %v9129_v57  ;;  %v8704_v54 = vpop.f32.mrf.mxu1  ;;  %v6498_v38 = vpack.c.bf16 %v6497_v21, %v6497_v21 }
 0x539   :  { %v5765_v40 = vadd.f32 %v7690_v15, %v5752_v50  ;;  %8720 = vmatprep.subr.bf16.mxu0 %v9338_v25  ;;  %8756 = vmatprep.subr.bf16.mxu1 %v9338_v25 }
 0x53a   :  { %v5744_v2 = vpop.f32.mrf.mxu1  ;;  %8726 = vmatprep.mubr.msk.bf16.mxu0 %vm9339_vm5, %v9338_v25  ;;  %8762 = vmatprep.mubr.msk.bf16.mxu1 %vm9339_vm5, %v9338_v25 }
 0x53b   :  { %v5771_v63 = vmax.f32 %v5765_v40, 0.0  ;;  %v5753_v6 = vadd.f32 %v5744_v2, %v5616_v51 }
 0x53c   :  { %8721 = vmatpush3.bf16.msra.mxu0 %v9130_v62  ;;  %8757 = vmatpush3.bf16.msra.mxu1 %v9131_v34  ;;  %v8705_v18 = vpop.f32.mrf.mxu1  ;;  %v6102_v13 = vld [vmem:[#allocation4 + $0x14] sm:$0x3]  ;;  %v6023_v19 = vld [vmem:[#allocation4 + $0x12] sm:$0x3]  ;;  %v6181_v43 = vld [vmem:[#allocation4 + $0x16] sm:$0x3] }
 0x53d   :  { %5778 = vst.msk [vmem:[#allocation4 + $0x20] sm:$0xff] %vm5773_vm6, %v5771_v63  ;;  %v5766_v48 = vadd.f32 %v7690_v15, %v5753_v6  ;;  %8722 = vmatprep.subr.bf16.mxu0 %v9338_v25  ;;  %8758 = vmatprep.subr.bf16.mxu1 %v9338_v25  ;;  %v6103_v17 = vpack.c.bf16 %v6102_v13, %v6102_v13  ;;  %v9149_v15 = vld [vmem:[%s13043_s25 + $0x108] sm:$0xff]  }
 0x53e   :  { %v6024_v1 = vpack.c.bf16 %v6023_v19, %v6023_v19  ;;  %v6182_v32 = vpack.c.bf16 %v6181_v43, %v6181_v43 }
 0x53f   :  { %v5772_v0 = vmax.f32 %v5766_v48, 0.0 }
 0x540   :  { %8723 = vmatpush3.bf16.msra.mxu0 %v9132_v44  ;;  %8759 = vmatpush3.bf16.msra.mxu1 %v9133_v7 }
 0x541   :  { %5779 = vst.msk [vmem:[#allocation4 + $0x28] sm:$0xff] %vm5773_vm6, %v5772_v0  ;;  %8724 = vmatprep.subr.bf16.mxu0 %v9338_v25  ;;  %8760 = vmatprep.subr.bf16.mxu1 %v9338_v25 }
 0x544   :  { %8725 = vmatpush3.bf16.msra.mxu0 %v9134_v11  ;;  %8761 = vmatpush3.bf16.msra.mxu1 %v9135_v26  ;;  %v6260_v35 = vld [vmem:[#allocation4 + $0x24] sm:$0x3]  ;;  %v6339_v10 = vld [vmem:[#allocation4 + $0x26] sm:$0x3]  ;;  %v7696_v26 = vld [vmem:[%s12760_s9] ss:$0 sm:$0xff] }
 0x545   :  { %8742 = vmatprep.subr.bf16.mxu0 %v9338_v25  ;;  %8778 = vmatprep.subr.bf16.mxu1 %v9338_v25  ;;  %v6261_v24 = vpack.c.bf16 %v6260_v35, %v6260_v35  ;;  %v6340_v12 = vpack.c.bf16 %v6339_v10, %v6339_v10  ;;  %s9340_s9 = smov 64  }
 0x547   :  { %8727 = vmatmul.mubr.msk.bf16.vlgmr.msra.gmra.mxu0 %vm5773_vm6, %v5866_v52  ;;  %8763 = vmatmul.mubr.msk.bf16.vlgmr.msra.gmra.mxu1 %vm5773_vm6, %v6103_v17 }
 0x548   :  { %8743 = vmatpush3.bf16.msra.mxu0 %v9136_v4  ;;  %8779 = vmatpush3.bf16.msra.mxu1 %v9137_v5  ;;  %v6418_v28 = vld [vmem:[#allocation4 + $0x28] sm:$0x3] }
 0x549   :  { %8744 = vmatprep.subr.bf16.mxu0 %v9338_v25  ;;  %8780 = vmatprep.subr.bf16.mxu1 %v9338_v25  ;;  %v6419_v3 = vpack.c.bf16 %v6418_v28, %v6418_v28 }
 0x54a   :  { %8750 = vmatprep.mubr.msk.bf16.mxu0 %vm9339_vm5, %v9338_v25  ;;  %8786 = vmatprep.mubr.msk.bf16.mxu1 %vm9339_vm5, %v9338_v25 }
 0x54c   :  { %8745 = vmatpush3.bf16.msra.mxu0 %v9138_v14  ;;  %8781 = vmatpush3.bf16.msra.mxu1 %v9139_v31 }
 0x54d   :  { %8746 = vmatprep.subr.bf16.mxu0 %v9338_v25  ;;  %8782 = vmatprep.subr.bf16.mxu1 %v9338_v25 }
 0x550   :  { %8747 = vmatpush3.bf16.msra.mxu0 %v9140_v60  ;;  %8783 = vmatpush3.bf16.msra.mxu1 %v9141_v58 }
 0x551   :  { %8748 = vmatprep.subr.bf16.mxu0 %v9338_v25  ;;  %8784 = vmatprep.subr.bf16.mxu1 %v9338_v25 }
 0x554   :  { %8749 = vmatpush3.bf16.msra.mxu0 %v9142_v23  ;;  %8785 = vmatpush3.bf16.msra.mxu1 %v9143_v20 }
 0x555   :  { %8766 = vmatprep.subr.bf16.mxu0 %v9338_v25  ;;  %8802 = vmatprep.subr.bf16.mxu1 %v9338_v25 }
 0x557   :  { %8751 = vmatmul.mubr.msk.bf16.vlgmr.msra.gmra.mxu0 %vm5773_vm6, %v6024_v1  ;;  %8787 = vmatmul.mubr.msk.bf16.vlgmr.msra.gmra.mxu1 %vm5773_vm6, %v6261_v24 }
 0x558   :  { %8767 = vmatpush3.bf16.msra.mxu0 %v9144_v16  ;;  %8803 = vmatpush3.bf16.msra.mxu1 %v9145_v30 }
 0x559   :  { %8768 = vmatprep.subr.bf16.mxu0 %v9338_v25  ;;  %8804 = vmatprep.subr.bf16.mxu1 %v9338_v25 }
 0x55a   :  { %8774 = vmatprep.mubr.msk.bf16.mxu0 %vm9339_vm5, %v9338_v25  ;;  %8810 = vmatprep.mubr.msk.bf16.mxu1 %vm9339_vm5, %v9338_v25 }
 0x55c   :  { %8769 = vmatpush3.bf16.msra.mxu0 %v9146_v36  ;;  %8805 = vmatpush3.bf16.msra.mxu1 %v9147_v45 }
 0x55d   :  { %8770 = vmatprep.subr.bf16.mxu0 %v9338_v25  ;;  %8806 = vmatprep.subr.bf16.mxu1 %v9338_v25 }
 0x560   :  { %8771 = vmatpush3.bf16.msra.mxu0 %v9148_v61  ;;  %8807 = vmatpush3.bf16.msra.mxu1 %v9149_v15 }
 0x561   :  { %8772 = vmatprep.subr.bf16.mxu0 %v9338_v25  ;;  %8808 = vmatprep.subr.bf16.mxu1 %v9338_v25 }
 0x564   :  { %8773 = vmatpush3.bf16.msra.mxu0 %v9150_v8  ;;  %8809 = vmatpush3.bf16.msra.mxu1 %v9151_v55 }
 0x565   :  { %8790 = vmatprep.subr.bf16.mxu0 %v9338_v25  ;;  %8822 = vmatprep.subr.bf16.mxu1 %v9338_v25 }
 0x567   :  { %8775 = vmatmul.mubr.msk.bf16.vlgmr.msra.gmra.mxu0 %vm5773_vm6, %v6182_v32  ;;  %8811 = vmatmul.mubr.msk.bf16.vlgmr.msra.gmra.mxu1 %vm5773_vm6, %v6419_v3  ;;  %v6560_v32 = vld [vmem:[%s12770_s19] sm:$0x3] }
 0x568   :  { %8791 = vmatpush3.bf16.msra.mxu0 %v9152_v29  ;;  %8798 = vmatprep.mubr.msk.bf16.mxu0 %vm9339_vm5, %v9338_v25 }
 0x569   :  { %8792 = vmatprep.subr.bf16.mxu0 %v9338_v25  ;;  %8826 = vmatprep.mubr.msk.bf16.mxu1 %vm9339_vm5, %v9338_v25 }
 0x56c   :  { %8793 = vmatpush3.bf16.msra.mxu0 %v9153_v33 }
 0x56d   :  { %8794 = vmatprep.subr.bf16.mxu0 %v9338_v25 }
 0x570   :  { %8795 = vmatpush3.bf16.msra.mxu0 %v9154_v27 }
 0x571   :  { %8796 = vmatprep.subr.bf16.mxu0 %v9338_v25 }
 0x574   :  { %8797 = vmatpush3.bf16.msra.mxu0 %v9155_v56 }
 0x575   :  { %8814 = vmatprep.subr.bf16.mxu0 %v9338_v25 }
 0x577   :  { %8799 = vmatmul.mubr.msk.bf16.vlgmr.msra.gmra.mxu0 %vm5773_vm6, %v6340_v12 }
 0x578   :  { %8815 = vmatpush3.bf16.msra.mxu0 %v9156_v46  ;;  %8818 = vmatprep.mubr.msk.bf16.mxu0 %vm9339_vm5, %v9338_v25 }
 0x579   :  { %8816 = vmatprep.subr.bf16.mxu0 %v9338_v25 }
 0x57c   :  { %8817 = vmatpush3.bf16.msra.mxu0 %v9157_v39 }
 0x57d   :  { %8830 = vmatprep.subr.bf16.mxu0 %v9338_v25 }
 0x57f   :  { %8819 = vmatmul.mubr.msk.bf16.vlgmr.msra.gmra.mxu0 %vm6515_vm7, %v6498_v38 }
 0x580   :  { %8834 = vmatprep.mubr.msk.bf16.mxu0 %vm9339_vm5, %v9338_v25 }
 0x5f7   :  { %v5852_v53 = vpop.f32.mrf.mxu0  ;;  %v6016_v42 = vpop.f32.mrf.mxu1 }
 0x5f8   :  { %v5864_v49 = vadd.f32 %v7696_v26, %v5852_v53  ;;  %v9158_v53 = vld [vmem:[%s12762_s11 + $0x8] sm:$0xff]  }
 0x5f9   :  { %v8716_v37 = vpop.f32.mrf.mxu0  ;;  %v8740_v59 = vpop.f32.mrf.mxu1  ;;  %8831 = vmatpush3.bf16.msra.mxu0 %v9158_v53 }
 0x5fa   :  { %v9160_v37 = vld [vmem:[%s12762_s11] sm:$0xff]   ;;  %8832 = vmatprep.subr.bf16.mxu0 %v9338_v25 }
 0x5fb   :  { %v5855_v57 = vpop.f32.mrf.mxu0  ;;  %v6019_v41 = vpop.f32.mrf.mxu1  ;;  %v9161_v59 = vld [vmem:[%s12761_s10] sm:$0xff]  }
 0x5fc   :  { %v6660_v57 = vld [vmem:[%s12771_s20] sm:$0x3] }
 0x5fd   :  { %v8717_v22 = vpop.f32.mrf.mxu0  ;;  %v8741_v9 = vpop.f32.mrf.mxu1  ;;  %v6661_v41 = vpack.c.bf16 %v6660_v57, %v6660_v57  ;;  %8833 = vmatpush3.bf16.msra.mxu0 %v9160_v37 }
 0x5fe   :  { %8846 = vmatprep.subr.bf16.mxu0 %v9338_v25 }
 0x600   :  { %8835 = vmatmul.mubr.msk.bf16.vlgmr.msra.gmra.mxu0 %vm6515_vm7, %v6661_v41 }
 0x601   :  { %8850 = vmatprep.mubr.msk.bf16.mxu0 %vm9339_vm5, %v9338_v25 }
 0x607   :  { %v5937_v47 = vpop.f32.mrf.mxu0  ;;  %v6174_v50 = vpop.f32.mrf.mxu1 }
 0x608   :  { %v5943_v5 = vadd.f32 %v5937_v47, %v5864_v49 }
 0x609   :  { %v8728_v54 = vpop.f32.mrf.mxu0  ;;  %v8764_v62 = vpop.f32.mrf.mxu1 }
 0x60a   :  { %v6022_v60 = vadd.f32 %v6016_v42, %v5943_v5  ;;  %v9159_v42 = vld [vmem:[%s12761_s10 + $0x8] sm:$0xff]   ;;  %v6722_v54 = vld [vmem:[%s12772_s21] sm:$0x3] }
 0x60b   :  { %v5940_v34 = vpop.f32.mrf.mxu0  ;;  %v6177_v40 = vpop.f32.mrf.mxu1  ;;  %8823 = vmatpush3.bf16.msra.mxu1 %v9159_v42 }
 0x60c   :  { %8824 = vmatprep.subr.bf16.mxu1 %v9338_v25 }
 0x60d   :  { %v8729_v51 = vpop.f32.mrf.mxu0  ;;  %v8765_v2 = vpop.f32.mrf.mxu1 }
 0x60e   :  { %v9162_v2 = vld [vmem:[%s12764_s13 + $0x8] sm:$0xff]  }
 0x60f   :  { %8825 = vmatpush3.bf16.msra.mxu1 %v9161_v59 }
 0x610   :  { %8838 = vmatprep.subr.bf16.mxu1 %v9338_v25 }
 0x617   :  { %v6095_v63 = vpop.f32.mrf.mxu0  ;;  %v6332_v6 = vpop.f32.mrf.mxu1 }
 0x618   :  { %v6101_v20 = vadd.f32 %v6095_v63, %v6022_v60 }
 0x619   :  { %v8752_v18 = vpop.f32.mrf.mxu0  ;;  %v8788_v44 = vpop.f32.mrf.mxu1 }
 0x61a   :  { %v6180_v19 = vadd.f32 %v6174_v50, %v6101_v20  ;;  %v7808_v18 = vld [vmem:[#allocation10] ss:$0 sm:$0xff] }
 0x61b   :  { %v6098_v7 = vpop.f32.mrf.mxu0  ;;  %v6335_v48 = vpop.f32.mrf.mxu1 }
 0x61d   :  { %v8753_v0 = vpop.f32.mrf.mxu0  ;;  %v8789_v11 = vpop.f32.mrf.mxu1 }
 0x627   :  { %v6253_v13 = vpop.f32.mrf.mxu0  ;;  %v6490_v4 = vpop.f32.mrf.mxu1 }
 0x628   :  { %v6259_v35 = vadd.f32 %v6253_v13, %v6180_v19 }
 0x629   :  { %v8776_v52 = vpop.f32.mrf.mxu0  ;;  %v8812_v17 = vpop.f32.mrf.mxu1 }
 0x62a   :  { %v6338_v30 = vadd.f32 %v6332_v6, %v6259_v35  ;;  %v9163_v6 = vld [vmem:[%s12764_s13] sm:$0xff]  }
 0x62b   :  { %v6256_v14 = vpop.f32.mrf.mxu0  ;;  %v6493_v31 = vpop.f32.mrf.mxu1 }
 0x62d   :  { %v8777_v58 = vpop.f32.mrf.mxu0  ;;  %v8813_v23 = vpop.f32.mrf.mxu1 }
 0x637   :  { %v6411_v16 = vpop.f32.mrf.mxu0 }
 0x638   :  { %v6417_v24 = vadd.f32 %v6411_v16, %v6338_v30  ;;  %v9164_v30 = vld [vmem:[%s12765_s14 + $0x8] sm:$0xff]  }
 0x639   :  { %v8800_v1 = vpop.f32.mrf.mxu0  ;;  %8847 = vmatpush3.bf16.msra.mxu0 %v9164_v30 }
 0x63a   :  { %v6496_v61 = vadd.f32 %v6490_v4, %v6417_v24  ;;  %v9165_v1 = vld [vmem:[%s12765_s14] sm:$0xff]   ;;  %8848 = vmatprep.subr.bf16.mxu0 %v9338_v25 }
 0x63b   :  { %v6414_v36 = vpop.f32.mrf.mxu0 }
 0x63d   :  { %v8801_v45 = vpop.f32.mrf.mxu0  ;;  %8849 = vmatpush3.bf16.msra.mxu0 %v9165_v1 }
 0x63f   :  { %v6553_v15 = vpop.f32.mrf.mxu0 }
 0x640   :  { %v6559_v8 = vadd.f32 %v6553_v15, %v6496_v61 }
 0x641   :  { %v8820_v55 = vpop.f32.mrf.mxu0 }
 0x642   :  { %9168 = vtanh.f32 %v6559_v8  ;;  %v7804_v3 = vmul.f32 -1.442695, %v6559_v8  ;;  %v9166_v8 = vld [vmem:[%s12767_s16 + $0x8] sm:$0xff]   ;;  %v9167_v55 = vld [vmem:[%s12767_s16] sm:$0xff]  }
 0x643   :  { %v6556_v43 = vpop.f32.mrf.mxu0 }
 0x644   :  { %9170 = vpow2.f32 %v7804_v3  ;;  %v7816_v43 = vld [vmem:[#allocation12] ss:$0 sm:$0xff] }
 0x645   :  { %v8821_v28 = vpop.f32.mrf.mxu0 }
 0x64f   :  { %v9169_v29 = vpop.eup %9168 }
 0x650   :  { %6574 = vrot.lane.b32.xlu0 %v9169_v29, %s9340_s9 }
 0x651   :  { %v9171_v33 = vpop.eup %9170 }
 0x652   :  { %v6564_v27 = vadd.f32 1.0, %v9171_v33 }
 0x654   :  { %6569 = vrot.lane.b32.xlu0 %v6560_v32, %s9341_s5  ;;  %9172 = vrcp.f32 %v6564_v27 }
 0x661   :  { %v9173_v56 = vpop.eup %9172 }
 0x6c0   :  { %v6715_v62 = vpop.f32.mrf.mxu0 }
 0x6c2   :  { %v6575_v10 = vpop.permute.xlu0 %6574  ;;  %v8836_v34 = vpop.f32.mrf.mxu0 }
 0x6c3   :  { %v6577_v46 = vmul.f32 %v9173_v56, %v6575_v10 }
 0x6c4   :  { %v6718_v40 = vpop.f32.mrf.mxu0 }
 0x6c5   :  { %6579 = vrot.lane.b32.xlu1 %v6577_v46, %s9341_s5  ;;  %v13044_v46 = vlaneseq }
 0x6c6   :  { %v6570_v12 = vpop.permute.xlu0 %6569  ;;  %v8837_v51 = vpop.f32.mrf.mxu0 }
 0x6c7   :  { %v6572_v39 = vmul.f32 %v9173_v56, %v6570_v12  ;;  %v6948_v12 = vand.u32 127, %v13044_v46 }
 0x6c9   :  { %vm6949_vm8 = vcmp.lt.s32.totalorder %v6948_v12, 3  ;;  %vm6964_vm14 = vcmp.eq.s32.totalorder %v6948_v12, 3 }
 0x737   :  { %v6580_v21 = vpop.permute.xlu1 %6579 }
 0x738   :  { %v12658_v38 = vadd.f32 %v6580_v21, %v6572_v39  ;;  %v7820_v39 = vld [vmem:[#allocation13] ss:$0 sm:$0xff] }
 0x73a   :  { %9174 = vtanh.f32 %v12658_v38 }
 0x747   :  { %v9175_v22 = vpop.eup %9174 }
 0x748   :  { %6585 = vrot.lane.b32.xlu1 %v9175_v22, %s9340_s9 }
 0x7ba   :  { %v6586_v9 = vpop.permute.xlu1 %6585 }
 0x7bb   :  { %v12684_v47 = vmul.f32 %v9173_v56, %v6586_v9 }
 0x7bd   :  { %v6590_v50 = vpack.c.bf16 %v12684_v47, %v12684_v47 }
 0x7bf   :  { %6596 = vrot.lane.b32.xlu0 %v6590_v50, %s9341_s5 }
 0x7c3   :  { %6731 = vrot.lane.b32.xlu0 %v6722_v54, %s9341_s5 }
 0x831   :  { %v6597_v63 = vpop.permute.xlu0 %6596 }
 0x832   :  { %8827 = vmatmul.mubr.msk.bf16.vlgmr.msra.gmra.mxu1 %vm6515_vm7, %v6597_v63 }
 0x833   :  { %8839 = vmatpush3.bf16.msra.mxu1 %v9162_v2  ;;  %8842 = vmatprep.mubr.msk.bf16.mxu1 %vm9339_vm5, %v9338_v25 }
 0x834   :  { %8840 = vmatprep.subr.bf16.mxu1 %v9338_v25 }
 0x835   :  { %v6732_v20 = vpop.permute.xlu0 %6731 }
 0x837   :  { %8841 = vmatpush3.bf16.msra.mxu1 %v9163_v6 }
 0x838   :  { %8854 = vmatprep.subr.bf16.mxu1 %v9338_v25 }
 0x83a   :  { %8843 = vmatmul.mubr.msk.bf16.vlgmr.msra.gmra.mxu1 %vm6515_vm7, %v6597_v63 }
 0x83b   :  { %8858 = vmatprep.mubr.msk.bf16.mxu1 %vm9339_vm5, %v9338_v25  ;;  %8855 = vmatpush3.bf16.msra.mxu1 %v9166_v8 }
 0x83c   :  { %8856 = vmatprep.subr.bf16.mxu1 %v9338_v25 }
 0x83f   :  { %8857 = vmatpush3.bf16.msra.mxu1 %v9167_v55 }
 0x8f2   :  { %v6647_v44 = vpop.f32.mrf.mxu1 }
 0x8f3   :  { %v6659_v7 = vadd.f32 %v7808_v18, %v6647_v44 }
 0x8f4   :  { %v8828_v48 = vpop.f32.mrf.mxu1 }
 0x8f5   :  { %v6721_v0 = vadd.f32 %v6715_v62, %v6659_v7 }
 0x8f6   :  { %v6650_v11 = vpop.f32.mrf.mxu1 }
 0x8f7   :  { %9176 = vtanh.f32 %v6721_v0  ;;  %v7812_v17 = vmul.f32 -1.442695, %v6721_v0 }
 0x8f8   :  { %v8829_v26 = vpop.f32.mrf.mxu1 }
 0x8f9   :  { %9178 = vpow2.f32 %v7812_v17 }
 0x8fa   :  { %v6802_v49 = vpop.f32.mrf.mxu1 }
 0x8fb   :  { %v6814_v28 = vadd.f32 %v7816_v43, %v6802_v49 }
 0x8fc   :  { %v8844_v13 = vpop.f32.mrf.mxu1 }
 0x8fe   :  { %v6805_v4 = vpop.f32.mrf.mxu1 }
 0x900   :  { %v8845_v5 = vpop.f32.mrf.mxu1 }
 0x904   :  { %v9177_v52 = vpop.eup %9176 }
 0x905   :  { %6736 = vrot.lane.b32.xlu1 %v9177_v52, %s9340_s9 }
 0x906   :  { %v9179_v14 = vpop.eup %9178 }
 0x907   :  { %v6726_v31 = vadd.f32 1.0, %v9179_v14 }
 0x909   :  { %9180 = vrcp.f32 %v6726_v31 }
 0x916   :  { %v9181_v60 = vpop.eup %9180 }
 0x917   :  { %v6734_v19 = vmul.f32 %v9181_v60, %v6732_v20 }
 0x977   :  { %v6737_v58 = vpop.permute.xlu1 %6736 }
 0x978   :  { %v6739_v23 = vmul.f32 %v9181_v60, %v6737_v58 }
 0x97a   :  { %6741 = vrot.lane.b32.xlu1 %v6739_v23, %s9341_s5 }
 0x9ec   :  { %v6742_v35 = vpop.permute.xlu1 %6741 }
 0x9ed   :  { %v6744_v16 = vadd.f32 %v6742_v35, %v6734_v19 }
 0x9ef   :  { %9182 = vtanh.f32 %v6744_v16 }
 0x9fc   :  { %v9183_v24 = vpop.eup %9182 }
 0x9fd   :  { %6747 = vrot.lane.b32.xlu0 %v9183_v24, %s9340_s9 }
 0xa6f   :  { %v6748_v36 = vpop.permute.xlu0 %6747 }
 0xa70   :  { %v6750_v45 = vmul.f32 %v9181_v60, %v6748_v36 }
 0xa72   :  { %v6815_v61 = vpack.c.bf16 %v6750_v45, %v6750_v45 }
 0xa74   :  { %6821 = vrot.lane.b32.xlu1 %v6815_v61, %s9341_s5 }
 0xae6   :  { %v6822_v15 = vpop.permute.xlu1 %6821 }
 0xae7   :  { %8851 = vmatmul.mubr.msk.bf16.vlgmr.msra.gmra.mxu0 %vm6515_vm7, %v6822_v15 }
 0xba7   :  { %v6872_v29 = vpop.f32.mrf.mxu0 }
 0xba8   :  { %v6878_v32 = vadd.f32 %v6872_v29, %v6814_v28 }
 0xba9   :  { %v8852_v3 = vpop.f32.mrf.mxu0 }
 0xbaa   :  { %v6879_v33 = vmax.f32 %v6878_v32, 0.0 }
 0xbab   :  { %v6875_v27 = vpop.f32.mrf.mxu0 }
 0xbac   :  { %v6880_v56 = vpack.c.bf16 %v6879_v33, %v6879_v33 }
 0xbad   :  { %v8853_v10 = vpop.f32.mrf.mxu0 }
 0xbae   :  { %8859 = vmatmul.mubr.msk.bf16.vlgmr.msra.gmra.mxu1 %vm6515_vm7, %v6880_v56 }
 0xc6e   :  { %v6941_v21 = vpop.f32.mrf.mxu1 }
 0xc6f   :  { %v6942_v53 = vadd.f32 %v7820_v39, %v6941_v21 }
 0xc70   :  { %v8860_v25 = vpop.f32.mrf.mxu1 }
 0xc71   :  { %v6950_v42 = vsel %vm6949_vm8, %v6942_v53, -1e+30 }
 0xc72   :  { %v6944_v37 = vpop.f32.mrf.mxu1  ;;  %v6952_v59 = vsel %vm6951_vm9, %v6950_v42, -inf }
 0xc73   :  { %6953 = vmax.xlane.f32.xlu0 %v6952_v59 }
 0xc74   :  { %v8861_v57 = vpop.f32.mrf.mxu1 }
 0xc89   :  { %6968 = vrot.lane.b32.xlu0 %v12684_v47, %s9341_s5 }
 0xc8d   :  { %6982 = vrot.lane.b32.xlu0 %v6744_v16, %s9340_s9  ;;  %s9342_s9 = smov 96  }
 0xcfc   :  { %v6954_v41 = vpop.xlane.xlu0 %6953 }
 0xcfd   :  { %v6955_v22 = vsub.f32 %v6950_v42, %v6954_v41 }
 0xcff   :  { %v6956_v9 = vmul.f32 1.442695, %v6955_v22 }
 0xd00   :  { %v6969_v50 = vpop.permute.xlu0 %6968 }
 0xd01   :  { %9184 = vpow2.f32 %v6956_v9  ;;  %6972 = vst.msk [vmem:[%s12774_s23] sm:$0x3] %vm6971_vm10, %v6969_v50 }
 0xd02   :  { %6974 = vst.msk [vmem:[%s12774_s23] sm:$0x3] %vm6973_vm11, %v12658_v38 }
 0xd04   :  { %v6983_v51 = vpop.permute.xlu0 %6982 }
 0xd0e   :  { %v9185_v54 = vpop.eup %9184 }
 0xd0f   :  { %v6958_v47 = vsel %vm6949_vm8, %v9185_v54, 0.0 }
 0xd10   :  { %v6959_v62 = vsel %vm6951_vm9, %v6958_v47, 0.0 }
 0xd11   :  { %6960 = vadd.xlane.f32.xlu1 %v6959_v62 }
 0xd22   :  { %6976 = vrot.lane.b32.xlu1 %v6750_v45, %s9342_s9 }
 0xd9a   :  { %v6961_v34 = vpop.xlane.xlu1 %6960 }
 0xd9b   :  { %9186 = vrcp.f32 %v6961_v34 }
 0xd9e   :  { %v6977_v40 = vpop.permute.xlu1 %6976 }
 0xd9f   :  { %6980 = vst.msk [vmem:[%s12774_s23] sm:$0x3] %vm6979_vm12, %v6977_v40 }
 0xda0   :  { %6986 = vst.msk [vmem:[%s12774_s23] sm:$0x3] %vm6985_vm13, %v6983_v51 }
 0xda8   :  { %v9187_v38 = vpop.eup %9186 }
 0xda9   :  { %v6963_v2 = vmul.f32 %v9187_v38, %v6958_v47 }
 0xdab   :  { %v6965_v63 = vsel %vm6964_vm14, %v6942_v53, %v6963_v2 }
 0xdac   :  { %6966 = vst [vmem:[%s12773_s22] sm:$0x3] %v6965_v63 }
 0xdad   :  { %6995 = vsyncpa [#allocation6], 1 }
 0xdae   :  { %6996 = vsyncpa [#allocation8], 1 }
 0xdaf   :  { %6997 = vsyncpa [#allocation11], 1 }
 0xdb0   :  { %6998 = vsyncpa [#allocation14], 1 }

</bundles_post_ra>
